<compile_context>
chip_gen: v7x
topology: tpu7x:2x2x1
jax: 0.10.0
libtpu: 0.0.40
codegen_flags: <defaults>
</compile_context>

<pallas_src>
import functools

import jax
import jax.numpy as jnp
from jax.experimental import pallas as pl
from jax.experimental.pallas import tpu as pltpu


def _round_up(v, m):
    return (v + m - 1) // m * m


def _wavenet_kernel(x_ref, wc_ref, wrs_ref, bias_ref, out_ref, skips_ref,
                    halo_ref, *, dilations, t_halo, compute_dtype):
    """Whole ConvWavenet forward for one (batch, T-tile) grid step.

    x_ref    : (1, C, Tt)      input signal tile
    wc_ref   : (L, 2, C, C)    per-layer conv taps [w0, w1]
    wrs_ref  : (L, 2C, C)      per-layer [wr ; ws] (residual / skip 1x1 convs)
    bias_ref : (C, 3L)         lane-dense biases, cols (3l, 3l+1, 3l+2)=(bc,br,bs)
    out_ref  : (1, C, Tt)      final layer output tile
    skips_ref: (1, L, C, Tt)   per-layer skip outputs (per-batch contiguous slab)
    halo_ref : (L, C, t_halo)  VMEM scratch: each layer's input tail from the
                               previous T tile (causal history carry)
    """
    C = x_ref.shape[1]
    Tt = x_ref.shape[2]
    t_id = pl.program_id(1)

    # Fresh causal history at the start of each batch element's time chain.
    @pl.when(t_id == 0)
    def _():
        halo_ref[...] = jnp.zeros_like(halo_ref)

    x_cur = x_ref[0].astype(jnp.float32)                       # (C, Tt), resident

    # Global time index, (1, Tt): only tile 0 actually masks anything
    # (F.pad's exact zeros in the first `d` samples of the sequence).
    g_t = t_id * Tt + jax.lax.broadcasted_iota(jnp.int32, (1, Tt), 1)
    masks = {}

    for l, d in enumerate(dilations):
        if d not in masks:
            masks[d] = g_t >= d

        # Causal shift with cross-tile halo: prev[:, t] = x(global t - d).
        prev = jnp.concatenate(
            [halo_ref[l, :, t_halo - d:], x_cur[:, :Tt - d]], axis=1)  # (C, Tt)
        # Save this layer's input tail for the next T tile (read old halo above
        # before overwriting).
        halo_ref[l] = x_cur[:, Tt - t_halo:]

        xc = x_cur.astype(compute_dtype)
        xp = prev.astype(compute_dtype)

        # Dilated causal conv taps: two MXU passes, no (2C,Tt) concat copy.
        y = (jnp.dot(wc_ref[l, 0], xp, preferred_element_type=jnp.float32)
             + jnp.dot(wc_ref[l, 1], xc, preferred_element_type=jnp.float32))
        y = y + bias_ref[:, 3 * l:3 * l + 1]                    # conv bias (C,1)
        # F.pad(conv_out, [d, 0]): the first d global time-steps are exactly 0.
        y = jnp.where(masks[d], y, 0.0)
        y = jnp.sin(y)

        # Residual + skip 1x1 convs in one MXU pass; split the (2C, Tt) result.
        rs = jnp.dot(wrs_ref[l], y.astype(compute_dtype),
                     preferred_element_type=jnp.float32)        # (2C, Tt)
        res = rs[:C] + bias_ref[:, 3 * l + 1:3 * l + 2]
        skip = rs[C:] + bias_ref[:, 3 * l + 2:3 * l + 3]

        skips_ref[0, l] = skip.astype(skips_ref.dtype)
        x_cur = (res + x_cur) * 0.5

    out_ref[0] = x_cur.astype(out_ref.dtype)


def _pack_params(layer_params, compute_dtype):
    """Pack per-layer params into 3 slabs so the kernel has few, dense DMAs."""
    wc = jnp.stack([jnp.stack([p["w0"], p["w1"]], axis=0)
                    for p in layer_params]).astype(compute_dtype)      # (L, 2, C, C)
    wrs = jnp.stack([jnp.concatenate([p["wr"], p["ws"]], axis=0)
                     for p in layer_params]).astype(compute_dtype)     # (L, 2C, C)
    bias_cols = []
    for p in layer_params:
        bias_cols += [p["bc"], p["br"], p["bs"]]                       # each (C,1)
    bias = jnp.concatenate(bias_cols, axis=1).astype(jnp.float32)      # (C, 3L)
    dilations = tuple(int(p["dilation"]) for p in layer_params)
    return wc, wrs, bias, dilations


def _pick_t_tile(T, max_d, target=512):
    """Largest T-tile <= target (multiple of 128, divides T, >= max dilation)."""
    m = T // 128
    divisors = [128 * k for k in range(1, m + 1) if m % k == 0]
    ok = [d for d in divisors if d >= max_d]
    under = [d for d in ok if d <= target]
    if under:
        return under[-1]
    return ok[0] if ok else T


def conv_wavenet_forward(x, layer_params, *, compute_dtype=jnp.bfloat16,
                         skips_dtype=jnp.bfloat16, t_tile=None):
    """ConvWavenet.forward.

    x: (B, C, T) float32.
    Returns (out, skips) with out (B, C, T) in x.dtype and skips stacked as a
    single (B, L, C, T) array in `skips_dtype` (callers needing the PyTorch
    per-layer list can index skips[:, l]).
    """
    B, C, T = x.shape
    wc, wrs, bias, dilations = _pack_params(layer_params, compute_dtype)
    L = len(dilations)
    max_d = max(dilations)

    assert C % 8 == 0 and T % 128 == 0, "C must be 8-aligned, T 128-aligned"
    if jnp.dtype(compute_dtype) != jnp.dtype(jnp.float32):
        assert C % 16 == 0, "bf16 MXU path needs C % 16 == 0 (sublane packing)"
    assert max_d < T, "dilation must be smaller than the sequence length"

    if t_tile is None:
        t_tile = _pick_t_tile(T, max_d)
    assert t_tile % 128 == 0 and T % t_tile == 0, "t_tile must be 128-aligned and divide T"
    assert max_d <= t_tile, "t_tile must cover the largest dilation (single-tile halo)"
    n_t = T // t_tile
    t_halo = max_d

    kern = functools.partial(_wavenet_kernel, dilations=dilations,
                             t_halo=t_halo, compute_dtype=compute_dtype)

    # ---- explicit VMEM budget from the actual (double-buffered) block shapes.
    cb = jnp.dtype(compute_dtype).itemsize
    sb = jnp.dtype(skips_dtype).itemsize
    lane_T = _round_up(t_tile, 128)
    lane_C = _round_up(C, 128)
    blk = (C * lane_T * 4                      # x
           + C * lane_T * 4                    # out
           + L * C * lane_T * sb               # skips
           + L * 2 * C * lane_C * cb           # wc
           + L * 2 * C * lane_C * cb           # wrs
           + C * _round_up(3 * L, 128) * 4)    # bias
    halo_bytes = L * C * _round_up(t_halo, 128) * 4
    work = 8 * C * lane_T * 4                  # live f32 temporaries in the layer loop
    need = 2 * blk + halo_bytes + work         # pipeline blocks are double-buffered
    try:
        phys_vmem = int(pltpu.get_tpu_info().vmem_capacity_bytes)
    except Exception:
        phys_vmem = 64 * 1024 * 1024           # conservative (v7x per-core)
    vmem_limit = min(max(int(need * 2), 32 * 1024 * 1024), int(phys_vmem * 0.8))

    out, skips = pl.pallas_call(
        kern,
        out_shape=(jax.ShapeDtypeStruct((B, C, T), x.dtype),
                   jax.ShapeDtypeStruct((B, L, C, T), skips_dtype)),
        grid_spec=pltpu.PrefetchScalarGridSpec(
            num_scalar_prefetch=0,
            grid=(B, n_t),
            in_specs=[
                pl.BlockSpec((1, C, t_tile), lambda b, t: (b, 0, t)),        # signal
                pl.BlockSpec((L, 2, C, C), lambda b, t: (0, 0, 0, 0)),       # conv taps
                pl.BlockSpec((L, 2 * C, C), lambda b, t: (0, 0, 0)),         # res/skip
                pl.BlockSpec((C, 3 * L), lambda b, t: (0, 0)),               # biases
            ],
            out_specs=[
                pl.BlockSpec((1, C, t_tile), lambda b, t: (b, 0, t)),
                pl.BlockSpec((1, L, C, t_tile), lambda b, t: (b, 0, 0, t)),
            ],
            scratch_shapes=[pltpu.VMEM((L, C, t_halo), jnp.float32)],        # halo
        ),
        compiler_params=pltpu.CompilerParams(
            dimension_semantics=("parallel", "arbitrary"),
            vmem_limit_bytes=vmem_limit),
    )(x, wc, wrs, bias)
    return out, skips


def init_params(key, channels, blocks, layers_per_block, conv_len):
    """Deterministic synthetic init mirroring the PyTorch shapes."""
    assert conv_len == 2, "kernel specialized to conv_len=2 (module default)"
    C = channels
    layers = []
    for _ in range(blocks):
        for l in range(layers_per_block):
            key, *ks = jax.random.split(key, 7)
            bound_conv = 1.0 / jnp.sqrt(C * conv_len)
            bound_pw = jnp.sqrt(6.0 / C)
            bound_b = 1.0 / jnp.sqrt(float(C))
            wconv = jax.random.uniform(ks[0], (C, C, conv_len), jnp.float32,
                                       -bound_conv, bound_conv)
            layers.append({
                "w0": wconv[:, :, 0],
                "w1": wconv[:, :, 1],
                "bc": jax.random.uniform(ks[1], (C, 1), jnp.float32,
                                         -bound_conv, bound_conv),
                "wr": jax.random.uniform(ks[2], (C, C), jnp.float32,
                                         -bound_pw, bound_pw),
                "br": jax.random.uniform(ks[3], (C, 1), jnp.float32,
                                         -bound_b, bound_b),
                "ws": jax.random.uniform(ks[4], (C, C), jnp.float32,
                                         -bound_pw, bound_pw),
                "bs": jax.random.uniform(ks[5], (C, 1), jnp.float32,
                                         -bound_b, bound_b),
                "dilation": 2 ** l,
            })
    return layers


# ---- pure-JAX reference (correctness sanity check) ----
def ref_convblock(x, p, d):
    w = jnp.stack([p["w0"], p["w1"]], axis=-1)      # (C_out, C_in, K)
    y = jax.lax.conv_general_dilated(
        x, w, window_strides=(1,), padding="VALID", rhs_dilation=(d,),
        dimension_numbers=("NCH", "OIH", "NCH"))
    y = y + p["bc"][None]
    pad = d * (2 - 1)
    y = jnp.pad(y, ((0, 0), (0, 0), (pad, 0)))
    y = jnp.sin(y)
    res = jnp.einsum("oc,bct->bot", p["wr"], y) + p["br"][None]
    skip = jnp.einsum("oc,bct->bot", p["ws"], y) + p["bs"][None]
    return (res + x) / 2.0, skip


if __name__ == "__main__":
    # Small ConvWavenet: channels=32, blocks=2, layers_per_block=3, conv_len=2.
    # T=256 with t_tile=128 exercises the cross-tile causal halo path.
    channels, blocks, layers_per_block, conv_len = 32, 2, 3, 2
    B, T, t_tile = 2, 256, 128

    key = jax.random.PRNGKey(0)
    kp, kx = jax.random.split(key)
    layers = init_params(kp, channels, blocks, layers_per_block, conv_len)
    x = jax.random.normal(kx, (B, channels, T), jnp.float32)

    # Pure-JAX reference.
    xr = x
    ref_skips = []
    for p in layers:
        xr, sk = ref_convblock(xr, p, p["dilation"])
        ref_skips.append(sk)

    # f32 MXU path + f32 skips: strict check (also validates the halo carry).
    out, skips = conv_wavenet_forward(x, layers, compute_dtype=jnp.float32,
                                      skips_dtype=jnp.float32, t_tile=t_tile)
    out = jax.block_until_ready(out)
    skips = jax.block_until_ready(skips)
    assert jnp.allclose(out, xr, atol=1e-4, rtol=1e-4), "output mismatch (f32)"
    for l in range(len(layers)):
        assert jnp.allclose(skips[:, l], ref_skips[l], atol=1e-4, rtol=1e-4), \
            f"skip {l} mismatch (f32)"

    # Default perf config: bf16 MXU inputs + bf16 skips (f32 accumulation).
    out_bf, skips_bf = conv_wavenet_forward(x, layers, t_tile=t_tile)
    out_bf = jax.block_until_ready(out_bf)
    skips_bf = jax.block_until_ready(skips_bf)
    assert jnp.allclose(out_bf, xr, atol=1e-1, rtol=1e-1), "output mismatch (bf16)"
    for l in range(len(layers)):
        assert jnp.allclose(skips_bf[:, l].astype(jnp.float32), ref_skips[l],
                            atol=1e-1, rtol=1e-1), f"skip {l} mismatch (bf16)"

    print("KERNEL_OK")
</pallas_src>

<mosaic_0001>
module attributes {stable_mosaic.version = 11 : i64} {
  func.func @_wavenet_kernel(%arg0: i32, %arg1: i32, %arg2: memref<1x32x128xf32, #tpu.memory_space<vmem>>, %arg3: memref<6x2x32x32xf32, #tpu.memory_space<vmem>>, %arg4: memref<6x64x32xf32, #tpu.memory_space<vmem>>, %arg5: memref<32x18xf32, #tpu.memory_space<vmem>>, %arg6: memref<1x32x128xf32, #tpu.memory_space<vmem>>, %arg7: memref<1x6x32x128xf32, #tpu.memory_space<vmem>>, %arg8: memref<6x32x4xf32, #tpu.memory_space<vmem>>) attributes {dimension_semantics = [#tpu.dimension_semantics<parallel>, #tpu.dimension_semantics<arbitrary>], iteration_bounds = array<i64: 2, 2>, scalar_prefetch = 0 : i64, scratch_operands = 1 : i64, tpu.core_type = #tpu.core_type<tc>, window_params = [{transform_indices = @transform_0, window_bounds = array<i64: 1, 32, 128>}, {pipeline_mode = #tpu.pipeline_mode<synchronous>, transform_indices = @transform_1, window_bounds = array<i64: 6, 2, 32, 32>}, {pipeline_mode = #tpu.pipeline_mode<synchronous>, transform_indices = @transform_2, window_bounds = array<i64: 6, 64, 32>}, {pipeline_mode = #tpu.pipeline_mode<synchronous>, transform_indices = @transform_3, window_bounds = array<i64: 32, 18>}, {transform_indices = @transform_4, window_bounds = array<i64: 1, 32, 128>}, {transform_indices = @transform_5, window_bounds = array<i64: 1, 6, 32, 128>}]} {
    %c0_i32 = arith.constant 0 : i32
    %0 = arith.cmpi eq, %arg1, %c0_i32 : i32
    %1 = arith.extui %0 : i1 to i32
    %c0_i32_0 = arith.constant 0 : i32
    %2 = arith.cmpi ne, %1, %c0_i32_0 : i32
    scf.if %2 {
      %cst_180 = arith.constant 0.000000e+00 : f32
      %258 = vector.broadcast %cst_180 : f32 to vector<6x32x4xf32>
      %c0_181 = arith.constant 0 : index
      %c0_182 = arith.constant 0 : index
      %c0_183 = arith.constant 0 : index
      %259 = vector.load %arg8[%c0_181, %c0_182, %c0_183] : memref<6x32x4xf32, #tpu.memory_space<vmem>>, vector<6x32x4xf32>
      tpu.vector_store %arg8[%c0_181, %c0_182, %c0_183], %258 {strides = array<i32>} : memref<6x32x4xf32, #tpu.memory_space<vmem>>, vector<6x32x4xf32>,
    } else {
    }
    %c0 = arith.constant 0 : index
    %c0_1 = arith.constant 0 : index
    %c0_2 = arith.constant 0 : index
    %3 = vector.load %arg2[%c0, %c0_1, %c0_2] : memref<1x32x128xf32, #tpu.memory_space<vmem>>, vector<1x32x128xf32>
    %4 = vector.shape_cast %3 : vector<1x32x128xf32> to vector<32x128xf32>
    %c128_i32 = arith.constant 128 : i32
    %5 = arith.muli %arg1, %c128_i32 : i32
    %6 = tpu.iota {dimensions = array<i32: 1>} : vector<1x128xi32>
    %7 = vector.broadcast %5 : i32 to vector<1x128xi32>
    %8 = arith.addi %7, %6 : vector<1x128xi32>
    %c1_i32 = arith.constant 1 : i32
    %9 = vector.broadcast %c1_i32 : i32 to vector<1x128xi32>
    %10 = arith.cmpi sge, %8, %9 : vector<1x128xi32>
    %c0_3 = arith.constant 0 : index
    %c0_4 = arith.constant 0 : index
    %c3 = arith.constant 3 : index
    %11 = vector.load %arg8[%c0_3, %c0_4, %c3] : memref<6x32x4xf32, #tpu.memory_space<vmem>>, vector<1x32x1xf32>
    %12 = vector.shape_cast %11 : vector<1x32x1xf32> to vector<32x1xf32>
    %13 = vector.extract_strided_slice %4 {offsets = [0, 0], sizes = [32, 127], strides = [1, 1]} : vector<32x128xf32> to vector<32x127xf32>
    %14 = tpu.concatenate %12, %13 in 1 : vector<32x1xf32>, vector<32x127xf32> -> vector<32x128xf32>
    %15 = vector.extract_strided_slice %4 {offsets = [0, 124], sizes = [32, 4], strides = [1, 1]} : vector<32x128xf32> to vector<32x4xf32>
    %c0_5 = arith.constant 0 : index
    %c0_6 = arith.constant 0 : index
    %c0_7 = arith.constant 0 : index
    %16 = vector.load %arg8[%c0_5, %c0_6, %c0_7] : memref<6x32x4xf32, #tpu.memory_space<vmem>>, vector<1x32x4xf32>
    %17 = vector.shape_cast %16 : vector<1x32x4xf32> to vector<32x4xf32>
    %18 = vector.shape_cast %15 : vector<32x4xf32> to vector<1x32x4xf32>
    tpu.vector_store %arg8[%c0_5, %c0_6, %c0_7], %18 {strides = array<i32>} : memref<6x32x4xf32, #tpu.memory_space<vmem>>, vector<1x32x4xf32>,
    %c0_8 = arith.constant 0 : index
    %c0_9 = arith.constant 0 : index
    %c0_10 = arith.constant 0 : index
    %c0_11 = arith.constant 0 : index
    %19 = vector.load %arg3[%c0_8, %c0_9, %c0_10, %c0_11] : memref<6x2x32x32xf32, #tpu.memory_space<vmem>>, vector<1x1x32x32xf32>
    %20 = vector.shape_cast %19 : vector<1x1x32x32xf32> to vector<32x32xf32>
    %cst = arith.constant dense<0.000000e+00> : vector<32x128xf32>
    %21 = tpu.matmul %20, %14, %cst {dimension_numbers = #tpu.dot_dimension_numbers<[1], [0], [0], [1], [0, 0, 1, 1], [], []>} : vector<32x32xf32>, vector<32x128xf32>, vector<32x128xf32> -> vector<32x128xf32>
    %c0_12 = arith.constant 0 : index
    %c1 = arith.constant 1 : index
    %c0_13 = arith.constant 0 : index
    %c0_14 = arith.constant 0 : index
    %22 = vector.load %arg3[%c0_12, %c1, %c0_13, %c0_14] : memref<6x2x32x32xf32, #tpu.memory_space<vmem>>, vector<1x1x32x32xf32>
    %23 = vector.shape_cast %22 : vector<1x1x32x32xf32> to vector<32x32xf32>
    %cst_15 = arith.constant dense<0.000000e+00> : vector<32x128xf32>
    %24 = tpu.matmul %23, %4, %cst_15 {dimension_numbers = #tpu.dot_dimension_numbers<[1], [0], [0], [1], [0, 0, 1, 1], [], []>} : vector<32x32xf32>, vector<32x128xf32>, vector<32x128xf32> -> vector<32x128xf32>
    %25 = arith.addf %21, %24 : vector<32x128xf32>
    %c0_16 = arith.constant 0 : index
    %c0_17 = arith.constant 0 : index
    %26 = vector.load %arg5[%c0_16, %c0_17] : memref<32x18xf32, #tpu.memory_space<vmem>>, vector<32x1xf32>
    %27 = vector.broadcast %26 : vector<32x1xf32> to vector<32x128xf32>
    %28 = arith.addf %25, %27 : vector<32x128xf32>
    %cst_18 = arith.constant 0.000000e+00 : f32
    %29 = vector.shape_cast %10 : vector<1x128xi1> to vector<1x128xi1>
    %30 = vector.broadcast %29 : vector<1x128xi1> to vector<32x128xi1>
    %31 = vector.broadcast %cst_18 : f32 to vector<32x128xf32>
    %32 = arith.select %30, %28, %31 : vector<32x128xi1>, vector<32x128xf32>
    %33 = math.sin %32 : vector<32x128xf32>
    %c0_19 = arith.constant 0 : index
    %c0_20 = arith.constant 0 : index
    %c0_21 = arith.constant 0 : index
    %34 = vector.load %arg4[%c0_19, %c0_20, %c0_21] : memref<6x64x32xf32, #tpu.memory_space<vmem>>, vector<1x64x32xf32>
    %35 = vector.shape_cast %34 : vector<1x64x32xf32> to vector<64x32xf32>
    %cst_22 = arith.constant dense<0.000000e+00> : vector<64x128xf32>
    %36 = tpu.matmul %35, %33, %cst_22 {dimension_numbers = #tpu.dot_dimension_numbers<[1], [0], [0], [1], [0, 0, 1, 1], [], []>} : vector<64x32xf32>, vector<32x128xf32>, vector<64x128xf32> -> vector<64x128xf32>
    %37 = vector.extract_strided_slice %36 {offsets = [0, 0], sizes = [32, 128], strides = [1, 1]} : vector<64x128xf32> to vector<32x128xf32>
    %c0_23 = arith.constant 0 : index
    %c1_24 = arith.constant 1 : index
    %38 = vector.load %arg5[%c0_23, %c1_24] : memref<32x18xf32, #tpu.memory_space<vmem>>, vector<32x1xf32>
    %39 = vector.broadcast %38 : vector<32x1xf32> to vector<32x128xf32>
    %40 = arith.addf %37, %39 : vector<32x128xf32>
    %41 = vector.extract_strided_slice %36 {offsets = [32, 0], sizes = [32, 128], strides = [1, 1]} : vector<64x128xf32> to vector<32x128xf32>
    %c0_25 = arith.constant 0 : index
    %c2 = arith.constant 2 : index
    %42 = vector.load %arg5[%c0_25, %c2] : memref<32x18xf32, #tpu.memory_space<vmem>>, vector<32x1xf32>
    %43 = vector.broadcast %42 : vector<32x1xf32> to vector<32x128xf32>
    %44 = arith.addf %41, %43 : vector<32x128xf32>
    %c0_26 = arith.constant 0 : index
    %c0_27 = arith.constant 0 : index
    %c0_28 = arith.constant 0 : index
    %c0_29 = arith.constant 0 : index
    %45 = vector.load %arg7[%c0_26, %c0_27, %c0_28, %c0_29] : memref<1x6x32x128xf32, #tpu.memory_space<vmem>>, vector<1x1x32x128xf32>
    %46 = vector.shape_cast %45 : vector<1x1x32x128xf32> to vector<32x128xf32>
    %47 = vector.shape_cast %44 : vector<32x128xf32> to vector<1x1x32x128xf32>
    tpu.vector_store %arg7[%c0_26, %c0_27, %c0_28, %c0_29], %47 {strides = array<i32>} : memref<1x6x32x128xf32, #tpu.memory_space<vmem>>, vector<1x1x32x128xf32>,
    %48 = arith.addf %40, %4 : vector<32x128xf32>
    %cst_30 = arith.constant 5.000000e-01 : f32
    %49 = vector.broadcast %cst_30 : f32 to vector<32x128xf32>
    %50 = arith.mulf %48, %49 : vector<32x128xf32>
    %c2_i32 = arith.constant 2 : i32
    %51 = vector.broadcast %c2_i32 : i32 to vector<1x128xi32>
    %52 = arith.cmpi sge, %8, %51 : vector<1x128xi32>
    %c1_31 = arith.constant 1 : index
    %c0_32 = arith.constant 0 : index
    %c2_33 = arith.constant 2 : index
    %53 = vector.load %arg8[%c1_31, %c0_32, %c2_33] : memref<6x32x4xf32, #tpu.memory_space<vmem>>, vector<1x32x2xf32>
    %54 = vector.shape_cast %53 : vector<1x32x2xf32> to vector<32x2xf32>
    %55 = vector.extract_strided_slice %50 {offsets = [0, 0], sizes = [32, 126], strides = [1, 1]} : vector<32x128xf32> to vector<32x126xf32>
    %56 = tpu.concatenate %54, %55 in 1 : vector<32x2xf32>, vector<32x126xf32> -> vector<32x128xf32>
    %57 = vector.extract_strided_slice %50 {offsets = [0, 124], sizes = [32, 4], strides = [1, 1]} : vector<32x128xf32> to vector<32x4xf32>
    %c1_34 = arith.constant 1 : index
    %c0_35 = arith.constant 0 : index
    %c0_36 = arith.constant 0 : index
    %58 = vector.load %arg8[%c1_34, %c0_35, %c0_36] : memref<6x32x4xf32, #tpu.memory_space<vmem>>, vector<1x32x4xf32>
    %59 = vector.shape_cast %58 : vector<1x32x4xf32> to vector<32x4xf32>
    %60 = vector.shape_cast %57 : vector<32x4xf32> to vector<1x32x4xf32>
    tpu.vector_store %arg8[%c1_34, %c0_35, %c0_36], %60 {strides = array<i32>} : memref<6x32x4xf32, #tpu.memory_space<vmem>>, vector<1x32x4xf32>,
    %c1_37 = arith.constant 1 : index
    %c0_38 = arith.constant 0 : index
    %c0_39 = arith.constant 0 : index
    %c0_40 = arith.constant 0 : index
    %61 = vector.load %arg3[%c1_37, %c0_38, %c0_39, %c0_40] : memref<6x2x32x32xf32, #tpu.memory_space<vmem>>, vector<1x1x32x32xf32>
    %62 = vector.shape_cast %61 : vector<1x1x32x32xf32> to vector<32x32xf32>
    %cst_41 = arith.constant dense<0.000000e+00> : vector<32x128xf32>
    %63 = tpu.matmul %62, %56, %cst_41 {dimension_numbers = #tpu.dot_dimension_numbers<[1], [0], [0], [1], [0, 0, 1, 1], [], []>} : vector<32x32xf32>, vector<32x128xf32>, vector<32x128xf32> -> vector<32x128xf32>
    %c1_42 = arith.constant 1 : index
    %c1_43 = arith.constant 1 : index
    %c0_44 = arith.constant 0 : index
    %c0_45 = arith.constant 0 : index
    %64 = vector.load %arg3[%c1_42, %c1_43, %c0_44, %c0_45] : memref<6x2x32x32xf32, #tpu.memory_space<vmem>>, vector<1x1x32x32xf32>
    %65 = vector.shape_cast %64 : vector<1x1x32x32xf32> to vector<32x32xf32>
    %cst_46 = arith.constant dense<0.000000e+00> : vector<32x128xf32>
    %66 = tpu.matmul %65, %50, %cst_46 {dimension_numbers = #tpu.dot_dimension_numbers<[1], [0], [0], [1], [0, 0, 1, 1], [], []>} : vector<32x32xf32>, vector<32x128xf32>, vector<32x128xf32> -> vector<32x128xf32>
    %67 = arith.addf %63, %66 : vector<32x128xf32>
    %c0_47 = arith.constant 0 : index
    %c3_48 = arith.constant 3 : index
    %68 = vector.load %arg5[%c0_47, %c3_48] : memref<32x18xf32, #tpu.memory_space<vmem>>, vector<32x1xf32>
    %69 = vector.broadcast %68 : vector<32x1xf32> to vector<32x128xf32>
    %70 = arith.addf %67, %69 : vector<32x128xf32>
    %cst_49 = arith.constant 0.000000e+00 : f32
    %71 = vector.shape_cast %52 : vector<1x128xi1> to vector<1x128xi1>
    %72 = vector.broadcast %71 : vector<1x128xi1> to vector<32x128xi1>
    %73 = vector.broadcast %cst_49 : f32 to vector<32x128xf32>
    %74 = arith.select %72, %70, %73 : vector<32x128xi1>, vector<32x128xf32>
    %75 = math.sin %74 : vector<32x128xf32>
    %c1_50 = arith.constant 1 : index
    %c0_51 = arith.constant 0 : index
    %c0_52 = arith.constant 0 : index
    %76 = vector.load %arg4[%c1_50, %c0_51, %c0_52] : memref<6x64x32xf32, #tpu.memory_space<vmem>>, vector<1x64x32xf32>
    %77 = vector.shape_cast %76 : vector<1x64x32xf32> to vector<64x32xf32>
    %cst_53 = arith.constant dense<0.000000e+00> : vector<64x128xf32>
    %78 = tpu.matmul %77, %75, %cst_53 {dimension_numbers = #tpu.dot_dimension_numbers<[1], [0], [0], [1], [0, 0, 1, 1], [], []>} : vector<64x32xf32>, vector<32x128xf32>, vector<64x128xf32> -> vector<64x128xf32>
    %79 = vector.extract_strided_slice %78 {offsets = [0, 0], sizes = [32, 128], strides = [1, 1]} : vector<64x128xf32> to vector<32x128xf32>
    %c0_54 = arith.constant 0 : index
    %c4 = arith.constant 4 : index
    %80 = vector.load %arg5[%c0_54, %c4] : memref<32x18xf32, #tpu.memory_space<vmem>>, vector<32x1xf32>
    %81 = vector.broadcast %80 : vector<32x1xf32> to vector<32x128xf32>
    %82 = arith.addf %79, %81 : vector<32x128xf32>
    %83 = vector.extract_strided_slice %78 {offsets = [32, 0], sizes = [32, 128], strides = [1, 1]} : vector<64x128xf32> to vector<32x128xf32>
    %c0_55 = arith.constant 0 : index
    %c5 = arith.constant 5 : index
    %84 = vector.load %arg5[%c0_55, %c5] : memref<32x18xf32, #tpu.memory_space<vmem>>, vector<32x1xf32>
    %85 = vector.broadcast %84 : vector<32x1xf32> to vector<32x128xf32>
    %86 = arith.addf %83, %85 : vector<32x128xf32>
    %c0_56 = arith.constant 0 : index
    %c1_57 = arith.constant 1 : index
    %c0_58 = arith.constant 0 : index
    %c0_59 = arith.constant 0 : index
    %87 = vector.load %arg7[%c0_56, %c1_57, %c0_58, %c0_59] : memref<1x6x32x128xf32, #tpu.memory_space<vmem>>, vector<1x1x32x128xf32>
    %88 = vector.shape_cast %87 : vector<1x1x32x128xf32> to vector<32x128xf32>
    %89 = vector.shape_cast %86 : vector<32x128xf32> to vector<1x1x32x128xf32>
    tpu.vector_store %arg7[%c0_56, %c1_57, %c0_58, %c0_59], %89 {strides = array<i32>} : memref<1x6x32x128xf32, #tpu.memory_space<vmem>>, vector<1x1x32x128xf32>,
    %90 = arith.addf %82, %50 : vector<32x128xf32>
    %cst_60 = arith.constant 5.000000e-01 : f32
    %91 = vector.broadcast %cst_60 : f32 to vector<32x128xf32>
    %92 = arith.mulf %90, %91 : vector<32x128xf32>
    %c4_i32 = arith.constant 4 : i32
    %93 = vector.broadcast %c4_i32 : i32 to vector<1x128xi32>
    %94 = arith.cmpi sge, %8, %93 : vector<1x128xi32>
    %c2_61 = arith.constant 2 : index
    %c0_62 = arith.constant 0 : index
    %c0_63 = arith.constant 0 : index
    %95 = vector.load %arg8[%c2_61, %c0_62, %c0_63] : memref<6x32x4xf32, #tpu.memory_space<vmem>>, vector<1x32x4xf32>
    %96 = vector.shape_cast %95 : vector<1x32x4xf32> to vector<32x4xf32>
    %97 = vector.extract_strided_slice %92 {offsets = [0, 0], sizes = [32, 124], strides = [1, 1]} : vector<32x128xf32> to vector<32x124xf32>
    %98 = tpu.concatenate %96, %97 in 1 : vector<32x4xf32>, vector<32x124xf32> -> vector<32x128xf32>
    %99 = vector.extract_strided_slice %92 {offsets = [0, 124], sizes = [32, 4], strides = [1, 1]} : vector<32x128xf32> to vector<32x4xf32>
    %c2_64 = arith.constant 2 : index
    %c0_65 = arith.constant 0 : index
    %c0_66 = arith.constant 0 : index
    %100 = vector.load %arg8[%c2_64, %c0_65, %c0_66] : memref<6x32x4xf32, #tpu.memory_space<vmem>>, vector<1x32x4xf32>
    %101 = vector.shape_cast %100 : vector<1x32x4xf32> to vector<32x4xf32>
    %102 = vector.shape_cast %99 : vector<32x4xf32> to vector<1x32x4xf32>
    tpu.vector_store %arg8[%c2_64, %c0_65, %c0_66], %102 {strides = array<i32>} : memref<6x32x4xf32, #tpu.memory_space<vmem>>, vector<1x32x4xf32>,
    %c2_67 = arith.constant 2 : index
    %c0_68 = arith.constant 0 : index
    %c0_69 = arith.constant 0 : index
    %c0_70 = arith.constant 0 : index
    %103 = vector.load %arg3[%c2_67, %c0_68, %c0_69, %c0_70] : memref<6x2x32x32xf32, #tpu.memory_space<vmem>>, vector<1x1x32x32xf32>
    %104 = vector.shape_cast %103 : vector<1x1x32x32xf32> to vector<32x32xf32>
    %cst_71 = arith.constant dense<0.000000e+00> : vector<32x128xf32>
    %105 = tpu.matmul %104, %98, %cst_71 {dimension_numbers = #tpu.dot_dimension_numbers<[1], [0], [0], [1], [0, 0, 1, 1], [], []>} : vector<32x32xf32>, vector<32x128xf32>, vector<32x128xf32> -> vector<32x128xf32>
    %c2_72 = arith.constant 2 : index
    %c1_73 = arith.constant 1 : index
    %c0_74 = arith.constant 0 : index
    %c0_75 = arith.constant 0 : index
    %106 = vector.load %arg3[%c2_72, %c1_73, %c0_74, %c0_75] : memref<6x2x32x32xf32, #tpu.memory_space<vmem>>, vector<1x1x32x32xf32>
    %107 = vector.shape_cast %106 : vector<1x1x32x32xf32> to vector<32x32xf32>
    %cst_76 = arith.constant dense<0.000000e+00> : vector<32x128xf32>
    %108 = tpu.matmul %107, %92, %cst_76 {dimension_numbers = #tpu.dot_dimension_numbers<[1], [0], [0], [1], [0, 0, 1, 1], [], []>} : vector<32x32xf32>, vector<32x128xf32>, vector<32x128xf32> -> vector<32x128xf32>
    %109 = arith.addf %105, %108 : vector<32x128xf32>
    %c0_77 = arith.constant 0 : index
    %c6 = arith.constant 6 : index
    %110 = vector.load %arg5[%c0_77, %c6] : memref<32x18xf32, #tpu.memory_space<vmem>>, vector<32x1xf32>
    %111 = vector.broadcast %110 : vector<32x1xf32> to vector<32x128xf32>
    %112 = arith.addf %109, %111 : vector<32x128xf32>
    %cst_78 = arith.constant 0.000000e+00 : f32
    %113 = vector.shape_cast %94 : vector<1x128xi1> to vector<1x128xi1>
    %114 = vector.broadcast %113 : vector<1x128xi1> to vector<32x128xi1>
    %115 = vector.broadcast %cst_78 : f32 to vector<32x128xf32>
    %116 = arith.select %114, %112, %115 : vector<32x128xi1>, vector<32x128xf32>
    %117 = math.sin %116 : vector<32x128xf32>
    %c2_79 = arith.constant 2 : index
    %c0_80 = arith.constant 0 : index
    %c0_81 = arith.constant 0 : index
    %118 = vector.load %arg4[%c2_79, %c0_80, %c0_81] : memref<6x64x32xf32, #tpu.memory_space<vmem>>, vector<1x64x32xf32>
    %119 = vector.shape_cast %118 : vector<1x64x32xf32> to vector<64x32xf32>
    %cst_82 = arith.constant dense<0.000000e+00> : vector<64x128xf32>
    %120 = tpu.matmul %119, %117, %cst_82 {dimension_numbers = #tpu.dot_dimension_numbers<[1], [0], [0], [1], [0, 0, 1, 1], [], []>} : vector<64x32xf32>, vector<32x128xf32>, vector<64x128xf32> -> vector<64x128xf32>
    %121 = vector.extract_strided_slice %120 {offsets = [0, 0], sizes = [32, 128], strides = [1, 1]} : vector<64x128xf32> to vector<32x128xf32>
    %c0_83 = arith.constant 0 : index
    %c7 = arith.constant 7 : index
    %122 = vector.load %arg5[%c0_83, %c7] : memref<32x18xf32, #tpu.memory_space<vmem>>, vector<32x1xf32>
    %123 = vector.broadcast %122 : vector<32x1xf32> to vector<32x128xf32>
    %124 = arith.addf %121, %123 : vector<32x128xf32>
    %125 = vector.extract_strided_slice %120 {offsets = [32, 0], sizes = [32, 128], strides = [1, 1]} : vector<64x128xf32> to vector<32x128xf32>
    %c0_84 = arith.constant 0 : index
    %c8 = arith.constant 8 : index
    %126 = vector.load %arg5[%c0_84, %c8] : memref<32x18xf32, #tpu.memory_space<vmem>>, vector<32x1xf32>
    %127 = vector.broadcast %126 : vector<32x1xf32> to vector<32x128xf32>
    %128 = arith.addf %125, %127 : vector<32x128xf32>
    %c0_85 = arith.constant 0 : index
    %c2_86 = arith.constant 2 : index
    %c0_87 = arith.constant 0 : index
    %c0_88 = arith.constant 0 : index
    %129 = vector.load %arg7[%c0_85, %c2_86, %c0_87, %c0_88] : memref<1x6x32x128xf32, #tpu.memory_space<vmem>>, vector<1x1x32x128xf32>
    %130 = vector.shape_cast %129 : vector<1x1x32x128xf32> to vector<32x128xf32>
    %131 = vector.shape_cast %128 : vector<32x128xf32> to vector<1x1x32x128xf32>
    tpu.vector_store %arg7[%c0_85, %c2_86, %c0_87, %c0_88], %131 {strides = array<i32>} : memref<1x6x32x128xf32, #tpu.memory_space<vmem>>, vector<1x1x32x128xf32>,
    %132 = arith.addf %124, %92 : vector<32x128xf32>
    %cst_89 = arith.constant 5.000000e-01 : f32
    %133 = vector.broadcast %cst_89 : f32 to vector<32x128xf32>
    %134 = arith.mulf %132, %133 : vector<32x128xf32>
    %c3_90 = arith.constant 3 : index
    %c0_91 = arith.constant 0 : index
    %c3_92 = arith.constant 3 : index
    %135 = vector.load %arg8[%c3_90, %c0_91, %c3_92] : memref<6x32x4xf32, #tpu.memory_space<vmem>>, vector<1x32x1xf32>
    %136 = vector.shape_cast %135 : vector<1x32x1xf32> to vector<32x1xf32>
    %137 = vector.extract_strided_slice %134 {offsets = [0, 0], sizes = [32, 127], strides = [1, 1]} : vector<32x128xf32> to vector<32x127xf32>
    %138 = tpu.concatenate %136, %137 in 1 : vector<32x1xf32>, vector<32x127xf32> -> vector<32x128xf32>
    %139 = vector.extract_strided_slice %134 {offsets = [0, 124], sizes = [32, 4], strides = [1, 1]} : vector<32x128xf32> to vector<32x4xf32>
    %c3_93 = arith.constant 3 : index
    %c0_94 = arith.constant 0 : index
    %c0_95 = arith.constant 0 : index
    %140 = vector.load %arg8[%c3_93, %c0_94, %c0_95] : memref<6x32x4xf32, #tpu.memory_space<vmem>>, vector<1x32x4xf32>
    %141 = vector.shape_cast %140 : vector<1x32x4xf32> to vector<32x4xf32>
    %142 = vector.shape_cast %139 : vector<32x4xf32> to vector<1x32x4xf32>
    tpu.vector_store %arg8[%c3_93, %c0_94, %c0_95], %142 {strides = array<i32>} : memref<6x32x4xf32, #tpu.memory_space<vmem>>, vector<1x32x4xf32>,
    %c3_96 = arith.constant 3 : index
    %c0_97 = arith.constant 0 : index
    %c0_98 = arith.constant 0 : index
    %c0_99 = arith.constant 0 : index
    %143 = vector.load %arg3[%c3_96, %c0_97, %c0_98, %c0_99] : memref<6x2x32x32xf32, #tpu.memory_space<vmem>>, vector<1x1x32x32xf32>
    %144 = vector.shape_cast %143 : vector<1x1x32x32xf32> to vector<32x32xf32>
    %cst_100 = arith.constant dense<0.000000e+00> : vector<32x128xf32>
    %145 = tpu.matmul %144, %138, %cst_100 {dimension_numbers = #tpu.dot_dimension_numbers<[1], [0], [0], [1], [0, 0, 1, 1], [], []>} : vector<32x32xf32>, vector<32x128xf32>, vector<32x128xf32> -> vector<32x128xf32>
    %c3_101 = arith.constant 3 : index
    %c1_102 = arith.constant 1 : index
    %c0_103 = arith.constant 0 : index
    %c0_104 = arith.constant 0 : index
    %146 = vector.load %arg3[%c3_101, %c1_102, %c0_103, %c0_104] : memref<6x2x32x32xf32, #tpu.memory_space<vmem>>, vector<1x1x32x32xf32>
    %147 = vector.shape_cast %146 : vector<1x1x32x32xf32> to vector<32x32xf32>
    %cst_105 = arith.constant dense<0.000000e+00> : vector<32x128xf32>
    %148 = tpu.matmul %147, %134, %cst_105 {dimension_numbers = #tpu.dot_dimension_numbers<[1], [0], [0], [1], [0, 0, 1, 1], [], []>} : vector<32x32xf32>, vector<32x128xf32>, vector<32x128xf32> -> vector<32x128xf32>
    %149 = arith.addf %145, %148 : vector<32x128xf32>
    %c0_106 = arith.constant 0 : index
    %c9 = arith.constant 9 : index
    %150 = vector.load %arg5[%c0_106, %c9] : memref<32x18xf32, #tpu.memory_space<vmem>>, vector<32x1xf32>
    %151 = vector.broadcast %150 : vector<32x1xf32> to vector<32x128xf32>
    %152 = arith.addf %149, %151 : vector<32x128xf32>
    %cst_107 = arith.constant 0.000000e+00 : f32
    %153 = vector.shape_cast %10 : vector<1x128xi1> to vector<1x128xi1>
    %154 = vector.broadcast %153 : vector<1x128xi1> to vector<32x128xi1>
    %155 = vector.broadcast %cst_107 : f32 to vector<32x128xf32>
    %156 = arith.select %154, %152, %155 : vector<32x128xi1>, vector<32x128xf32>
    %157 = math.sin %156 : vector<32x128xf32>
    %c3_108 = arith.constant 3 : index
    %c0_109 = arith.constant 0 : index
    %c0_110 = arith.constant 0 : index
    %158 = vector.load %arg4[%c3_108, %c0_109, %c0_110] : memref<6x64x32xf32, #tpu.memory_space<vmem>>, vector<1x64x32xf32>
    %159 = vector.shape_cast %158 : vector<1x64x32xf32> to vector<64x32xf32>
    %cst_111 = arith.constant dense<0.000000e+00> : vector<64x128xf32>
    %160 = tpu.matmul %159, %157, %cst_111 {dimension_numbers = #tpu.dot_dimension_numbers<[1], [0], [0], [1], [0, 0, 1, 1], [], []>} : vector<64x32xf32>, vector<32x128xf32>, vector<64x128xf32> -> vector<64x128xf32>
    %161 = vector.extract_strided_slice %160 {offsets = [0, 0], sizes = [32, 128], strides = [1, 1]} : vector<64x128xf32> to vector<32x128xf32>
    %c0_112 = arith.constant 0 : index
    %c10 = arith.constant 10 : index
    %162 = vector.load %arg5[%c0_112, %c10] : memref<32x18xf32, #tpu.memory_space<vmem>>, vector<32x1xf32>
    %163 = vector.broadcast %162 : vector<32x1xf32> to vector<32x128xf32>
    %164 = arith.addf %161, %163 : vector<32x128xf32>
    %165 = vector.extract_strided_slice %160 {offsets = [32, 0], sizes = [32, 128], strides = [1, 1]} : vector<64x128xf32> to vector<32x128xf32>
    %c0_113 = arith.constant 0 : index
    %c11 = arith.constant 11 : index
    %166 = vector.load %arg5[%c0_113, %c11] : memref<32x18xf32, #tpu.memory_space<vmem>>, vector<32x1xf32>
    %167 = vector.broadcast %166 : vector<32x1xf32> to vector<32x128xf32>
    %168 = arith.addf %165, %167 : vector<32x128xf32>
    %c0_114 = arith.constant 0 : index
    %c3_115 = arith.constant 3 : index
    %c0_116 = arith.constant 0 : index
    %c0_117 = arith.constant 0 : index
    %169 = vector.load %arg7[%c0_114, %c3_115, %c0_116, %c0_117] : memref<1x6x32x128xf32, #tpu.memory_space<vmem>>, vector<1x1x32x128xf32>
    %170 = vector.shape_cast %169 : vector<1x1x32x128xf32> to vector<32x128xf32>
    %171 = vector.shape_cast %168 : vector<32x128xf32> to vector<1x1x32x128xf32>
    tpu.vector_store %arg7[%c0_114, %c3_115, %c0_116, %c0_117], %171 {strides = array<i32>} : memref<1x6x32x128xf32, #tpu.memory_space<vmem>>, vector<1x1x32x128xf32>,
    %172 = arith.addf %164, %134 : vector<32x128xf32>
    %cst_118 = arith.constant 5.000000e-01 : f32
    %173 = vector.broadcast %cst_118 : f32 to vector<32x128xf32>
    %174 = arith.mulf %172, %173 : vector<32x128xf32>
    %c4_119 = arith.constant 4 : index
    %c0_120 = arith.constant 0 : index
    %c2_121 = arith.constant 2 : index
    %175 = vector.load %arg8[%c4_119, %c0_120, %c2_121] : memref<6x32x4xf32, #tpu.memory_space<vmem>>, vector<1x32x2xf32>
    %176 = vector.shape_cast %175 : vector<1x32x2xf32> to vector<32x2xf32>
    %177 = vector.extract_strided_slice %174 {offsets = [0, 0], sizes = [32, 126], strides = [1, 1]} : vector<32x128xf32> to vector<32x126xf32>
    %178 = tpu.concatenate %176, %177 in 1 : vector<32x2xf32>, vector<32x126xf32> -> vector<32x128xf32>
    %179 = vector.extract_strided_slice %174 {offsets = [0, 124], sizes = [32, 4], strides = [1, 1]} : vector<32x128xf32> to vector<32x4xf32>
    %c4_122 = arith.constant 4 : index
    %c0_123 = arith.constant 0 : index
    %c0_124 = arith.constant 0 : index
    %180 = vector.load %arg8[%c4_122, %c0_123, %c0_124] : memref<6x32x4xf32, #tpu.memory_space<vmem>>, vector<1x32x4xf32>
    %181 = vector.shape_cast %180 : vector<1x32x4xf32> to vector<32x4xf32>
    %182 = vector.shape_cast %179 : vector<32x4xf32> to vector<1x32x4xf32>
    tpu.vector_store %arg8[%c4_122, %c0_123, %c0_124], %182 {strides = array<i32>} : memref<6x32x4xf32, #tpu.memory_space<vmem>>, vector<1x32x4xf32>,
    %c4_125 = arith.constant 4 : index
    %c0_126 = arith.constant 0 : index
    %c0_127 = arith.constant 0 : index
    %c0_128 = arith.constant 0 : index
    %183 = vector.load %arg3[%c4_125, %c0_126, %c0_127, %c0_128] : memref<6x2x32x32xf32, #tpu.memory_space<vmem>>, vector<1x1x32x32xf32>
    %184 = vector.shape_cast %183 : vector<1x1x32x32xf32> to vector<32x32xf32>
    %cst_129 = arith.constant dense<0.000000e+00> : vector<32x128xf32>
    %185 = tpu.matmul %184, %178, %cst_129 {dimension_numbers = #tpu.dot_dimension_numbers<[1], [0], [0], [1], [0, 0, 1, 1], [], []>} : vector<32x32xf32>, vector<32x128xf32>, vector<32x128xf32> -> vector<32x128xf32>
    %c4_130 = arith.constant 4 : index
    %c1_131 = arith.constant 1 : index
    %c0_132 = arith.constant 0 : index
    %c0_133 = arith.constant 0 : index
    %186 = vector.load %arg3[%c4_130, %c1_131, %c0_132, %c0_133] : memref<6x2x32x32xf32, #tpu.memory_space<vmem>>, vector<1x1x32x32xf32>
    %187 = vector.shape_cast %186 : vector<1x1x32x32xf32> to vector<32x32xf32>
    %cst_134 = arith.constant dense<0.000000e+00> : vector<32x128xf32>
    %188 = tpu.matmul %187, %174, %cst_134 {dimension_numbers = #tpu.dot_dimension_numbers<[1], [0], [0], [1], [0, 0, 1, 1], [], []>} : vector<32x32xf32>, vector<32x128xf32>, vector<32x128xf32> -> vector<32x128xf32>
    %189 = arith.addf %185, %188 : vector<32x128xf32>
    %c0_135 = arith.constant 0 : index
    %c12 = arith.constant 12 : index
    %190 = vector.load %arg5[%c0_135, %c12] : memref<32x18xf32, #tpu.memory_space<vmem>>, vector<32x1xf32>
    %191 = vector.broadcast %190 : vector<32x1xf32> to vector<32x128xf32>
    %192 = arith.addf %189, %191 : vector<32x128xf32>
    %cst_136 = arith.constant 0.000000e+00 : f32
    %193 = vector.shape_cast %52 : vector<1x128xi1> to vector<1x128xi1>
    %194 = vector.broadcast %193 : vector<1x128xi1> to vector<32x128xi1>
    %195 = vector.broadcast %cst_136 : f32 to vector<32x128xf32>
    %196 = arith.select %194, %192, %195 : vector<32x128xi1>, vector<32x128xf32>
    %197 = math.sin %196 : vector<32x128xf32>
    %c4_137 = arith.constant 4 : index
    %c0_138 = arith.constant 0 : index
    %c0_139 = arith.constant 0 : index
    %198 = vector.load %arg4[%c4_137, %c0_138, %c0_139] : memref<6x64x32xf32, #tpu.memory_space<vmem>>, vector<1x64x32xf32>
    %199 = vector.shape_cast %198 : vector<1x64x32xf32> to vector<64x32xf32>
    %cst_140 = arith.constant dense<0.000000e+00> : vector<64x128xf32>
    %200 = tpu.matmul %199, %197, %cst_140 {dimension_numbers = #tpu.dot_dimension_numbers<[1], [0], [0], [1], [0, 0, 1, 1], [], []>} : vector<64x32xf32>, vector<32x128xf32>, vector<64x128xf32> -> vector<64x128xf32>
    %201 = vector.extract_strided_slice %200 {offsets = [0, 0], sizes = [32, 128], strides = [1, 1]} : vector<64x128xf32> to vector<32x128xf32>
    %c0_141 = arith.constant 0 : index
    %c13 = arith.constant 13 : index
    %202 = vector.load %arg5[%c0_141, %c13] : memref<32x18xf32, #tpu.memory_space<vmem>>, vector<32x1xf32>
    %203 = vector.broadcast %202 : vector<32x1xf32> to vector<32x128xf32>
    %204 = arith.addf %201, %203 : vector<32x128xf32>
    %205 = vector.extract_strided_slice %200 {offsets = [32, 0], sizes = [32, 128], strides = [1, 1]} : vector<64x128xf32> to vector<32x128xf32>
    %c0_142 = arith.constant 0 : index
    %c14 = arith.constant 14 : index
    %206 = vector.load %arg5[%c0_142, %c14] : memref<32x18xf32, #tpu.memory_space<vmem>>, vector<32x1xf32>
    %207 = vector.broadcast %206 : vector<32x1xf32> to vector<32x128xf32>
    %208 = arith.addf %205, %207 : vector<32x128xf32>
    %c0_143 = arith.constant 0 : index
    %c4_144 = arith.constant 4 : index
    %c0_145 = arith.constant 0 : index
    %c0_146 = arith.constant 0 : index
    %209 = vector.load %arg7[%c0_143, %c4_144, %c0_145, %c0_146] : memref<1x6x32x128xf32, #tpu.memory_space<vmem>>, vector<1x1x32x128xf32>
    %210 = vector.shape_cast %209 : vector<1x1x32x128xf32> to vector<32x128xf32>
    %211 = vector.shape_cast %208 : vector<32x128xf32> to vector<1x1x32x128xf32>
    tpu.vector_store %arg7[%c0_143, %c4_144, %c0_145, %c0_146], %211 {strides = array<i32>} : memref<1x6x32x128xf32, #tpu.memory_space<vmem>>, vector<1x1x32x128xf32>,
    %212 = arith.addf %204, %174 : vector<32x128xf32>
    %cst_147 = arith.constant 5.000000e-01 : f32
    %213 = vector.broadcast %cst_147 : f32 to vector<32x128xf32>
    %214 = arith.mulf %212, %213 : vector<32x128xf32>
    %c5_148 = arith.constant 5 : index
    %c0_149 = arith.constant 0 : index
    %c0_150 = arith.constant 0 : index
    %215 = vector.load %arg8[%c5_148, %c0_149, %c0_150] : memref<6x32x4xf32, #tpu.memory_space<vmem>>, vector<1x32x4xf32>
    %216 = vector.shape_cast %215 : vector<1x32x4xf32> to vector<32x4xf32>
    %217 = vector.extract_strided_slice %214 {offsets = [0, 0], sizes = [32, 124], strides = [1, 1]} : vector<32x128xf32> to vector<32x124xf32>
    %218 = tpu.concatenate %216, %217 in 1 : vector<32x4xf32>, vector<32x124xf32> -> vector<32x128xf32>
    %219 = vector.extract_strided_slice %214 {offsets = [0, 124], sizes = [32, 4], strides = [1, 1]} : vector<32x128xf32> to vector<32x4xf32>
    %c5_151 = arith.constant 5 : index
    %c0_152 = arith.constant 0 : index
    %c0_153 = arith.constant 0 : index
    %220 = vector.load %arg8[%c5_151, %c0_152, %c0_153] : memref<6x32x4xf32, #tpu.memory_space<vmem>>, vector<1x32x4xf32>
    %221 = vector.shape_cast %220 : vector<1x32x4xf32> to vector<32x4xf32>
    %222 = vector.shape_cast %219 : vector<32x4xf32> to vector<1x32x4xf32>
    tpu.vector_store %arg8[%c5_151, %c0_152, %c0_153], %222 {strides = array<i32>} : memref<6x32x4xf32, #tpu.memory_space<vmem>>, vector<1x32x4xf32>,
    %c5_154 = arith.constant 5 : index
    %c0_155 = arith.constant 0 : index
    %c0_156 = arith.constant 0 : index
    %c0_157 = arith.constant 0 : index
    %223 = vector.load %arg3[%c5_154, %c0_155, %c0_156, %c0_157] : memref<6x2x32x32xf32, #tpu.memory_space<vmem>>, vector<1x1x32x32xf32>
    %224 = vector.shape_cast %223 : vector<1x1x32x32xf32> to vector<32x32xf32>
    %cst_158 = arith.constant dense<0.000000e+00> : vector<32x128xf32>
    %225 = tpu.matmul %224, %218, %cst_158 {dimension_numbers = #tpu.dot_dimension_numbers<[1], [0], [0], [1], [0, 0, 1, 1], [], []>} : vector<32x32xf32>, vector<32x128xf32>, vector<32x128xf32> -> vector<32x128xf32>
    %c5_159 = arith.constant 5 : index
    %c1_160 = arith.constant 1 : index
    %c0_161 = arith.constant 0 : index
    %c0_162 = arith.constant 0 : index
    %226 = vector.load %arg3[%c5_159, %c1_160, %c0_161, %c0_162] : memref<6x2x32x32xf32, #tpu.memory_space<vmem>>, vector<1x1x32x32xf32>
    %227 = vector.shape_cast %226 : vector<1x1x32x32xf32> to vector<32x32xf32>
    %cst_163 = arith.constant dense<0.000000e+00> : vector<32x128xf32>
    %228 = tpu.matmul %227, %214, %cst_163 {dimension_numbers = #tpu.dot_dimension_numbers<[1], [0], [0], [1], [0, 0, 1, 1], [], []>} : vector<32x32xf32>, vector<32x128xf32>, vector<32x128xf32> -> vector<32x128xf32>
    %229 = arith.addf %225, %228 : vector<32x128xf32>
    %c0_164 = arith.constant 0 : index
    %c15 = arith.constant 15 : index
    %230 = vector.load %arg5[%c0_164, %c15] : memref<32x18xf32, #tpu.memory_space<vmem>>, vector<32x1xf32>
    %231 = vector.broadcast %230 : vector<32x1xf32> to vector<32x128xf32>
    %232 = arith.addf %229, %231 : vector<32x128xf32>
    %cst_165 = arith.constant 0.000000e+00 : f32
    %233 = vector.shape_cast %94 : vector<1x128xi1> to vector<1x128xi1>
    %234 = vector.broadcast %233 : vector<1x128xi1> to vector<32x128xi1>
    %235 = vector.broadcast %cst_165 : f32 to vector<32x128xf32>
    %236 = arith.select %234, %232, %235 : vector<32x128xi1>, vector<32x128xf32>
    %237 = math.sin %236 : vector<32x128xf32>
    %c5_166 = arith.constant 5 : index
    %c0_167 = arith.constant 0 : index
    %c0_168 = arith.constant 0 : index
    %238 = vector.load %arg4[%c5_166, %c0_167, %c0_168] : memref<6x64x32xf32, #tpu.memory_space<vmem>>, vector<1x64x32xf32>
    %239 = vector.shape_cast %238 : vector<1x64x32xf32> to vector<64x32xf32>
    %cst_169 = arith.constant dense<0.000000e+00> : vector<64x128xf32>
    %240 = tpu.matmul %239, %237, %cst_169 {dimension_numbers = #tpu.dot_dimension_numbers<[1], [0], [0], [1], [0, 0, 1, 1], [], []>} : vector<64x32xf32>, vector<32x128xf32>, vector<64x128xf32> -> vector<64x128xf32>
    %241 = vector.extract_strided_slice %240 {offsets = [0, 0], sizes = [32, 128], strides = [1, 1]} : vector<64x128xf32> to vector<32x128xf32>
    %c0_170 = arith.constant 0 : index
    %c16 = arith.constant 16 : index
    %242 = vector.load %arg5[%c0_170, %c16] : memref<32x18xf32, #tpu.memory_space<vmem>>, vector<32x1xf32>
    %243 = vector.broadcast %242 : vector<32x1xf32> to vector<32x128xf32>
    %244 = arith.addf %241, %243 : vector<32x128xf32>
    %245 = vector.extract_strided_slice %240 {offsets = [32, 0], sizes = [32, 128], strides = [1, 1]} : vector<64x128xf32> to vector<32x128xf32>
    %c0_171 = arith.constant 0 : index
    %c17 = arith.constant 17 : index
    %246 = vector.load %arg5[%c0_171, %c17] : memref<32x18xf32, #tpu.memory_space<vmem>>, vector<32x1xf32>
    %247 = vector.broadcast %246 : vector<32x1xf32> to vector<32x128xf32>
    %248 = arith.addf %245, %247 : vector<32x128xf32>
    %c0_172 = arith.constant 0 : index
    %c5_173 = arith.constant 5 : index
    %c0_174 = arith.constant 0 : index
    %c0_175 = arith.constant 0 : index
    %249 = vector.load %arg7[%c0_172, %c5_173, %c0_174, %c0_175] : memref<1x6x32x128xf32, #tpu.memory_space<vmem>>, vector<1x1x32x128xf32>
    %250 = vector.shape_cast %249 : vector<1x1x32x128xf32> to vector<32x128xf32>
    %251 = vector.shape_cast %248 : vector<32x128xf32> to vector<1x1x32x128xf32>
    tpu.vector_store %arg7[%c0_172, %c5_173, %c0_174, %c0_175], %251 {strides = array<i32>} : memref<1x6x32x128xf32, #tpu.memory_space<vmem>>, vector<1x1x32x128xf32>,
    %252 = arith.addf %244, %214 : vector<32x128xf32>
    %cst_176 = arith.constant 5.000000e-01 : f32
    %253 = vector.broadcast %cst_176 : f32 to vector<32x128xf32>
    %254 = arith.mulf %252, %253 : vector<32x128xf32>
    %c0_177 = arith.constant 0 : index
    %c0_178 = arith.constant 0 : index
    %c0_179 = arith.constant 0 : index
    %255 = vector.load %arg6[%c0_177, %c0_178, %c0_179] : memref<1x32x128xf32, #tpu.memory_space<vmem>>, vector<1x32x128xf32>
    %256 = vector.shape_cast %255 : vector<1x32x128xf32> to vector<32x128xf32>
    %257 = vector.shape_cast %254 : vector<32x128xf32> to vector<1x32x128xf32>
    tpu.vector_store %arg6[%c0_177, %c0_178, %c0_179], %257 {strides = array<i32>} : memref<1x32x128xf32, #tpu.memory_space<vmem>>, vector<1x32x128xf32>,
    return
  }
  func.func @transform_0(%arg0: i32, %arg1: i32) -> (i32, i32, i32) {
    %c0_i32 = arith.constant 0 : i32
    %c0_i32_0 = arith.constant 0 : i32
    return %arg0, %c0_i32, %arg1 : i32, i32, i32
  }
  func.func @transform_1(%arg0: i32, %arg1: i32) -> (i32, i32, i32, i32) {
    %c0_i32 = arith.constant 0 : i32
    %c0_i32_0 = arith.constant 0 : i32
    %c0_i32_1 = arith.constant 0 : i32
    %c0_i32_2 = arith.constant 0 : i32
    %c0_i32_3 = arith.constant 0 : i32
    return %c0_i32, %c0_i32_0, %c0_i32_1, %c0_i32_2 : i32, i32, i32, i32
  }
  func.func @transform_2(%arg0: i32, %arg1: i32) -> (i32, i32, i32) {
    %c0_i32 = arith.constant 0 : i32
    %c0_i32_0 = arith.constant 0 : i32
    %c0_i32_1 = arith.constant 0 : i32
    %c0_i32_2 = arith.constant 0 : i32
    return %c0_i32, %c0_i32_0, %c0_i32_1 : i32, i32, i32
  }
  func.func @transform_3(%arg0: i32, %arg1: i32) -> (i32, i32) {
    %c0_i32 = arith.constant 0 : i32
    %c0_i32_0 = arith.constant 0 : i32
    %c0_i32_1 = arith.constant 0 : i32
    return %c0_i32, %c0_i32_0 : i32, i32
  }
  func.func @transform_4(%arg0: i32, %arg1: i32) -> (i32, i32, i32) {
    %c0_i32 = arith.constant 0 : i32
    %c0_i32_0 = arith.constant 0 : i32
    return %arg0, %c0_i32, %arg1 : i32, i32, i32
  }
  func.func @transform_5(%arg0: i32, %arg1: i32) -> (i32, i32, i32, i32) {
    %c0_i32 = arith.constant 0 : i32
    %c0_i32_0 = arith.constant 0 : i32
    %c0_i32_1 = arith.constant 0 : i32
    return %arg0, %c0_i32, %c0_i32_0, %arg1 : i32, i32, i32, i32
  }
}

</mosaic_0001>

<bundles_post_ra>
// kernel: tpu_custom_call.1
= control target key start
LH: loop header
LB: loop body
LE: loop exit
PB: predicated region body
PF: predicated region fallthrough
CT: control target
= control target key end

     0   :  { %s10291_s0 = inlined_call_operand.vmem [shape: f32[2,32,256], index: 0, kind: input, shape index: {}]   ;;  %s10292_s1 = inlined_call_operand.vmem [shape: f32[6,2,32,32], index: 1, kind: input, shape index: {}]   ;;  %s10293_s2 = inlined_call_operand.vmem [shape: f32[6,64,32], index: 2, kind: input, shape index: {}]   ;;  %s10294_s3 = inlined_call_operand.vmem [shape: f32[32,18], index: 3, kind: input, shape index: {}]   ;;  %s10295_s4 = inlined_call_operand.hbm [shape: f32[2,32,256], index: 4, kind: output, shape index: {0}]   ;;  %s10296_s5 = inlined_call_operand.hbm [shape: f32[2,6,32,256], index: 5, kind: output, shape index: {1}]  }
   0x1   :  { %10326 = sst [smem:[#allocation22_spill]] %s10291_s0 }
   0x2   :  { %10327 = sst [smem:[#allocation23_spill]] %s10292_s1 }
   0x3   :  { %11 = vsyncpa [#allocation5], 0 }
   0x4   :  { %13 = vsyncpa [#allocation5 + $0x1], 0 }
   0x5   :  { %14 = vsyncpa [#allocation7], 0 }
   0x6   :  { %16 = vsyncpa [#allocation7 + $0x1], 0  ;;  %s7427_s18 = smov 0   ;;  %s7429_s19 = smov 0  }
   0x7   :  { %s7431_s20 = smov 0   ;;  %s7433_s21 = smov 0  }
   0x8   :  { %s7435_s22 = smov 0   ;;  %s7437_s23 = smov 0  }
   0x9   :  { %s7439_s24 = smov 0   ;;  %s7441_s25 = smov 0  }
   0xa LB: > { %s5849_s26 = sadd.s32 4294967295, %s7360_s25   ;;  %s5850_s27 = sadd.s32 4294967294, %s7360_s25   ;;  %s7360_s25 = sphi %s7441_s25, %s22_s25   ;;  %s7356_s24 = sphi %s7439_s24, %s10423_s24   ;;  %s7352_s23 = sphi %s7437_s23, %s10422_s23   ;;  %s7348_s22 = sphi %s7435_s22, %s10421_s22   ;;  %s7344_s21 = sphi %s7433_s21, %s10420_s21   ;;  %s7340_s20 = sphi %s7431_s20, %s10419_s20   ;;  %s7336_s19 = sphi %s7429_s19, %s10418_s19   ;;  %s7332_s18 = sphi %s7427_s18, %s10417_s18  }
   0xb   : > { %s31_s28 = sadd.s32 1, %s7352_s23  ;;  %s34_s29 = sadd.s32 1, %s7356_s24 }
   0xc   : > { %p32_p0 = scmp.ge.s32.totalorder %s31_s28, 2  ;;  %p50_p1 = scmp.ne.s32.totalorder %s7340_s20, %s7336_s19 }
   0xd   : > { %p51_p2 = scmp.eq.s32.totalorder %s7360_s25, 0  ;;  %p145_p5 = scmp.eq.s32.totalorder %s5849_s26, 3 }
   0xe   : > { %s10425_s28 = smov (%p32_p0, %s31_s28), 0  ;;  %s10427_s29 = smov (!%p32_p0, %s34_s29), %s7356_s24 }
   0xf   : > { %s39_s30 = ssub.s32 %s7352_s23, %s10425_s28  ;;  %p7479_p3 = por %p51_p2, %p50_p1 }
  0x10   : > { %p36_p4 = scmp.ge.s32.totalorder %s10427_s29, 2  ;;  %p150_p6 = scmp.ne.s32.totalorder %s7336_s19, %s7332_s18 }
  0x11   : > { %p151_p7 = scmp.eq.s32.totalorder %s5850_s27, 3  ;;  %p7487_p8 = por %p145_p5, %p50_p1 }
  0x12   : > { %s10429_s29 = smov (%p36_p4, %s10427_s29), 0  ;;  %s43_s11 = sadd.s32 1, %s7340_s20 }
  0x13   : > { %p7491_p9 = por %p151_p7, %p150_p6  ;;  %s38_s9 = ssub.s32 %s7356_s24, %s10429_s29 }
  0x14   : > { %s40_s10 = sor.u32 %s39_s30, %s38_s9  ;;  %p5852_p11 = scmp.ge.s32.totalorder %s7360_s25, 4 }
  0x15   : > { %p41_p10 = scmp.eq.s32.totalorder %s40_s10, 0 }
  0x16   : > { %204 = sbr.rel (%p5852_p11) target bundleno = 41 (0x29), region = 28 }
  0x17   : > { %s7499_s12 = scalar_select %p41_p10, %s7340_s20, %s43_s11  }
  0x1d   : > { %207 = sbr.rel (!%p7479_p3) target bundleno = 41 (0x29), region = 32  ;;  %s209_s13 = sand.u32 (%p7479_p3), 1, %s7340_s20  }
  0x1e   : > { %s5854_s14 = sshll.u32 (%p7479_p3), %s7356_s24, 3  ;;  %s5853_s15 = sshll.u32 (%p7479_p3), %s209_s13, 5 }
  0x1f   : > { %s213_s16 = sadd.s32 (%p7479_p3), %s7352_s23, %s5854_s14  ;;  %s10331_s0 = sld [smem:[#allocation22_spill]] (%p7479_p3) }
  0x20   : > { %s5855_s17 = sshll.u32 (%p7479_p3), %s213_s16, 3  ;;  %s211_s9 = scalar_lea.vmem (%p7479_p3), [#allocation3], %s5853_s15 }
  0x25   : > { %s215_s30 = scalar_lea.vmem %s10331_s0, %s5855_s17 }
  0x26   : > { %v249_v0 = vld [vmem:[%s215_s30] sm:$0xff]  ;;  %v251_v1 = vld [vmem:[%s215_s30 + $0x10] sm:$0xff] }
  0x27   : > { %v253_v2 = vld [vmem:[%s215_s30 + $0x20] sm:$0xff]  ;;  %250 = vst [vmem:[%s211_s9] sm:$0xff] %v249_v0  ;;  %252 = vst [vmem:[%s211_s9 + $0x8] sm:$0xff] %v251_v1  ;;  %v255_v3 = vld [vmem:[%s215_s30 + $0x30] sm:$0xff] }
  0x28   : > { %254 = vst [vmem:[%s211_s9 + $0x10] sm:$0xff] %v253_v2  ;;  %256 = vst [vmem:[%s211_s9 + $0x18] sm:$0xff] %v255_v3 }
  0x29 PF: > { %p5856_p12 = scmp.ge.s32.totalorder %s7360_s25, 1  ;;  %p261_p13 = scmp.lt.s32.totalorder %s7360_s25, 5 }
  0x2b   : > { %p262_p0 = pnand %p5856_p12, %p261_p13 }
  0x2d   : > { %265 = sbr.rel (%p262_p0) target bundleno = 4338 (0x10f2), region = 70 }
  0x34   : > { %s7513_s6 = sand.u32 1, %s7336_s19   ;;  %p5859_p1 = scmp.ne.s32.totalorder %s7344_s21, 0 }
  0x35   : > { %s5857_s10 = sshll.u32 %s7513_s6, 5  ;;  %s6787_s11 = smul.u32 192, %s7513_s6  ;;  %vm304_vm0 = vcmask (!%p5859_p1), 31744   ;;  %v7362_v4 = vmov (!%p5859_p1), 0.0  }
  0x36   : > { %s7517_s13 = scalar_lea.vmem [#allocation3], %s5857_s10  ;;  %s7519_s14 = scalar_lea.vmem [#allocation4], %s5857_s10  ;;  %305 = vst.msk [vmem:[#allocation2] sm:$0xff] (!%p5859_p1), %vm304_vm0, %v7362_v4  ;;  %306 = vst.msk [vmem:[#allocation2 + $0x8] sm:$0xff] (!%p5859_p1), %vm304_vm0, %v7362_v4 }
  0x37   : > { %s7521_s15 = scalar_lea.vmem [#allocation6], %s6787_s11  ;;  %303 = sbr.rel (%p5859_p1) target bundleno = 66 (0x42), region = 78  ;;  %307 = vst.msk [vmem:[#allocation2 + $0x10] sm:$0xff] (!%p5859_p1), %vm304_vm0, %v7362_v4  ;;  %308 = vst.msk [vmem:[#allocation2 + $0x18] sm:$0xff] (!%p5859_p1), %vm304_vm0, %v7362_v4 }
  0x38   : > { %309 = vst.msk [vmem:[#allocation2 + $0x20] sm:$0xff] (!%p5859_p1), %vm304_vm0, %v7362_v4  ;;  %310 = vst.msk [vmem:[#allocation2 + $0x28] sm:$0xff] (!%p5859_p1), %vm304_vm0, %v7362_v4 }
  0x39   : > { %311 = vst.msk [vmem:[#allocation2 + $0x30] sm:$0xff] (!%p5859_p1), %vm304_vm0, %v7362_v4  ;;  %312 = vst.msk [vmem:[#allocation2 + $0x38] sm:$0xff] (!%p5859_p1), %vm304_vm0, %v7362_v4 }
  0x3a   : > { %313 = vst.msk [vmem:[#allocation2 + $0x40] sm:$0xff] (!%p5859_p1), %vm304_vm0, %v7362_v4  ;;  %314 = vst.msk [vmem:[#allocation2 + $0x48] sm:$0xff] (!%p5859_p1), %vm304_vm0, %v7362_v4 }
  0x3b   : > { %315 = vst.msk [vmem:[#allocation2 + $0x50] sm:$0xff] (!%p5859_p1), %vm304_vm0, %v7362_v4  ;;  %316 = vst.msk [vmem:[#allocation2 + $0x58] sm:$0xff] (!%p5859_p1), %vm304_vm0, %v7362_v4 }
  0x3c   : > { %317 = vst.msk [vmem:[#allocation2 + $0x60] sm:$0xff] (!%p5859_p1), %vm304_vm0, %v7362_v4  ;;  %318 = vst.msk [vmem:[#allocation2 + $0x68] sm:$0xff] (!%p5859_p1), %vm304_vm0, %v7362_v4 }
  0x3d   : > { %319 = vst.msk [vmem:[#allocation2 + $0x70] sm:$0xff] (!%p5859_p1), %vm304_vm0, %v7362_v4  ;;  %320 = vst.msk [vmem:[#allocation2 + $0x78] sm:$0xff] (!%p5859_p1), %vm304_vm0, %v7362_v4 }
  0x3e   : > { %321 = vst.msk [vmem:[#allocation2 + $0x80] sm:$0xff] %vm304_vm0, %v7362_v4  ;;  %322 = vst.msk [vmem:[#allocation2 + $0x88] sm:$0xff] %vm304_vm0, %v7362_v4 }
  0x3f   : > { %323 = vst.msk [vmem:[#allocation2 + $0x90] sm:$0xff] %vm304_vm0, %v7362_v4  ;;  %324 = vst.msk [vmem:[#allocation2 + $0x98] sm:$0xff] %vm304_vm0, %v7362_v4 }
  0x40   : > { %325 = vst.msk [vmem:[#allocation2 + $0xa0] sm:$0xff] %vm304_vm0, %v7362_v4  ;;  %326 = vst.msk [vmem:[#allocation2 + $0xa8] sm:$0xff] %vm304_vm0, %v7362_v4 }
  0x41   : > { %327 = vst.msk [vmem:[#allocation2 + $0xb0] sm:$0xff] %vm304_vm0, %v7362_v4  ;;  %328 = vst.msk [vmem:[#allocation2 + $0xb8] sm:$0xff] %vm304_vm0, %v7362_v4 }
  0x42 PF: > { %v341_v5 = vld [vmem:[#allocation2 + $0x10] sm:$0xff]  ;;  %v342_v6 = vld [vmem:[#allocation2 + $0x18] sm:$0xff]  ;;  %v339_v7 = vld [vmem:[#allocation2] sm:$0xff]  ;;  %vm406_vm1 = vcmask 261120   ;;  %s10332_s1 = sld [smem:[#allocation23_spill]]  ;;  %s10297_s26 = smov 125   ;;  %v334_v50 = vlaneseq }
  0x43   : > { %v7004_v8 = vpack.i.bf16 %v342_v6, %v341_v5  ;;  %v340_v9 = vld [vmem:[#allocation2 + $0x8] sm:$0xff]  ;;  %v331_v10 = vld [vmem:[%s7517_s13 + $0x10] sm:$0xff]  ;;  %v332_v11 = vld [vmem:[%s7517_s13 + $0x18] sm:$0xff]  ;;  %s7364_s27 = smov 1   ;;  %v7365_v24 = vmov 0   ;;  %vm375_vm2 = vcmask 7168  }
  0x44   : > { %v6994_v12 = vpack.i.bf16 %v340_v9, %v339_v7  ;;  %v329_v13 = vld [vmem:[%s7517_s13] sm:$0xff]  ;;  %v330_v14 = vld [vmem:[%s7517_s13 + $0x8] sm:$0xff]  ;;  %v7009_v16 = vpack.i.bf16 %v332_v11, %v331_v10  ;;  %v6623_v18 = vpack.c.bf16 %v332_v11, %v331_v10  ;;  %7015 = vset.pattern.permute.xlu1 %v7365_v24  ;;  %7014 = vset.pattern.permute.xlu0 %v7365_v24  ;;  %v7589_v27 = vld [vmem:[%s10294_s3 + $0x10] sm:$0xff]  ;;  %s5860_s16 = sshll.u32 %s7344_s21, 7  ;;  %v335_v51 = vand.u32 127, %v334_v50  ;;  %s10299_s17 = smov 126  }
  0x45   : > { %7005 = vrot.lane.b32.xlu1 %v7004_v8, %s10297_s26  ;;  %v6619_v17 = vpack.c.bf16 %v330_v14, %v329_v13  ;;  %v6999_v19 = vpack.i.bf16 %v330_v14, %v329_v13  ;;  %v7569_v22 = vld [vmem:[%s10294_s3 + $0x8] sm:$0xff]  ;;  %v7574_v23 = vld [vmem:[%s10294_s3] sm:$0xff]  ;;  %v7594_v28 = vld [vmem:[%s10294_s3 + $0x18] sm:$0xff]  ;;  %s10301_s10 = smov 2   ;;  %s10303_s11 = smov 4  }
  0x46   : > { %6995 = vrot.lane.b32.xlu0 %v6994_v12, %s10297_s26  ;;  %v336_v52 = vstv %s5860_s16  ;;  %s10394_s16 = smov 4   ;;  %s6884_s0 = smul.u32 48, %s7348_s22 }
  0x47   : > { %6620 = vmatprep.subr.bf16.mxu0 %v6619_v17  ;;  %v7617_v53 = vadd.s32 %v336_v52, %v335_v51  ;;  %s5715_s26 = sshll.u32 %s7519_s14, 4  ;;  %s5696_s9 = scalar_lea.sflag [#allocation5], %s7513_s6  ;;  %s10176_s26 = int_to_ptr.vmem [resolvable:$true] %s5715_s26 }
  0x48   : > { %v5861_v15 = vld [vmem:[%s10332_s1 + $0x20] sm:$0xff]  ;;  %6622 = vmatpush3.bf16.msra.mxu0 %v6619_v17  ;;  %v5862_v20 = vld [vmem:[%s10332_s1 + $0x28] sm:$0xff]  ;;  %v5863_v21 = vld [vmem:[%s10332_s1 + $0x30] sm:$0xff] }
  0x49   : > { %6339 = vmatprep.mubr.msk.f32.mxu0 %vm406_vm1, %v5861_v15  ;;  %7010 = vrot.lane.b32.xlu1 %v7009_v16, %s7364_s27  ;;  %v5864_v25 = vld [vmem:[%s10332_s1 + $0x38] sm:$0xff]  ;;  %v397_v26 = vld [vmem:[%s10332_s1] sm:$0xff]  ;;  %v398_v47 = vld [vmem:[%s10332_s1 + $0x8] sm:$0xff]  ;;  %10333 = vst [vmem:[#allocation10_spill] sm:$0xff] %v7617_v53  ;;  %vm338_vm3 = vcmp.ge.s32.totalorder %v7617_v53, 1 }
  0x4a   : > { %6624 = vmatprep.subr.bf16.mxu0 %v6623_v18  ;;  %7000 = vrot.lane.b32.xlu0 %v6999_v19, %s7364_s27  ;;  %v399_v48 = vld [vmem:[%s10332_s1 + $0x10] sm:$0xff]  ;;  %v400_v49 = vld [vmem:[%s10332_s1 + $0x18] sm:$0xff] }
  0x4c   : > { %6626 = vmatpush3.bf16.msra.mxu0 %v6623_v18 }
  0x4d   : > { %612 = vperm.xlu1 %7015, %v7569_v22  }
  0x4e   : > { %607 = vperm.xlu0 %7014, %v7574_v23  }
  0x4f   : > { %6340 = vmatmul.mubr.msk.f32.vlgmr.msra.gmra.mrb[0].mxu0 %vm406_vm1, %v5862_v20 }
  0x50   : > { %6342 = vmatprep.mubr.msk.f32.mxu0 %vm406_vm1, %v5863_v21 }
  0x51   : > { %617 = vperm.xlu1 %7015, %v7589_v27  }
  0x52   : > { %622 = vperm.xlu0 %7014, %v7594_v28  }
  0x53   : > { %6343 = vmatmul.mubr.msk.f32.gmra.mrb[2].mxu0 %vm406_vm1, %v5864_v25 }
  0x54   : > { %6353 = vmatprep.mubr.msk.f32.mxu0 %vm406_vm1, %v397_v26 }
  0xb7   : > { %v7006_v29 = vpop.permute.xlu1 %7005 }
  0xb8   : > { %v6996_v30 = vpop.permute.xlu0 %6995  ;;  %v7008_v31 = vunpack.i.h.bf16 %v7006_v29  ;;  %v7007_v32 = vunpack.i.l.bf16 %v7006_v29  ;;  %v1051_v29 = vld [vmem:[%s10293_s2] sm:$0xff] }
  0xb9   : > { %v6998_v37 = vunpack.i.h.bf16 %v6996_v30  ;;  %v6997_v38 = vunpack.i.l.bf16 %v6996_v30  ;;  %6367 = vmatprep.mubr.msk.f32.mxu1 %vm406_vm1, %v1051_v29 }
  0xbb   : > { %v7011_v33 = vpop.permute.xlu1 %7010 }
  0xbc   : > { %v7013_v34 = vunpack.i.h.bf16 %v7011_v33  ;;  %v7012_v35 = vunpack.i.l.bf16 %v7011_v33  ;;  %v7001_v36 = vpop.permute.xlu0 %7000 }
  0xbd   : > { %v7003_v39 = vunpack.i.h.bf16 %v7001_v36  ;;  %v7002_v40 = vunpack.i.l.bf16 %v7001_v36 }
  0xbe   : > { %v378_v43 = vsel %vm375_vm2, %v7007_v32, %v7012_v35  ;;  %v379_v44 = vsel %vm375_vm2, %v7008_v31, %v7013_v34 }
  0xbf   : > { %v376_v41 = vsel %vm375_vm2, %v6997_v38, %v7002_v40  ;;  %v377_v42 = vsel %vm375_vm2, %v6998_v37, %v7003_v39  ;;  %v6631_v46 = vpack.c.bf16 %v379_v44, %v378_v43  ;;  %v10318_v39 = vmov 683565275  }
  0xc0   : > { %v6627_v45 = vpack.c.bf16 %v377_v42, %v376_v41  ;;  %v10314_v43 = vmov 2475754826  }
  0xc2   : > { %6628 = vmatprep.subr.bf16.mxu0 %v6627_v45 }
  0xc3   : > { %6630 = vmatpush3.bf16.msra.mxu0 %v6627_v45  ;;  %v10312_v45 = vmov 2131351028  }
  0xc4   : > { %6632 = vmatprep.subr.bf16.mxu0 %v6631_v46 }
  0xc7   : > { %6634 = vmatpush3.bf16.msra.mxu0 %v6631_v46 }
  0xca   : > { %6354 = vmatmul.mubr.msk.f32.vlgmr.msra.gmra.mrb[0].mxu0 %vm406_vm1, %v398_v47  ;;  %v10316_v47 = vmov 2102212464  }
  0xcb   : > { %6356 = vmatprep.mubr.msk.f32.mxu0 %vm406_vm1, %v399_v48 }
  0xcc   : > { %v613_v55 = vpop.permute.xlu1 %612 }
  0xcd   : > { %v608_v54 = vpop.permute.xlu0 %607 }
  0xce   : > { %6357 = vmatmul.mubr.msk.f32.gmra.mrb[2].mxu0 %vm406_vm1, %v400_v49  ;;  %v10308_v49 = vmov 920167782  }
  0xd0   : > { %v618_v13 = vpop.permute.xlu1 %617 }
  0xd1   : > { %v623_v63 = vpop.permute.xlu0 %622 }
 0x19d   : > { %v6355_v56 = vpop.f32.mrb[0].mxu0 }
 0x19e   : > { %v626_v57 = vadd.f32 %v6355_v56, %v613_v55  ;;  %v582_v58 = vpop.f32.mrb[1].mxu0 }
 0x19f   : > { %v625_v59 = vadd.f32 %v608_v54, %v582_v58 }
 0x1a0   : > { %v7622_v60 = vsel %vm338_vm3, %v626_v57, 0.0  ;;  %v10306_v57 = vmov 1326507024  }
 0x1a1   : > { %v739_v61 = vand.u32 2147483647, %v7622_v60  ;;  %v742_v62 = vand.u32 2139095040, %v7622_v60  ;;  %v7628_v0 = vsel %vm338_vm3, %v625_v59, 0.0  ;;  %v6358_v1 = vpop.f32.mrb[2].mxu0 }
 0x1a2   : > { %v635_v2 = vand.u32 2147483647, %v7628_v0  ;;  %v638_v3 = vand.u32 2139095040, %v7628_v0  ;;  %v628_v4 = vadd.f32 %v6358_v1, %v623_v63  ;;  %v592_v5 = vpop.f32.mrb[3].mxu0 }
 0x1a3   : > { %v743_v6 = vshrl.u32 %v742_v62, 23  ;;  %v746_v7 = vand.u32 8388607, %v739_v61  ;;  %v627_v18 = vadd.f32 %v618_v13, %v592_v5 }
 0x1a4   : > { %v639_v8 = vshrl.u32 %v638_v3, 23  ;;  %v642_v9 = vand.u32 8388607, %v635_v2  ;;  %v7638_v10 = vsel %vm338_vm3, %v628_v4, 0.0 }
 0x1a5   : > { %v5877_v11 = vadd.s32 4294967169, %v743_v6  ;;  %v947_v12 = vand.u32 2147483647, %v7638_v10  ;;  %v950_v15 = vand.u32 2139095040, %v7638_v10  ;;  %v747_v16 = vor.u32 8388608, %v746_v7 }
 0x1a6   : > { %v5873_v14 = vadd.s32 4294967169, %v639_v8  ;;  %v643_v19 = vor.u32 8388608, %v642_v9  ;;  %v7651_v33 = vsel %vm338_vm3, %v627_v18, 0.0 }
 0x1a7   : > { %v749_v17 = vadd.s32 1, %v5877_v11  ;;  %v951_v21 = vshrl.u32 %v950_v15, 23  ;;  %v7644_v24 = vand.u32 8388607, %v947_v12  ;;  %v7654_v34 = vshll.u32 %v747_v16, 8 }
 0x1a8   : > { %v645_v20 = vadd.s32 1, %v5873_v14  ;;  %v7658_v36 = vshll.u32 %v643_v19, 8 }
 0x1a9   : > { %vm750_vm4 = vcmp.gt.s32.totalorder %v749_v17, 0  ;;  %v5885_v26 = vadd.s32 4294967169, %v951_v21  ;;  %v955_v37 = vor.u32 8388608, %v7644_v24 }
 0x1aa   : > { %v751_v25 = vsel %vm750_vm4, %v749_v17, 0  ;;  %vm646_vm5 = vcmp.gt.s32.totalorder %v645_v20, 0 }
 0x1ab   : > { %v752_v30 = vshrl.u32 %v751_v25, 5  ;;  %v753_v31 = vand.u32 31, %v751_v25  ;;  %v647_v32 = vsel %vm646_vm5, %v645_v20, 0  ;;  %v7662_v42 = vadd.s32 1, %v5885_v26 }
 0x1ac   : > { %v7656_v35 = vshrl.u32 %v647_v32, 5  ;;  %v649_v41 = vand.u32 31, %v647_v32 }
 0x1ad   : > { %v754_v38 = vsub.s32 32, %v753_v31  ;;  %v756_v40 = vshll.u32 %v10318_v39, %v753_v31  ;;  %v759_v44 = vshll.u32 %v10314_v43, %v753_v31  ;;  %v762_v46 = vshll.u32 %v10312_v45, %v753_v31 }
 0x1ae   : > { %v765_v48 = vshll.u32 %v10316_v47, %v753_v31  ;;  %v768_v50 = vshll.u32 %v10308_v49, %v753_v31  ;;  %vm771_vm6 = vcmp.lt.s32.totalorder %v752_v30, 1  ;;  %vm772_vm7 = vcmp.lt.s32.totalorder %v752_v30, 2 }
 0x1af   : > { %v757_v51 = vshrl.u32 %v10314_v43, %v754_v38  ;;  %v760_v52 = vshrl.u32 %v10312_v45, %v754_v38  ;;  %v763_v54 = vshrl.u32 %v10316_v47, %v754_v38  ;;  %v755_v55 = vshrl.u32 %v10318_v39, %v754_v38 }
 0x1b0   : > { %v766_v56 = vshrl.u32 %v10308_v49, %v754_v38  ;;  %v769_v58 = vshrl.u32 %v10306_v57, %v754_v38  ;;  %v650_v1 = vsub.s32 32, %v649_v41  ;;  %vm773_vm8 = vcmp.lt.s32.totalorder %v752_v30, 3 }
 0x1b1   : > { %v758_v59 = vor.u32 %v757_v51, %v756_v40  ;;  %v761_v62 = vor.u32 %v760_v52, %v759_v44  ;;  %v764_v63 = vor.u32 %v763_v54, %v762_v46  ;;  %vm774_vm9 = vcmp.lt.s32.totalorder %v752_v30, 4 }
 0x1b2   : > { %v767_v3 = vor.u32 %v766_v56, %v765_v48  ;;  %v770_v4 = vor.u32 %v769_v58, %v768_v50  ;;  %v652_v14 = vshll.u32 %v10318_v39, %v649_v41  ;;  %v653_v17 = vshrl.u32 %v10314_v43, %v650_v1 }
 0x1b3   : > { %v775_v5 = vsel %vm771_vm6, %v755_v55, %v758_v59  ;;  %v776_v6 = vsel %vm774_vm9, %v764_v63, 2102212464  ;;  %v779_v7 = vsel %vm771_vm6, %v758_v59, %v761_v62  ;;  %v783_v8 = vsel %vm771_vm6, %v761_v62, %v764_v63 }
 0x1b4   : > { %v777_v9 = vsel %vm773_vm8, %v761_v62, %v776_v6  ;;  %v780_v11 = vsel %vm774_vm9, %v767_v3, 920167782  ;;  %v784_v13 = vsel %vm774_vm9, %v770_v4, 1326507024  ;;  %v655_v18 = vshll.u32 %v10314_v43, %v649_v41 }
 0x1b5   : > { %v781_v15 = vsel %vm773_vm8, %v764_v63, %v780_v11  ;;  %v785_v16 = vsel %vm773_vm8, %v767_v3, %v784_v13  ;;  %v778_v19 = vsel %vm772_vm7, %v775_v5, %v777_v9  ;;  %v656_v25 = vshrl.u32 %v10312_v45, %v650_v1 }
 0x1b6   : > { %v782_v20 = vsel %vm772_vm7, %v779_v7, %v781_v15  ;;  %v786_v21 = vsel %vm772_vm7, %v783_v8, %v785_v16  ;;  %v654_v38 = vor.u32 %v653_v17, %v652_v14  ;;  %v658_v44 = vshll.u32 %v10312_v45, %v649_v41 }
 0x1b7   : > { %v7685_v26 = vmul.u32.u64.low %v7654_v34, %v786_v21  ;;  %v7686_v29 = vmul.u32.u64.high %v7654_v34, %v786_v21, %v7685_v26  ;;  %v7689_v31 = vmul.u32.u64.low %v7654_v34, %v782_v20  ;;  %v7690_v32 = vmul.u32.u64.high %v7654_v34, %v782_v20, %v7689_v31 }
 0x1b8   : > { %v657_v40 = vor.u32 %v656_v25, %v655_v18  ;;  %v659_v46 = vshrl.u32 %v10316_v47, %v650_v1  ;;  %v651_v30 = vshrl.u32 %v10318_v39, %v650_v1  ;;  %v661_v48 = vshll.u32 %v10316_v47, %v649_v41 }
 0x1b9   : > { %v662_v50 = vshrl.u32 %v10308_v49, %v650_v1  ;;  %v665_v51 = vshrl.u32 %v10306_v57, %v650_v1  ;;  %v794_v52 = vmul.u32 %v7654_v34, %v778_v19  ;;  %v664_v55 = vshll.u32 %v10308_v49, %v649_v41 }
 0x1ba   : > { %v660_v54 = vor.u32 %v659_v46, %v658_v44  ;;  %vm667_vm10 = vcmp.lt.s32.totalorder %v7656_v35, 1  ;;  %vm796_vm11 = vc.u32 %v7686_v29, %v7689_v31  ;;  %v797_v56 = vadd.s32 1, %v7690_v32 }
 0x1bb   : > { %v663_v58 = vor.u32 %v662_v50, %v661_v48  ;;  %vm668_vm12 = vcmp.lt.s32.totalorder %v7656_v35, 2  ;;  %v666_v59 = vor.u32 %v665_v51, %v664_v55  ;;  %vm669_vm13 = vcmp.lt.s32.totalorder %v7656_v35, 3 }
 0x1bc   : > { %vm670_vm14 = vcmp.lt.s32.totalorder %v7656_v35, 4  ;;  %v675_v62 = vsel %vm667_vm10, %v654_v38, %v657_v40  ;;  %v798_v34 = vsel %vm796_vm11, %v797_v56, %v7690_v32  ;;  %v679_v1 = vsel %vm667_vm10, %v657_v40, %v660_v54 }
 0x1bd   : > { %v672_v63 = vsel %vm670_vm14, %v660_v54, 2102212464  ;;  %v676_v41 = vsel %vm670_vm14, %v663_v58, 920167782  ;;  %v799_v3 = vadd.s32 %v798_v34, %v794_v52  ;;  %v671_v4 = vsel %vm667_vm10, %v651_v30, %v654_v38 }
 0x1be   : > { %v677_v5 = vsel %vm669_vm13, %v660_v54, %v676_v41  ;;  %v680_v6 = vsel %vm670_vm14, %v666_v59, 1326507024  ;;  %v673_v7 = vsel %vm669_vm13, %v657_v40, %v672_v63  ;;  %vm958_vm15 = vcmp.gt.s32.totalorder %v7662_v42, 0 }
 0x1bf   : > { %v678_v8 = vsel %vm668_vm12, %v675_v62, %v677_v5  ;;  %v681_v9 = vsel %vm669_vm13, %v663_v58, %v680_v6  ;;  %v800_v11 = vadd.s32 536870912, %v799_v3  ;;  %v959_v18 = vsel %vm958_vm15, %v7662_v42, 0 }
 0x1c0   : > { %v682_v13 = vsel %vm668_vm12, %v679_v1, %v681_v9  ;;  %v7715_v14 = vmul.u32.u64.low %v7658_v36, %v678_v8  ;;  %v7716_v15 = vmul.u32.u64.high %v7658_v36, %v678_v8, %v7715_v14  ;;  %v846_v19 = vand.u32 2139095040, %v7651_v33 }
 0x1c1   : > { %v7720_v16 = vmul.u32.u64.low %v7658_v36, %v682_v13  ;;  %v7721_v17 = vmul.u32.u64.high %v7658_v36, %v682_v13, %v7720_v16  ;;  %v7725_v20 = vshrl.u32 %v800_v11, 30  ;;  %v674_v21 = vsel %vm668_vm12, %v671_v4, %v673_v7 }
 0x1c2   : > { %v961_v25 = vand.u32 31, %v959_v18  ;;  %v843_v26 = vand.u32 2147483647, %v7651_v33  ;;  %v693_v38 = vadd.s32 1, %v7716_v15  ;;  %v7734_v44 = vshll.u32 %v955_v37, 8 }
 0x1c3   : > { %v802_v32 = vshll.u32 %v7725_v20, 30  ;;  %v690_v42 = vmul.u32 %v7658_v36, %v674_v21  ;;  %vm692_vm0 = vc.u32 %v7721_v17, %v7715_v14  ;;  %v7739_v46 = vshrl.u32 %v959_v18, 5 }
 0x1c4   : > { %v962_v40 = vsub.s32 32, %v961_v25  ;;  %v847_v35 = vshrl.u32 %v846_v19, 23  ;;  %v694_v48 = vsel %vm692_vm0, %v693_v38, %v7716_v15  ;;  %v964_v50 = vshll.u32 %v10318_v39, %v961_v25 }
 0x1c5   : > { %v7741_v30 = vsub.s32 %v799_v3, %v802_v32  ;;  %v967_v51 = vshll.u32 %v10314_v43, %v961_v25  ;;  %v695_v52 = vadd.s32 %v694_v48, %v690_v42  ;;  %v970_v36 = vshll.u32 %v10312_v45, %v961_v25 }
 0x1c6   : > { %v965_v24 = vshrl.u32 %v10314_v43, %v962_v40  ;;  %v968_v37 = vshrl.u32 %v10312_v45, %v962_v40  ;;  %v971_v55 = vshrl.u32 %v10316_v47, %v962_v40  ;;  %v973_v56 = vshll.u32 %v10316_v47, %v961_v25 }
 0x1c7   : > { %v805_v54 = vsub.s32 0, %v7741_v30  ;;  %v974_v58 = vshrl.u32 %v10308_v49, %v962_v40  ;;  %v696_v59 = vadd.s32 536870912, %v695_v52  ;;  %v976_v63 = vshll.u32 %v10308_v49, %v961_v25 }
 0x1c8   : > { %v966_v62 = vor.u32 %v965_v24, %v964_v50  ;;  %v969_v34 = vor.u32 %v968_v37, %v967_v51  ;;  %v972_v1 = vor.u32 %v971_v55, %v970_v36  ;;  %v977_v4 = vshrl.u32 %v10306_v57, %v962_v40 }
 0x1c9   : > { %v5878_v41 = vmin.u32 %v805_v54, %v7741_v30  ;;  %v975_v3 = vor.u32 %v974_v58, %v973_v56  ;;  %v795_v5 = vadd.s32 %v7689_v31, %v7686_v29  ;;  %v697_v6 = vshrl.u32 %v696_v59, 30 }
 0x1ca   : > { %v5881_v7 = vadd.s32 4294967169, %v847_v35  ;;  %v7760_v8 = vand.u32 8388607, %v843_v26  ;;  %v825_v11 = vsub.s32 4, %v7725_v20  ;;  %v978_v13 = vor.u32 %v977_v4, %v976_v63 }
 0x1cb   : > { %v807_v9 = vclz %v5878_v41  ;;  %vm982_vm4 = vcmp.lt.s32.totalorder %v7739_v46, 4  ;;  %v698_v15 = vshll.u32 %v697_v6, 30  ;;  %v963_v16 = vshrl.u32 %v10318_v39, %v962_v40 }
 0x1cc   : > { %vm979_vm5 = vcmp.lt.s32.totalorder %v7739_v46, 1  ;;  %v984_v29 = vsel %vm982_vm4, %v972_v1, 2102212464  ;;  %vm981_vm6 = vcmp.lt.s32.totalorder %v7739_v46, 3  ;;  %v988_v19 = vsel %vm982_vm4, %v975_v3, 920167782 }
 0x1cd   : > { %v5879_v31 = vadd.s32 4294967294, %v807_v9  ;;  %v987_v18 = vsel %vm979_vm5, %v966_v62, %v969_v34  ;;  %vm741_vm7 = vcmp.lt.s32.totalorder %v7622_v60, 0  ;;  %v7772_v21 = vsub.s32 %v695_v52, %v698_v15 }
 0x1ce   : > { %vm980_vm8 = vcmp.lt.s32.totalorder %v7739_v46, 2  ;;  %v989_v25 = vsel %vm981_vm6, %v972_v1, %v988_v19  ;;  %v991_v32 = vsel %vm979_vm5, %v969_v34, %v972_v1  ;;  %vm637_vm10 = vcmp.lt.s32.totalorder %v7628_v0, 0 }
 0x1cf   : > { %vm5880_vm9 = vcmp.lt.s32.totalorder %v5879_v31, 0  ;;  %v983_v38 = vsel %vm979_vm5, %v963_v16, %v966_v62  ;;  %v985_v40 = vsel %vm981_vm6, %v969_v34, %v984_v29  ;;  %v992_v42 = vsel %vm982_vm4, %v978_v13, 1326507024 }
 0x1d0   : > { %v810_v35 = vsel %vm5880_vm9, 0, %v5879_v31  ;;  %v701_v48 = vsub.s32 0, %v7772_v21  ;;  %v990_v50 = vsel %vm980_vm8, %v987_v18, %v989_v25  ;;  %v993_v51 = vsel %vm981_vm6, %v975_v3, %v992_v42 }
 0x1d1   : > { %v811_v52 = vsub.s32 32, %v810_v35  ;;  %v812_v24 = vshll.u32 %v7741_v30, %v810_v35  ;;  %v815_v37 = vsub.s32 4294967266, %v810_v35  ;;  %v994_v36 = vsel %vm980_vm8, %v991_v32, %v993_v51 }
 0x1d2   : > { %v5874_v54 = vmin.u32 %v701_v48, %v7772_v21  ;;  %v7792_v55 = vmul.u32.u64.low %v7734_v44, %v994_v36  ;;  %v7793_v56 = vmul.u32.u64.high %v7734_v44, %v994_v36, %v7792_v55  ;;  %v853_v58 = vadd.s32 1, %v5881_v7 }
 0x1d3   : > { %v813_v59 = vshrl.u32 %v795_v5, %v811_v52  ;;  %v816_v62 = vadd.s32 127, %v815_v37  ;;  %v7796_v34 = vmul.u32.u64.low %v7734_v44, %v990_v50  ;;  %v7797_v63 = vmul.u32.u64.high %v7734_v44, %v990_v50, %v7796_v34 }
 0x1d4   : > { %vm7802_vm11 = vcmp.le.f32.partialorder %v635_v2, 0.7853982  ;;  %v703_v41 = vclz %v5874_v54  ;;  %v721_v1 = vsub.s32 4, %v697_v6  ;;  %vm854_vm12 = vcmp.gt.s32.totalorder %v853_v58, 0 }
 0x1d5   : > { %v814_v3 = vor.u32 %v813_v59, %v812_v24  ;;  %v817_v4 = vshll.u32 %v816_v62, 23  ;;  %v986_v5 = vsel %vm980_vm8, %v983_v38, %v985_v40  ;;  %v855_v7 = vsel %vm854_vm12, %v853_v58, 0 }
 0x1d6   : > { %v691_v9 = vadd.s32 %v7715_v14, %v7721_v17  ;;  %v5875_v13 = vadd.s32 4294967294, %v703_v41  ;;  %vm1004_vm13 = vc.u32 %v7793_v56, %v7796_v34  ;;  %v851_v2 = vor.u32 8388608, %v7760_v8 }
 0x1d7   : > { %vm7815_vm14 = vcmp.le.f32.partialorder %v739_v61, 0.7853982  ;;  %v818_v16 = vor.u32 4788187, %v817_v4  ;;  %v7822_v46 = vsel %vm741_vm7, %v825_v11, %v7725_v20  ;;  %v1005_v14 = vadd.s32 1, %v7797_v63 }
 0x1d8   : > { %v857_v17 = vand.u32 31, %v855_v7  ;;  %v821_v29 = vcvt.s32.f32 %v814_v3  ;;  %vm5876_vm15 = vcmp.lt.s32.totalorder %v5875_v13, 0  ;;  %v7827_v8 = vsel %vm637_vm10, %v721_v1, %v697_v6 }
 0x1d9   : > { %v1002_v61 = vmul.u32 %v7734_v44, %v986_v5  ;;  %v819_v31 = vand.u32 2147483647, %v818_v16  ;;  %v706_v18 = vsel %vm5876_vm15, 0, %v5875_v13  ;;  %v1006_v19 = vsel %vm1004_vm13, %v1005_v14, %v7797_v63 }
 0x1da   : > { %v858_v25 = vsub.s32 32, %v857_v17  ;;  %v707_v32 = vsub.s32 32, %v706_v18  ;;  %v711_v38 = vsub.s32 4294967266, %v706_v18  ;;  %v7831_v11 = vshll.u32 %v851_v2, 8 }
 0x1db   : > { %v1007_v20 = vadd.s32 %v1006_v19, %v1002_v61  ;;  %v822_v40 = vmul.f32 %v821_v29, %v819_v31  ;;  %v7833_v42 = vshrl.u32 %v855_v7, 5  ;;  %v724_v6 = vsel %vm7802_vm11, 0, %v7827_v8 }
 0x1dc   : > { %v861_v35 = vshrl.u32 %v10314_v43, %v858_v25  ;;  %v708_v44 = vshll.u32 %v7772_v21, %v706_v18  ;;  %v709_v48 = vshrl.u32 %v691_v9, %v707_v32  ;;  %v712_v50 = vadd.s32 127, %v711_v38 }
 0x1dd   : > { %v1008_v51 = vadd.s32 536870912, %v1007_v20  ;;  %v823_v52 = vxor.u32 2147483648, %v822_v40  ;;  %v860_v24 = vshll.u32 %v10318_v39, %v857_v17  ;;  %v863_v37 = vshll.u32 %v10314_v43, %v857_v17 }
 0x1de   : > { %v864_v36 = vshrl.u32 %v10312_v45, %v858_v25  ;;  %v710_v54 = vor.u32 %v709_v48, %v708_v44  ;;  %v713_v55 = vshll.u32 %v712_v50, 23  ;;  %v867_v59 = vshrl.u32 %v10316_v47, %v858_v25 }
 0x1df   : > { %v7843_v58 = vshrl.u32 %v1008_v51, 30  ;;  %v824_v62 = vsel %vm741_vm7, %v823_v52, %v822_v40  ;;  %v862_v21 = vor.u32 %v861_v35, %v860_v24  ;;  %v866_v63 = vshll.u32 %v10312_v45, %v857_v17 }
 0x1e0   : > { %v870_v41 = vshrl.u32 %v10308_v49, %v858_v25  ;;  %v827_v1 = vsel %vm7815_vm14, %v7622_v60, %v824_v62  ;;  %v714_v3 = vor.u32 4788187, %v713_v55  ;;  %v869_v5 = vshll.u32 %v10316_v47, %v857_v17 }
 0x1e1   : > { %v1010_v4 = vshll.u32 %v7843_v58, 30  ;;  %7110 = vcosq.f32 %v827_v1  ;;  %v717_v7 = vcvt.s32.f32 %v710_v54  ;;  %v865_v9 = vor.u32 %v864_v36, %v863_v37 }
 0x1e2   : > { %v868_v13 = vor.u32 %v867_v59, %v866_v63  ;;  %7112 = vsinq.f32 %v827_v1  ;;  %v715_v2 = vand.u32 2147483647, %v714_v3  ;;  %v871_v14 = vor.u32 %v870_v41, %v869_v5 }
 0x1e3   : > { %v7855_v16 = vsub.s32 %v1007_v20, %v1010_v4  ;;  %v872_v29 = vshll.u32 %v10308_v49, %v857_v17  ;;  %v873_v61 = vshrl.u32 %v10306_v57, %v858_v25  ;;  %vm875_vm0 = vcmp.lt.s32.totalorder %v7833_v42, 1 }
 0x1e4   : > { %vm878_vm4 = vcmp.lt.s32.totalorder %v7833_v42, 4  ;;  %v718_v31 = vmul.f32 %v717_v7, %v715_v2  ;;  %v859_v19 = vshrl.u32 %v10318_v39, %v858_v25  ;;  %vm876_vm5 = vcmp.lt.s32.totalorder %v7833_v42, 2 }
 0x1e5   : > { %v1013_v18 = vsub.s32 0, %v7855_v16  ;;  %v880_v32 = vsel %vm878_vm4, %v868_v13, 2102212464  ;;  %v874_v38 = vor.u32 %v873_v61, %v872_v29  ;;  %vm877_vm6 = vcmp.lt.s32.totalorder %v7833_v42, 3 }
 0x1e6   : > { %v883_v17 = vsel %vm875_vm0, %v862_v21, %v865_v9  ;;  %v719_v20 = vxor.u32 2147483648, %v718_v31  ;;  %v879_v35 = vsel %vm875_vm0, %v859_v19, %v862_v21  ;;  %v884_v25 = vsel %vm878_vm4, %v871_v14, 920167782 }
 0x1e7   : > { %v5886_v40 = vmin.u32 %v1013_v18, %v7855_v16  ;;  %v881_v44 = vsel %vm877_vm6, %v865_v9, %v880_v32  ;;  %v885_v48 = vsel %vm877_vm6, %v868_v13, %v884_v25  ;;  %v887_v50 = vsel %vm875_vm0, %v865_v9, %v868_v13 }
 0x1e8   : > { %v888_v51 = vsel %vm878_vm4, %v874_v38, 1326507024  ;;  %v720_v52 = vsel %vm637_vm10, %v719_v20, %v718_v31  ;;  %v886_v37 = vsel %vm876_vm5, %v883_v17, %v885_v48  ;;  %v882_v3 = vsel %vm876_vm5, %v879_v35, %v881_v44 }
 0x1e9   : > { %v1015_v24 = vclz %v5886_v40  ;;  %v889_v36 = vsel %vm877_vm6, %v871_v14, %v888_v51  ;;  %v723_v54 = vsel %vm7802_vm11, %v7628_v0, %v720_v52  ;;  %v828_v4 = vsel %vm7815_vm14, 0, %v7822_v46 }
 0x1ea   : > { %v890_v55 = vsel %vm876_vm5, %v887_v50, %v889_v36  ;;  %v7888_v59 = vmul.u32.u64.low %v7831_v11, %v886_v37  ;;  %v7889_v62 = vmul.u32.u64.high %v7831_v11, %v886_v37, %v7888_v59  ;;  %7114 = vcosq.f32 %v723_v54 }
 0x1eb   : > { %v5887_v21 = vadd.s32 4294967294, %v1015_v24  ;;  %v7893_v63 = vmul.u32.u64.low %v7831_v11, %v890_v55  ;;  %v7894_v41 = vmul.u32.u64.high %v7831_v11, %v890_v55, %v7893_v63  ;;  %v7111_v1 = vpop.eup %7110  ;;  %7116 = vsinq.f32 %v723_v54 }
 0x1ec   : > { %v7113_v5 = vpop.eup %7112  ;;  %v832_v7 = vadd.s32 3, %v828_v4  ;;  %v901_v13 = vadd.s32 1, %v7889_v62  ;;  %v728_v2 = vadd.s32 3, %v724_v6  ;;  %v898_v29 = vmul.u32 %v7831_v11, %v882_v3 }
 0x1ed   : > { %vm5888_vm7 = vcmp.lt.s32.totalorder %v5887_v21, 0  ;;  %v839_v42 = vxor.u32 2147483648, %v7111_v1  ;;  %vm900_vm8 = vc.u32 %v7894_v41, %v7888_v59  ;;  %v836_v46 = vxor.u32 2147483648, %v7113_v5 }
 0x1ee   : > { %v1018_v9 = vsel %vm5888_vm7, 0, %v5887_v21  ;;  %v833_v15 = vand.u32 3, %v832_v7  ;;  %v1003_v31 = vadd.s32 %v7796_v34, %v7793_v56  ;;  %v902_v19 = vsel %vm900_vm8, %v901_v13, %v7889_v62 }
 0x1ef   : > { %v1023_v14 = vsub.s32 4294967266, %v1018_v9  ;;  %v1019_v61 = vsub.s32 32, %v1018_v9  ;;  %v903_v30 = vadd.s32 %v902_v19, %v898_v29  ;;  %v729_v32 = vand.u32 3, %v728_v2 }
 0x1f0   : > { %vm835_vm9 = vcmp.eq.s32.totalorder %v833_v15, 0  ;;  %vm838_vm10 = vcmp.eq.s32.totalorder %v833_v15, 2  ;;  %vm834_vm11 = vcmp.lt.s32.totalorder %v833_v15, 2  ;;  %vm831_vm12 = vweird.f32 %v7622_v60 }
 0x1f1   : > { %v1024_v18 = vadd.s32 127, %v1023_v14  ;;  %v837_v11 = vsel %vm835_vm9, %v7111_v1, %v836_v46  ;;  %v840_v6 = vsel %vm838_vm10, %v839_v42, %v7113_v5  ;;  %v1021_v38 = vshrl.u32 %v1003_v31, %v1019_v61 }
 0x1f2   : > { %v904_v17 = vadd.s32 536870912, %v903_v30  ;;  %v841_v20 = vsel %vm834_vm11, %v837_v11, %v840_v6  ;;  %v1020_v56 = vshll.u32 %v7855_v16, %v1018_v9  ;;  %v7372_v50 = vmov 1  }
 0x1f3   : > { %v1025_v8 = vshll.u32 %v1024_v18, 23  ;;  %v842_v35 = vsel %vm831_vm12, nan, %v841_v20  ;;  %7016 = vset.pattern.permute.xlu1 %v7372_v50  ;;  %7017 = vset.pattern.permute.xlu0 %v7372_v50  ;;  %vm734_vm13 = vcmp.eq.s32.totalorder %v729_v32, 2  ;;  %vm731_vm14 = vcmp.eq.s32.totalorder %v729_v32, 0 }
 0x1f4   : > { %v7115_v40 = vpop.eup %7114  ;;  %v905_v44 = vshrl.u32 %v904_v17, 30  ;;  %1189 = vperm.xlu1 %7016, %v7574_v23   ;;  %1193 = vperm.xlu0 %7017, %v7569_v22   ;;  %v1022_v52 = vor.u32 %v1021_v38, %v1020_v56  ;;  %vm730_vm15 = vcmp.lt.s32.totalorder %v729_v32, 2  ;;  %vm727_vm0 = vweird.f32 %v7628_v0 }
 0x1f5   : > { %v7117_v25 = vpop.eup %7116  ;;  %v1026_v34 = vor.u32 4788187, %v1025_v8  ;;  %v735_v48 = vxor.u32 2147483648, %v7115_v40  ;;  %vm949_vm5 = vcmp.lt.s32.totalorder %v7638_v10, 0  ;;  %vm7926_vm6 = vcmp.le.f32.partialorder %v947_v12, 0.7853982 }
 0x1f6   : > { %v732_v51 = vxor.u32 2147483648, %v7117_v25  ;;  %v906_v60 = vshll.u32 %v905_v44, 30  ;;  %v1029_v62 = vcvt.s32.f32 %v1022_v52  ;;  %v1033_v15 = vsub.s32 4, %v7843_v58 }
 0x1f7   : > { %v736_v24 = vsel %vm734_vm13, %v735_v48, %v7117_v25  ;;  %v1027_v36 = vand.u32 2147483647, %v1026_v34  ;;  %v929_v18 = vsub.s32 4, %v905_v44  ;;  %vm845_vm7 = vcmp.lt.s32.totalorder %v7651_v33, 0 }
 0x1f8   : > { %v733_v37 = vsel %vm731_vm14, %v7115_v40, %v732_v51  ;;  %v907_v16 = vsub.s32 %v903_v30, %v906_v60  ;;  %1197 = vperm.xlu1 %7016, %v7589_v27   ;;  %v899_v27 = vadd.s32 %v7888_v59, %v7894_v41  ;;  %v1034_v12 = vsel %vm949_vm5, %v1033_v15, %v7843_v58 }
 0x1f9   : > { %v737_v54 = vsel %vm730_vm15, %v733_v37, %v736_v24  ;;  %v1030_v23 = vmul.f32 %v1029_v62, %v1027_v36  ;;  %v1036_v19 = vsel %vm7926_vm6, 0, %v1034_v12  ;;  %vm844_vm8 = vcmp.le.f32.partialorder %v843_v26, 0.7853982  ;;  %v1053_v62 = vld [vmem:[%s10293_s2 + $0x10] sm:$0xff] }
 0x1fa   : > { %v738_v55 = vsel %vm727_vm0, nan, %v737_v54  ;;  %v909_v21 = vsub.s32 0, %v907_v16  ;;  %v930_v8 = vsel %vm845_vm7, %v929_v18, %v905_v44  ;;  %v1040_v11 = vadd.s32 3, %v1036_v19  ;;  %v7209_v19 = vld [vmem:[%s7517_s13 + $0x10] sm:$0xff] }
 0x1fb   : > { %v6635_v63 = vpack.c.bf16 %v842_v35, %v738_v55  ;;  %v1031_v3 = vxor.u32 2147483648, %v1030_v23  ;;  %v932_v58 = vsel %vm844_vm8, 0, %v930_v8  ;;  %vm1039_vm14 = vweird.f32 %v7638_v10  ;;  %v1052_v55 = vld [vmem:[%s10293_s2 + $0x8] sm:$0xff] }
 0x1fc   : > { %v5882_v1 = vmin.u32 %v909_v21, %v907_v16  ;;  %1201 = vperm.xlu1 %7016, %v7594_v28   ;;  %v1041_v20 = vand.u32 3, %v1040_v11  ;;  %v936_v40 = vadd.s32 3, %v932_v58  ;;  %vm935_vm0 = vweird.f32 %v7651_v33  ;;  %v1243_v21 = vld [vmem:[#allocation2 + $0x28] sm:$0xff]  ;;  %v7988_v58 = vld [vmem:[%s10294_s3] sm:$0xff] }
 0x1fd   : > { %6636 = vmatprep.subr.bf16.mxu1 %v6635_v63  ;;  %v1032_v5 = vsel %vm949_vm5, %v1031_v3, %v1030_v23  ;;  %v1244_v23 = vld [vmem:[#allocation2 + $0x30] sm:$0xff]  ;;  %vm1240_vm5 = vcmp.ge.s32.totalorder %v7617_v53, 2 }
 0x1fe   : > { %6638 = vmatpush3.bf16.msra.mxu1 %v6635_v63  ;;  %v911_v22 = vclz %v5882_v1  ;;  %v1035_v29 = vsel %vm7926_vm6, %v7638_v10, %v1032_v5  ;;  %vm1043_vm9 = vcmp.eq.s32.totalorder %v1041_v20, 0  ;;  %vm1046_vm10 = vcmp.eq.s32.totalorder %v1041_v20, 2  ;;  %v1054_v10 = vld [vmem:[%s10293_s2 + $0x18] sm:$0xff] }
 0x1ff   : > { %7118 = vcosq.f32 %v1035_v29  ;;  %v937_v56 = vand.u32 3, %v936_v40  ;;  %vm1042_vm11 = vcmp.lt.s32.totalorder %v1041_v20, 2  ;;  %v1245_v1 = vld [vmem:[#allocation2 + $0x38] sm:$0xff]  ;;  %v5902_v20 = vld [vmem:[%s10332_s1 + $0x68] sm:$0xff]  ;;  %v7375_v40 = vmov 3  }
 0x200   : > { %v5883_v4 = vadd.s32 4294967294, %v911_v22  ;;  %7120 = vsinq.f32 %v1035_v29  ;;  %v7023_v22 = vpack.i.bf16 %v1245_v1, %v1244_v23  ;;  %v7207_v29 = vld [vmem:[%s7517_s13] sm:$0xff]  ;;  %7039 = vset.pattern.permute.xlu1 %v7375_v40  ;;  %7038 = vset.pattern.permute.xlu0 %v7375_v40 }
 0x201   : > { %vm942_vm12 = vcmp.eq.s32.totalorder %v937_v56, 2  ;;  %vm939_vm13 = vcmp.eq.s32.totalorder %v937_v56, 0  ;;  %vm938_vm15 = vcmp.lt.s32.totalorder %v937_v56, 2  ;;  %v8007_v56 = vld [vmem:[%s10294_s3 + $0x18] sm:$0xff] }
 0x202   : > { %vm5884_vm4 = vcmp.lt.s32.totalorder %v5883_v4, 0 }
 0x203   : > { %v914_v0 = vsel %vm5884_vm4, 0, %v5883_v4  ;;  %vm1278_vm4 = vcmask 15360  }
 0x204   : > { %v915_v7 = vsub.s32 32, %v914_v0  ;;  %v919_v9 = vsub.s32 4294967266, %v914_v0  ;;  %v916_v28 = vshll.u32 %v907_v16, %v914_v0 }
 0x206   : > { %v917_v2 = vshrl.u32 %v899_v27, %v915_v7  ;;  %v920_v14 = vadd.s32 127, %v919_v9  ;;  %v5901_v9 = vld [vmem:[%s10332_s1 + $0x60] sm:$0xff] }
 0x207   : > { %6387 = vmatprep.mubr.msk.f32.mxu0 %vm406_vm1, %v5901_v9 }
 0x208   : > { %v918_v42 = vor.u32 %v917_v2, %v916_v28  ;;  %v921_v61 = vshll.u32 %v920_v14, 23  ;;  %v7206_v28 = vld [vmem:[%s7517_s13 + $0x8] sm:$0xff] }
 0x209   : > { %v7119_v38 = vpop.eup %7118 }
 0x20a   : > { %v922_v59 = vor.u32 4788187, %v921_v61  ;;  %v925_v46 = vcvt.s32.f32 %v918_v42  ;;  %v7121_v17 = vpop.eup %7120  ;;  %v1047_v25 = vxor.u32 2147483648, %v7119_v38 }
 0x20b   : > { %v1044_v35 = vxor.u32 2147483648, %v7121_v17 }
 0x20c   : > { %v923_v41 = vand.u32 2147483647, %v922_v59  ;;  %v1048_v48 = vsel %vm1046_vm10, %v1047_v25, %v7121_v17  ;;  %v5903_v25 = vld [vmem:[%s10332_s1 + $0x70] sm:$0xff] }
 0x20d   : > { %v1045_v34 = vsel %vm1043_vm9, %v7119_v38, %v1044_v35  ;;  %v7996_v35 = vld [vmem:[%s10294_s3 + $0x8] sm:$0xff] }
 0x20e   : > { %v926_v31 = vmul.f32 %v925_v46, %v923_v41  ;;  %v1049_v51 = vsel %vm1042_vm11, %v1045_v34, %v1048_v48  ;;  %v5904_v34 = vld [vmem:[%s10332_s1 + $0x78] sm:$0xff]  ;;  %v8016_v48 = vld [vmem:[%s10294_s3 + $0x10] sm:$0xff] }
 0x20f   : > { %v1050_v37 = vsel %vm1039_vm14, nan, %v1049_v51 }
 0x210   : > { %v927_v30 = vxor.u32 2147483648, %v926_v31 }
 0x212   : > { %v928_v32 = vsel %vm845_vm7, %v927_v30, %v926_v31  ;;  %v7208_v31 = vld [vmem:[%s7517_s13 + $0x18] sm:$0xff] }
 0x213   : > { %v931_v6 = vsel %vm844_vm8, %v7651_v33, %v928_v32  ;;  %v1242_v33 = vld [vmem:[#allocation2 + $0x20] sm:$0xff] }
 0x214   : > { %7122 = vcosq.f32 %v931_v6  ;;  %v7018_v63 = vpack.i.bf16 %v1243_v21, %v1242_v33 }
 0x215   : > { %7124 = vsinq.f32 %v931_v6 }
 0x216   : > { %7019 = vrot.lane.b32.xlu0 %v7018_v63, %s10299_s17 }
 0x21a   : > { %7024 = vrot.lane.b32.xlu0 %v7023_v22, %s10299_s17  ;;  %v5898_v22 = vld [vmem:[%s10332_s1 + $0x48] sm:$0xff]  ;;  %s10381_s17 = smov 126  }
 0x21e   : > { %v7123_v26 = vpop.eup %7122  ;;  %1509 = vperm.xlu0 %7038, %v7988_v58  }
 0x21f   : > { %v7125_v44 = vpop.eup %7124  ;;  %v943_v50 = vxor.u32 2147483648, %v7123_v26 }
 0x220   : > { %v940_v52 = vxor.u32 2147483648, %v7125_v44 }
 0x221   : > { %v944_v60 = vsel %vm942_vm12, %v943_v50, %v7125_v44 }
 0x222   : > { %v941_v24 = vsel %vm939_vm13, %v7123_v26, %v940_v52  ;;  %v5897_v26 = vld [vmem:[%s10332_s1 + $0x40] sm:$0xff]  ;;  %1524 = vperm.xlu0 %7038, %v8007_v56  }
 0x223   : > { %v945_v36 = vsel %vm938_vm15, %v941_v24, %v944_v60 }
 0x224   : > { %v946_v16 = vsel %vm935_vm0, nan, %v945_v36 }
 0x225   : > { %v6639_v54 = vpack.c.bf16 %v1050_v37, %v946_v16 }
 0x227   : > { %6640 = vmatprep.subr.bf16.mxu1 %v6639_v54 }
 0x228   : > { %6642 = vmatpush3.bf16.msra.mxu1 %v6639_v54 }
 0x22b   : > { %6368 = vmatmul.mubr.msk.f32.vlgmr.msra.gmra.mrb[0].mxu1 %vm406_vm1, %v1052_v55 }
 0x22c   : > { %6370 = vmatprep.mubr.msk.f32.mxu1 %vm406_vm1, %v1053_v62 }
 0x22f   : > { %6371 = vmatmul.mubr.msk.f32.gmra.mrb[2].mxu1 %vm406_vm1, %v1054_v10 }
 0x273   : > { %v1190_v3 = vpop.permute.xlu1 %1189  ;;  %v1194_v0 = vpop.permute.xlu0 %1193 }
 0x277   : > { %v1198_v4 = vpop.permute.xlu1 %1197 }
 0x27b   : > { %v1202_v14 = vpop.permute.xlu1 %1201 }
 0x288   : > { %v7020_v44 = vpop.permute.xlu0 %7019 }
 0x289   : > { %v7022_v50 = vunpack.i.h.bf16 %v7020_v44  ;;  %v7021_v51 = vunpack.i.l.bf16 %v7020_v44 }
 0x28c   : > { %v7025_v60 = vpop.permute.xlu0 %7024 }
 0x28d   : > { %v7027_v36 = vunpack.i.h.bf16 %v7025_v60  ;;  %v7026_v16 = vunpack.i.l.bf16 %v7025_v60 }
 0x2fe   : > { %v6369_v5 = vpop.f32.mrb[0].mxu1 }
 0x2ff   : > { %v1205_v27 = vadd.f32 %v6369_v5, %v1194_v0  ;;  %v1149_v7 = vpop.f32.mrb[1].mxu1  ;;  %v1510_v0 = vpop.permute.xlu0 %1509  ;;  %v1055_v5 = vld [vmem:[%s10293_s2 + $0x20] sm:$0xff] }
 0x300   : > { %v1204_v13 = vadd.f32 %v1190_v3, %v1149_v7  ;;  %v5899_v3 = vld [vmem:[%s10332_s1 + $0x50] sm:$0xff]  ;;  %6373 = vmatprep.mubr.msk.f32.mxu1 %vm406_vm1, %v1055_v5 }
 0x301   : > { %v1233_v2 = vadd.f32 %v7206_v28, %v1205_v27  ;;  %v1056_v27 = vld [vmem:[%s10293_s2 + $0x28] sm:$0xff]  ;;  %v1057_v7 = vld [vmem:[%s10293_s2 + $0x30] sm:$0xff] }
 0x302   : > { %v1232_v42 = vadd.f32 %v7207_v29, %v1204_v13  ;;  %v6372_v61 = vpop.f32.mrb[2].mxu1  ;;  %6374 = vmatmul.mubr.msk.f32.gmra.mrb[4].mxu1 %vm406_vm1, %v1056_v27  ;;  %v1058_v29 = vld [vmem:[%s10293_s2 + $0x38] sm:$0xff] }
 0x303   : > { %v7965_v15 = vmul.f32 0.5, %v1233_v2  ;;  %v1207_v59 = vadd.f32 %v6372_v61, %v1202_v14  ;;  %v1159_v41 = vpop.f32.mrb[3].mxu1  ;;  %6376 = vmatprep.mubr.msk.f32.mxu1 %vm406_vm1, %v1057_v7 }
 0x304   : > { %v7967_v46 = vmul.f32 0.5, %v1232_v42  ;;  %v1206_v12 = vadd.f32 %v1198_v4, %v1159_v41  ;;  %v5900_v4 = vld [vmem:[%s10332_s1 + $0x58] sm:$0xff]  ;;  %v1525_v41 = vpop.permute.xlu0 %1524 }
 0x305   : > { %v1235_v18 = vadd.f32 %v7208_v31, %v1207_v59 }
 0x306   : > { %v1234_v30 = vadd.f32 %v7209_v19, %v1206_v12  ;;  %v7028_v32 = vpack.i.bf16 %v7965_v15, %v7967_v46  ;;  %v6643_v8 = vpack.c.bf16 %v7965_v15, %v7967_v46  ;;  %6377 = vmatmul.mubr.msk.f32.gmra.mrb[6].mxu1 %vm406_vm1, %v1058_v29 }
 0x307   : > { %v7975_v11 = vmul.f32 0.5, %v1235_v18 }
 0x308   : > { %v7977_v6 = vmul.f32 0.5, %v1234_v30  ;;  %7029 = vrot.lane.b32.xlu1 %v7028_v32, %s10301_s10  ;;  %6644 = vmatprep.subr.bf16.mxu0 %v6643_v8 }
 0x309   : > { %6646 = vmatpush3.bf16.msra.mxu0 %v6643_v8 }
 0x30a   : > { %v7033_v38 = vpack.i.bf16 %v7975_v11, %v7977_v6  ;;  %v6647_v17 = vpack.c.bf16 %v7975_v11, %v7977_v6 }
 0x30c   : > { %7034 = vrot.lane.b32.xlu1 %v7033_v38, %s10301_s10  ;;  %6648 = vmatprep.subr.bf16.mxu0 %v6647_v17 }
 0x30d   : > { %6650 = vmatpush3.bf16.msra.mxu0 %v6647_v17 }
 0x310   : > { %6388 = vmatmul.mubr.msk.f32.vlgmr.msra.gmra.mrb[4].mxu0 %vm406_vm1, %v5902_v20  ;;  %1514 = vperm.xlu1 %7039, %v7996_v35  }
 0x311   : > { %6390 = vmatprep.mubr.msk.f32.mxu0 %vm406_vm1, %v5903_v25 }
 0x314   : > { %6391 = vmatmul.mubr.msk.f32.gmra.mrb[6].mxu0 %vm406_vm1, %v5904_v34  ;;  %1519 = vperm.xlu1 %7039, %v8016_v48  }
 0x315   : > { %6401 = vmatprep.mubr.msk.f32.mxu0 %vm406_vm1, %v5897_v26 }
 0x37a   : > { %v7030_v52 = vpop.permute.xlu1 %7029 }
 0x37b   : > { %v7032_v24 = vunpack.i.h.bf16 %v7030_v52  ;;  %v7031_v37 = vunpack.i.l.bf16 %v7030_v52 }
 0x37d   : > { %v1279_v54 = vsel %vm1278_vm4, %v7021_v51, %v7031_v37  ;;  %v1280_v55 = vsel %vm1278_vm4, %v7022_v50, %v7032_v24 }
 0x37e   : > { %v7035_v62 = vpop.permute.xlu1 %7034  ;;  %v6651_v10 = vpack.c.bf16 %v1280_v55, %v1279_v54 }
 0x37f   : > { %v7037_v33 = vunpack.i.h.bf16 %v7035_v62  ;;  %v7036_v21 = vunpack.i.l.bf16 %v7035_v62 }
 0x380   : > { %6652 = vmatprep.subr.bf16.mxu0 %v6651_v10 }
 0x381   : > { %6654 = vmatpush3.bf16.msra.mxu0 %v6651_v10  ;;  %v1281_v63 = vsel %vm1278_vm4, %v7026_v16, %v7036_v21  ;;  %v1282_v23 = vsel %vm1278_vm4, %v7027_v36, %v7037_v33 }
 0x382   : > { %v6655_v1 = vpack.c.bf16 %v1282_v23, %v1281_v63 }
 0x384   : > { %6656 = vmatprep.subr.bf16.mxu0 %v6655_v1 }
 0x385   : > { %6658 = vmatpush3.bf16.msra.mxu0 %v6655_v1 }
 0x388   : > { %6402 = vmatmul.mubr.msk.f32.vlgmr.msra.gmra.mrb[4].mxu0 %vm406_vm1, %v5898_v22 }
 0x389   : > { %6404 = vmatprep.mubr.msk.f32.mxu0 %vm406_vm1, %v5899_v3 }
 0x38c   : > { %6405 = vmatmul.mubr.msk.f32.gmra.mrb[6].mxu0 %vm406_vm1, %v5900_v4 }
 0x38f   : > { %v1515_v9 = vpop.permute.xlu1 %1514 }
 0x393   : > { %v1520_v34 = vpop.permute.xlu1 %1519 }
 0x45b   : > { %v6403_v13 = vpop.f32.mrb[4].mxu0 }
 0x45c   : > { %v1528_v28 = vadd.f32 %v6403_v13, %v1515_v9  ;;  %v1484_v2 = vpop.f32.mrb[5].mxu0 }
 0x45d   : > { %v1527_v14 = vadd.f32 %v1510_v0, %v1484_v2 }
 0x45e   : > { %v8059_v42 = vsel %vm1240_vm5, %v1528_v28, 0.0 }
 0x45f   : > { %v1641_v61 = vand.u32 2147483647, %v8059_v42  ;;  %v1644_v59 = vand.u32 2139095040, %v8059_v42  ;;  %v8065_v12 = vsel %vm1240_vm5, %v1527_v14, 0.0  ;;  %v6406_v31 = vpop.f32.mrb[6].mxu0  ;;  %v5929_v14 = vld [vmem:[%s10293_s2 + $0x40] sm:$0xff] }
 0x460   : > { %v1537_v18 = vand.u32 2147483647, %v8065_v12  ;;  %v1540_v19 = vand.u32 2139095040, %v8065_v12  ;;  %v1530_v30 = vadd.f32 %v6406_v31, %v1525_v41  ;;  %v1494_v32 = vpop.f32.mrb[7].mxu0  ;;  %6415 = vmatprep.mubr.msk.f32.mxu1 %vm406_vm1, %v5929_v14 }
 0x461   : > { %v1645_v8 = vshrl.u32 %v1644_v59, 23  ;;  %v1648_v38 = vand.u32 8388607, %v1641_v61  ;;  %v1529_v52 = vadd.f32 %v1520_v34, %v1494_v32 }
 0x462   : > { %v1541_v17 = vshrl.u32 %v1540_v19, 23  ;;  %v1544_v20 = vand.u32 8388607, %v1537_v18  ;;  %v8076_v40 = vsel %vm1240_vm5, %v1530_v30, 0.0 }
 0x463   : > { %v5917_v25 = vadd.s32 4294967169, %v1645_v8  ;;  %v1852_v44 = vand.u32 2139095040, %v8076_v40  ;;  %v1649_v50 = vor.u32 8388608, %v1648_v38  ;;  %v1849_v37 = vand.u32 2147483647, %v8076_v40 }
 0x464   : > { %v5913_v26 = vadd.s32 4294967169, %v1541_v17  ;;  %v1545_v60 = vor.u32 8388608, %v1544_v20  ;;  %v8082_v33 = vsel %vm1240_vm5, %v1529_v52, 0.0 }
 0x465   : > { %v1651_v51 = vadd.s32 1, %v5917_v25  ;;  %v1853_v36 = vshrl.u32 %v1852_v44, 23  ;;  %v8084_v21 = vshll.u32 %v1649_v50, 8  ;;  %v8092_v1 = vand.u32 8388607, %v1849_v37 }
 0x466   : > { %v1547_v24 = vadd.s32 1, %v5913_v26  ;;  %v8088_v23 = vshll.u32 %v1545_v60, 8 }
 0x467   : > { %vm1652_vm6 = vcmp.gt.s32.totalorder %v1651_v51, 0  ;;  %v5925_v54 = vadd.s32 4294967169, %v1853_v36 }
 0x468   : > { %v1653_v16 = vsel %vm1652_vm6, %v1651_v51, 0  ;;  %vm1548_vm7 = vcmp.gt.s32.totalorder %v1547_v24, 0 }
 0x469   : > { %v1654_v55 = vshrl.u32 %v1653_v16, 5  ;;  %v1655_v62 = vand.u32 31, %v1653_v16  ;;  %v1549_v10 = vsel %vm1548_vm7, %v1547_v24, 0  ;;  %v8095_v0 = vadd.s32 1, %v5925_v54 }
 0x46a   : > { %v8086_v63 = vshrl.u32 %v1549_v10, 5  ;;  %v1551_v4 = vand.u32 31, %v1549_v10 }
 0x46b   : > { %v1656_v22 = vsub.s32 32, %v1655_v62  ;;  %v1658_v3 = vshll.u32 %v10318_v39, %v1655_v62  ;;  %v1661_v5 = vshll.u32 %v10314_v43, %v1655_v62  ;;  %v1664_v27 = vshll.u32 %v10312_v45, %v1655_v62 }
 0x46c   : > { %v1667_v7 = vshll.u32 %v10316_v47, %v1655_v62  ;;  %v1670_v9 = vshll.u32 %v10308_v49, %v1655_v62  ;;  %vm1673_vm8 = vcmp.lt.s32.totalorder %v1654_v55, 1  ;;  %vm1674_vm9 = vcmp.lt.s32.totalorder %v1654_v55, 2 }
 0x46d   : > { %v1659_v13 = vshrl.u32 %v10314_v43, %v1656_v22  ;;  %v1662_v28 = vshrl.u32 %v10312_v45, %v1656_v22  ;;  %v1665_v2 = vshrl.u32 %v10316_v47, %v1656_v22  ;;  %v1657_v29 = vshrl.u32 %v10318_v39, %v1656_v22 }
 0x46e   : > { %v1668_v59 = vshrl.u32 %v10308_v49, %v1656_v22  ;;  %v1671_v41 = vshrl.u32 %v10306_v57, %v1656_v22  ;;  %v1552_v32 = vsub.s32 32, %v1551_v4  ;;  %vm1675_vm10 = vcmp.lt.s32.totalorder %v1654_v55, 3 }
 0x46f   : > { %v1660_v31 = vor.u32 %v1659_v13, %v1658_v3  ;;  %v1663_v19 = vor.u32 %v1662_v28, %v1661_v5  ;;  %v1666_v30 = vor.u32 %v1665_v2, %v1664_v27  ;;  %vm1676_vm11 = vcmp.lt.s32.totalorder %v1654_v55, 4 }
 0x470   : > { %v1669_v8 = vor.u32 %v1668_v59, %v1667_v7  ;;  %v1672_v38 = vor.u32 %v1671_v41, %v1670_v9  ;;  %v1554_v51 = vshll.u32 %v10318_v39, %v1551_v4  ;;  %v1555_v24 = vshrl.u32 %v10314_v43, %v1552_v32 }
 0x471   : > { %v1677_v17 = vsel %vm1673_vm8, %v1657_v29, %v1660_v31  ;;  %v1678_v20 = vsel %vm1676_vm11, %v1666_v30, 2102212464  ;;  %v1681_v25 = vsel %vm1673_vm8, %v1660_v31, %v1663_v19  ;;  %v1685_v34 = vsel %vm1673_vm8, %v1663_v19, %v1666_v30 }
 0x472   : > { %v1679_v26 = vsel %vm1675_vm10, %v1663_v19, %v1678_v20  ;;  %v1682_v44 = vsel %vm1676_vm11, %v1669_v8, 920167782  ;;  %v1686_v50 = vsel %vm1676_vm11, %v1672_v38, 1326507024  ;;  %v1557_v36 = vshll.u32 %v10314_v43, %v1551_v4 }
 0x473   : > { %v1683_v52 = vsel %vm1675_vm10, %v1666_v30, %v1682_v44  ;;  %v1687_v60 = vsel %vm1675_vm10, %v1669_v8, %v1686_v50  ;;  %v1680_v16 = vsel %vm1674_vm9, %v1677_v17, %v1679_v26  ;;  %v1558_v10 = vshrl.u32 %v10312_v45, %v1552_v32 }
 0x474   : > { %v1684_v54 = vsel %vm1674_vm9, %v1681_v25, %v1683_v52  ;;  %v1688_v62 = vsel %vm1674_vm9, %v1685_v34, %v1687_v60  ;;  %v1556_v7 = vor.u32 %v1555_v24, %v1554_v51  ;;  %v1560_v13 = vshll.u32 %v10312_v45, %v1551_v4 }
 0x475   : > { %v8122_v22 = vmul.u32.u64.low %v8084_v21, %v1688_v62  ;;  %v8123_v3 = vmul.u32.u64.high %v8084_v21, %v1688_v62, %v8122_v22  ;;  %v8126_v5 = vmul.u32.u64.low %v8084_v21, %v1684_v54  ;;  %v8127_v27 = vmul.u32.u64.high %v8084_v21, %v1684_v54, %v8126_v5 }
 0x476   : > { %v1559_v9 = vor.u32 %v1558_v10, %v1557_v36  ;;  %v1561_v28 = vshrl.u32 %v10316_v47, %v1552_v32  ;;  %v1553_v2 = vshrl.u32 %v10318_v39, %v1552_v32  ;;  %v1563_v55 = vshll.u32 %v10316_v47, %v1551_v4 }
 0x477   : > { %v1564_v14 = vshrl.u32 %v10308_v49, %v1552_v32  ;;  %v1567_v29 = vshrl.u32 %v10306_v57, %v1552_v32  ;;  %v1696_v59 = vmul.u32 %v8084_v21, %v1680_v16  ;;  %v1566_v31 = vshll.u32 %v10308_v49, %v1551_v4 }
 0x478   : > { %v1562_v41 = vor.u32 %v1561_v28, %v1560_v13  ;;  %vm1569_vm12 = vcmp.lt.s32.totalorder %v8086_v63, 1  ;;  %vm1698_vm13 = vc.u32 %v8123_v3, %v8126_v5  ;;  %v1699_v19 = vadd.s32 1, %v8127_v27 }
 0x479   : > { %v1565_v30 = vor.u32 %v1564_v14, %v1563_v55  ;;  %vm1570_vm14 = vcmp.lt.s32.totalorder %v8086_v63, 2  ;;  %v1568_v8 = vor.u32 %v1567_v29, %v1566_v31  ;;  %vm1571_vm15 = vcmp.lt.s32.totalorder %v8086_v63, 3 }
 0x47a   : > { %vm1572_vm0 = vcmp.lt.s32.totalorder %v8086_v63, 4  ;;  %v1577_v32 = vsel %vm1569_vm12, %v1556_v7, %v1559_v9  ;;  %v1700_v21 = vsel %vm1698_vm13, %v1699_v19, %v8127_v27  ;;  %v1581_v4 = vsel %vm1569_vm12, %v1559_v9, %v1562_v41 }
 0x47b   : > { %v1574_v38 = vsel %vm1572_vm0, %v1562_v41, 2102212464  ;;  %v1578_v17 = vsel %vm1572_vm0, %v1565_v30, 920167782  ;;  %v1701_v20 = vadd.s32 %v1700_v21, %v1696_v59  ;;  %v1573_v25 = vsel %vm1569_vm12, %v1553_v2, %v1556_v7 }
 0x47c   : > { %v1579_v34 = vsel %vm1571_vm15, %v1562_v41, %v1578_v17  ;;  %v1582_v26 = vsel %vm1572_vm0, %v1568_v8, 1326507024  ;;  %v1575_v44 = vsel %vm1571_vm15, %v1559_v9, %v1574_v38  ;;  %vm1860_vm6 = vcmp.gt.s32.totalorder %v8095_v0, 0 }
 0x47d   : > { %v1580_v50 = vsel %vm1570_vm14, %v1577_v32, %v1579_v34  ;;  %v1583_v51 = vsel %vm1571_vm15, %v1565_v30, %v1582_v26  ;;  %v1702_v52 = vadd.s32 536870912, %v1701_v20  ;;  %v1861_v62 = vsel %vm1860_vm6, %v8095_v0, 0 }
 0x47e   : > { %v1584_v60 = vsel %vm1570_vm14, %v1581_v4, %v1583_v51  ;;  %v8150_v24 = vmul.u32.u64.low %v8088_v23, %v1580_v50  ;;  %v8151_v36 = vmul.u32.u64.high %v8088_v23, %v1580_v50, %v8150_v24  ;;  %v1576_v22 = vsel %vm1570_vm14, %v1573_v25, %v1575_v44 }
 0x47f   : > { %v8155_v16 = vmul.u32.u64.low %v8088_v23, %v1584_v60  ;;  %v8156_v54 = vmul.u32.u64.high %v8088_v23, %v1584_v60, %v8155_v16  ;;  %v1703_v10 = vshrl.u32 %v1702_v52, 30  ;;  %v1857_v27 = vor.u32 8388608, %v8092_v1 }
 0x480   : > { %v1863_v7 = vand.u32 31, %v1861_v62  ;;  %v1748_v9 = vand.u32 2139095040, %v8082_v33  ;;  %v1595_v28 = vadd.s32 1, %v8151_v36  ;;  %v1592_v55 = vmul.u32 %v8088_v23, %v1576_v22 }
 0x481   : > { %v1704_v13 = vshll.u32 %v1703_v10, 30  ;;  %vm1594_vm7 = vc.u32 %v8156_v54, %v8150_v24  ;;  %v8170_v63 = vshll.u32 %v1857_v27, 8  ;;  %v1745_v1 = vand.u32 2147483647, %v8082_v33 }
 0x482   : > { %v1864_v2 = vsub.s32 32, %v1863_v7  ;;  %v1596_v0 = vsel %vm1594_vm7, %v1595_v28, %v8151_v36  ;;  %v1749_v31 = vshrl.u32 %v1748_v9, 23  ;;  %vm1643_vm8 = vcmp.lt.s32.totalorder %v8059_v42, 0 }
 0x483   : > { %v8167_v14 = vsub.s32 %v1701_v20, %v1704_v13  ;;  %v1597_v29 = vadd.s32 %v1596_v0, %v1592_v55  ;;  %v1697_v23 = vadd.s32 %v8126_v5, %v8123_v3  ;;  %v1872_v30 = vshll.u32 %v10312_v45, %v1863_v7 }
 0x484   : > { %v1867_v59 = vshrl.u32 %v10314_v43, %v1864_v2  ;;  %v1870_v41 = vshrl.u32 %v10312_v45, %v1864_v2  ;;  %v1873_v8 = vshrl.u32 %v10316_v47, %v1864_v2  ;;  %v1862_v21 = vshrl.u32 %v1861_v62, 5 }
 0x485   : > { %v1707_v19 = vsub.s32 0, %v8167_v14  ;;  %v1598_v32 = vadd.s32 536870912, %v1597_v29  ;;  %v1866_v38 = vshll.u32 %v10318_v39, %v1863_v7  ;;  %v1869_v17 = vshll.u32 %v10314_v43, %v1863_v7 }
 0x486   : > { %v1874_v20 = vor.u32 %v1873_v8, %v1872_v30  ;;  %v1875_v25 = vshll.u32 %v10316_v47, %v1863_v7  ;;  %v1876_v34 = vshrl.u32 %v10308_v49, %v1864_v2  ;;  %v1879_v44 = vshrl.u32 %v10306_v57, %v1864_v2 }
 0x487   : > { %v5918_v4 = vmin.u32 %v1707_v19, %v8167_v14  ;;  %v1599_v3 = vshrl.u32 %v1598_v32, 30  ;;  %v1868_v5 = vor.u32 %v1867_v59, %v1866_v38  ;;  %v1871_v26 = vor.u32 %v1870_v41, %v1869_v17 }
 0x488   : > { %v1727_v51 = vsub.s32 4, %v1703_v10  ;;  %v1877_v52 = vor.u32 %v1876_v34, %v1875_v25  ;;  %v5921_v60 = vadd.s32 4294967169, %v1749_v31  ;;  %v1865_v16 = vshrl.u32 %v10318_v39, %v1864_v2 }
 0x489   : > { %v1709_v50 = vclz %v5918_v4  ;;  %v1600_v36 = vshll.u32 %v1599_v3, 30  ;;  %v1878_v62 = vshll.u32 %v10308_v49, %v1863_v7  ;;  %vm1884_vm9 = vcmp.lt.s32.totalorder %v1862_v21, 4 }
 0x48a   : > { %vm1881_vm10 = vcmp.lt.s32.totalorder %v1862_v21, 1  ;;  %vm1883_vm11 = vcmp.lt.s32.totalorder %v1862_v21, 3  ;;  %v1886_v27 = vsel %vm1884_vm9, %v1874_v20, 2102212464  ;;  %vm8191_vm12 = vcmp.le.f32.partialorder %v1641_v61, 0.7853982 }
 0x48b   : > { %v5919_v22 = vadd.s32 4294967294, %v1709_v50  ;;  %vm1539_vm13 = vcmp.lt.s32.totalorder %v8065_v12, 0  ;;  %v8196_v13 = vsub.s32 %v1597_v29, %v1600_v36  ;;  %v1880_v28 = vor.u32 %v1879_v44, %v1878_v62 }
 0x48c   : > { %v1889_v2 = vsel %vm1881_vm10, %v1868_v5, %v1871_v26  ;;  %v1890_v7 = vsel %vm1884_vm9, %v1877_v52, 920167782  ;;  %v1885_v55 = vsel %vm1881_vm10, %v1865_v16, %v1868_v5  ;;  %v1887_v0 = vsel %vm1883_vm11, %v1871_v26, %v1886_v27 }
 0x48d   : > { %vm5920_vm14 = vcmp.lt.s32.totalorder %v5919_v22, 0  ;;  %v1891_v59 = vsel %vm1883_vm11, %v1874_v20, %v1890_v7  ;;  %v1728_v41 = vsel %vm1643_vm8, %v1727_v51, %v1703_v10  ;;  %v1603_v31 = vsub.s32 0, %v8196_v13 }
 0x48e   : > { %v1712_v61 = vsel %vm5920_vm14, 0, %v5919_v22  ;;  %vm1882_vm15 = vcmp.lt.s32.totalorder %v1862_v21, 2  ;;  %v1893_v8 = vsel %vm1881_vm10, %v1871_v26, %v1874_v20  ;;  %v1623_v38 = vsub.s32 4, %v1599_v3 }
 0x48f   : > { %v1713_v29 = vsub.s32 32, %v1712_v61  ;;  %v1717_v19 = vsub.s32 4294967266, %v1712_v61  ;;  %v1892_v30 = vsel %vm1882_vm15, %v1889_v2, %v1891_v59  ;;  %v5914_v32 = vmin.u32 %v1603_v31, %v8196_v13 }
 0x490   : > { %v1888_v17 = vsel %vm1882_vm15, %v1885_v55, %v1887_v0  ;;  %v1894_v4 = vsel %vm1884_vm9, %v1880_v28, 1326507024  ;;  %v1714_v25 = vshll.u32 %v8167_v14, %v1712_v61  ;;  %vm8222_vm0 = vcmp.le.f32.partialorder %v1537_v18, 0.7853982 }
 0x491   : > { %v1715_v34 = vshrl.u32 %v1697_v23, %v1713_v29  ;;  %v1718_v5 = vadd.s32 127, %v1717_v19  ;;  %v1895_v10 = vsel %vm1883_vm11, %v1877_v52, %v1894_v4  ;;  %v1605_v44 = vclz %v5914_v32 }
 0x492   : > { %v1896_v50 = vsel %vm1882_vm15, %v1893_v8, %v1895_v10  ;;  %v8212_v51 = vmul.u32.u64.low %v8170_v63, %v1892_v30  ;;  %v8213_v36 = vmul.u32.u64.high %v8170_v63, %v1892_v30, %v8212_v51  ;;  %v1752_v21 = vand.u32 8388607, %v1745_v1 }
 0x493   : > { %v1716_v20 = vor.u32 %v1715_v34, %v1714_v25  ;;  %v1719_v26 = vshll.u32 %v1718_v5, 23  ;;  %v8217_v16 = vmul.u32.u64.low %v8170_v63, %v1896_v50  ;;  %v8218_v62 = vmul.u32.u64.high %v8170_v63, %v1896_v50, %v8217_v16 }
 0x494   : > { %v5915_v23 = vadd.s32 4294967294, %v1605_v44  ;;  %v1755_v52 = vadd.s32 1, %v5921_v60  ;;  %v1730_v27 = vsel %vm8191_vm12, 0, %v1728_v41  ;;  %v1593_v28 = vadd.s32 %v8150_v24, %v8156_v54 }
 0x495   : > { %v1720_v22 = vor.u32 4788187, %v1719_v26  ;;  %v1624_v2 = vsel %vm1539_vm13, %v1623_v38, %v1599_v3  ;;  %v1904_v18 = vmul.u32 %v8170_v63, %v1888_v17  ;;  %v1907_v7 = vadd.s32 1, %v8213_v36 }
 0x496   : > { %vm5916_vm6 = vcmp.lt.s32.totalorder %v5915_v23, 0  ;;  %vm1756_vm7 = vcmp.gt.s32.totalorder %v1755_v52, 0  ;;  %v1723_v0 = vcvt.s32.f32 %v1716_v20  ;;  %vm1906_vm9 = vc.u32 %v8218_v62, %v8212_v51 }
 0x497   : > { %v1721_v55 = vand.u32 2147483647, %v1720_v22  ;;  %v1608_v59 = vsel %vm5916_vm6, 0, %v5915_v23  ;;  %v1734_v60 = vadd.s32 3, %v1730_v27  ;;  %v1908_v24 = vsel %vm1906_vm9, %v1907_v7, %v8213_v36 }
 0x498   : > { %v1609_v61 = vsub.s32 32, %v1608_v59  ;;  %v1613_v41 = vsub.s32 4294967266, %v1608_v59  ;;  %v1626_v3 = vsel %vm8222_vm0, 0, %v1624_v2  ;;  %v1909_v31 = vadd.s32 %v1908_v24, %v1904_v18 }
 0x499   : > { %v1724_v54 = vmul.f32 %v1723_v0, %v1721_v55  ;;  %v1757_v63 = vsel %vm1756_vm7, %v1755_v52, 0  ;;  %v1610_v29 = vshll.u32 %v8196_v13, %v1608_v59  ;;  %v8244_v5 = vand.u32 3, %v1734_v60 }
 0x49a   : > { %v1611_v19 = vshrl.u32 %v1593_v28, %v1609_v61  ;;  %v1614_v30 = vadd.s32 127, %v1613_v41  ;;  %v1759_v8 = vand.u32 31, %v1757_v63  ;;  %v1910_v38 = vadd.s32 536870912, %v1909_v31 }
 0x49b   : > { %v1725_v32 = vxor.u32 2147483648, %v1724_v54  ;;  %v8246_v10 = vadd.s32 3, %v1626_v3  ;;  %v1753_v36 = vor.u32 8388608, %v1752_v21  ;;  %v1758_v9 = vshrl.u32 %v1757_v63, 5 }
 0x49c   : > { %v1612_v17 = vor.u32 %v1611_v19, %v1610_v29  ;;  %v1615_v4 = vshll.u32 %v1614_v30, 23  ;;  %v1760_v25 = vsub.s32 32, %v1759_v8  ;;  %v8248_v44 = vshrl.u32 %v1910_v38, 30 }
 0x49d   : > { %v1726_v34 = vsel %vm1643_vm8, %v1725_v32, %v1724_v54  ;;  %v1762_v20 = vshll.u32 %v10318_v39, %v1759_v8  ;;  %v1765_v2 = vshll.u32 %v10314_v43, %v1759_v8  ;;  %v1768_v21 = vshll.u32 %v10312_v45, %v1759_v8 }
 0x49e   : > { %v1729_v13 = vsel %vm8191_vm12, %v8059_v42, %v1726_v34  ;;  %v1616_v50 = vor.u32 4788187, %v1615_v4  ;;  %v1619_v26 = vcvt.s32.f32 %v1612_v17  ;;  %v1912_v16 = vshll.u32 %v8248_v44, 30 }
 0x49f   : > { %7126 = vcosq.f32 %v1729_v13  ;;  %v1763_v23 = vshrl.u32 %v10314_v43, %v1760_v25  ;;  %v1766_v22 = vshrl.u32 %v10312_v45, %v1760_v25  ;;  %v1769_v27 = vshrl.u32 %v10316_v47, %v1760_v25 }
 0x4a0   : > { %7128 = vsinq.f32 %v1729_v13  ;;  %v1617_v52 = vand.u32 2147483647, %v1616_v50  ;;  %v8258_v28 = vsub.s32 %v1909_v31, %v1912_v16  ;;  %v1771_v55 = vshll.u32 %v10316_v47, %v1759_v8 }
 0x4a1   : > { %v1764_v7 = vor.u32 %v1763_v23, %v1762_v20  ;;  %v8263_v0 = vshll.u32 %v1753_v36, 8  ;;  %v1767_v60 = vor.u32 %v1766_v22, %v1765_v2  ;;  %v1770_v61 = vor.u32 %v1769_v27, %v1768_v21 }
 0x4a2   : > { %v1620_v18 = vmul.f32 %v1619_v26, %v1617_v52  ;;  %v1915_v59 = vsub.s32 0, %v8258_v28  ;;  %v1772_v41 = vshrl.u32 %v10308_v49, %v1760_v25  ;;  %v1774_v54 = vshll.u32 %v10308_v49, %v1759_v8 }
 0x4a3   : > { %v1775_v3 = vshrl.u32 %v10306_v57, %v1760_v25  ;;  %vm1740_vm8 = vcmp.eq.s32.totalorder %v8244_v5, 2  ;;  %v1761_v63 = vshrl.u32 %v10318_v39, %v1760_v25  ;;  %vm1777_vm10 = vcmp.lt.s32.totalorder %v1758_v9, 1 }
 0x4a4   : > { %v1621_v24 = vxor.u32 2147483648, %v1620_v18  ;;  %v5926_v31 = vmin.u32 %v1915_v59, %v8258_v28  ;;  %v1773_v29 = vor.u32 %v1772_v41, %v1771_v55  ;;  %vm1778_vm11 = vcmp.lt.s32.totalorder %v1758_v9, 2 }
 0x4a5   : > { %v1776_v30 = vor.u32 %v1775_v3, %v1774_v54  ;;  %vm1780_vm12 = vcmp.lt.s32.totalorder %v1758_v9, 4  ;;  %v1785_v17 = vsel %vm1777_vm10, %v1764_v7, %v1767_v60  ;;  %vm1779_vm14 = vcmp.lt.s32.totalorder %v1758_v9, 3 }
 0x4a6   : > { %v1622_v19 = vsel %vm1539_vm13, %v1621_v24, %v1620_v18  ;;  %v1917_v32 = vclz %v5926_v31  ;;  %v1782_v38 = vsel %vm1780_vm12, %v1770_v61, 2102212464  ;;  %v1781_v4 = vsel %vm1777_vm10, %v1761_v63, %v1764_v7 }
 0x4a7   : > { %v1625_v8 = vsel %vm8222_vm0, %v8065_v12, %v1622_v19  ;;  %v1786_v25 = vsel %vm1780_vm12, %v1773_v29, 920167782  ;;  %v1789_v36 = vsel %vm1777_vm10, %v1767_v60, %v1770_v61  ;;  %v1783_v14 = vsel %vm1779_vm14, %v1767_v60, %v1782_v38 }
 0x4a8   : > { %7130 = vcosq.f32 %v1625_v8  ;;  %v5927_v13 = vadd.s32 4294967294, %v1917_v32  ;;  %v1787_v50 = vsel %vm1779_vm14, %v1770_v61, %v1786_v25  ;;  %v1790_v16 = vsel %vm1780_vm12, %v1776_v30, 1326507024 }
 0x4a9   : > { %v7127_v34 = vpop.eup %7126  ;;  %7132 = vsinq.f32 %v1625_v8  ;;  %v1788_v26 = vsel %vm1778_vm11, %v1785_v17, %v1787_v50  ;;  %v1791_v52 = vsel %vm1779_vm14, %v1773_v29, %v1790_v16  ;;  %vm1733_vm15 = vweird.f32 %v8059_v42 }
 0x4aa   : > { %v7129_v20 = vpop.eup %7128  ;;  %v1741_v23 = vxor.u32 2147483648, %v7127_v34  ;;  %vm5928_vm13 = vcmp.lt.s32.totalorder %v5927_v13, 0  ;;  %v8285_v22 = vmul.u32.u64.low %v8263_v0, %v1788_v26  ;;  %v8286_v27 = vmul.u32.u64.high %v8263_v0, %v1788_v26, %v8285_v22 }
 0x4ab   : > { %v1920_v2 = vsel %vm5928_vm13, 0, %v5927_v13  ;;  %v1792_v21 = vsel %vm1778_vm11, %v1789_v36, %v1791_v52  ;;  %v1738_v18 = vxor.u32 2147483648, %v7129_v20  ;;  %vm1737_vm0 = vcmp.eq.s32.totalorder %v8244_v5, 0 }
 0x4ac   : > { %v1742_v7 = vsel %vm1740_vm8, %v1741_v23, %v7129_v20  ;;  %v1925_v55 = vsub.s32 4294967266, %v1920_v2  ;;  %v8295_v59 = vmul.u32.u64.low %v8263_v0, %v1792_v21  ;;  %v8296_v60 = vmul.u32.u64.high %v8263_v0, %v1792_v21, %v8295_v59 }
 0x4ad   : > { %vm1736_vm6 = vcmp.lt.s32.totalorder %v8244_v5, 2  ;;  %v1739_v61 = vsel %vm1737_vm0, %v7127_v34, %v1738_v18  ;;  %v1631_v41 = vand.u32 3, %v8246_v10  ;;  %v1784_v24 = vsel %vm1778_vm11, %v1781_v4, %v1783_v14 }
 0x4ae   : > { %v1803_v54 = vadd.s32 1, %v8286_v27  ;;  %v1743_v3 = vsel %vm1736_vm6, %v1739_v61, %v1742_v7  ;;  %v1926_v31 = vadd.s32 127, %v1925_v55  ;;  %v7376_v29 = vmov 4  }
 0x4af   : > { %v1744_v63 = vsel %vm1733_vm15, nan, %v1743_v3  ;;  %7040 = vset.pattern.permute.xlu1 %v7376_v29  ;;  %7041 = vset.pattern.permute.xlu0 %v7376_v29  ;;  %v1921_v19 = vsub.s32 32, %v1920_v2  ;;  %v1800_v30 = vmul.u32 %v8263_v0, %v1784_v24  ;;  %vm1802_vm7 = vc.u32 %v8296_v60, %v8285_v22 }
 0x4b0   : > { %2092 = vperm.xlu1 %7040, %v7988_v58   ;;  %2096 = vperm.xlu0 %7041, %v7996_v35   ;;  %v1804_v10 = vsel %vm1802_vm7, %v1803_v54, %v8286_v27  ;;  %vm1636_vm9 = vcmp.eq.s32.totalorder %v1631_v41, 2  ;;  %v1905_v8 = vadd.s32 %v8212_v51, %v8218_v62  ;;  %v1927_v32 = vshll.u32 %v1926_v31, 23 }
 0x4b1   : > { %v1805_v38 = vadd.s32 %v1804_v10, %v1800_v30  ;;  %vm1633_vm8 = vcmp.eq.s32.totalorder %v1631_v41, 0  ;;  %vm1632_vm10 = vcmp.lt.s32.totalorder %v1631_v41, 2  ;;  %vm1629_vm11 = vweird.f32 %v8065_v12 }
 0x4b2   : > { %v7131_v42 = vpop.eup %7130  ;;  %v1923_v4 = vshrl.u32 %v1905_v8, %v1921_v19  ;;  %v1922_v35 = vshll.u32 %v8258_v28, %v1920_v2  ;;  %v1928_v13 = vor.u32 4788187, %v1927_v32  ;;  %vm1851_vm14 = vcmp.lt.s32.totalorder %v8076_v40, 0 }
 0x4b3   : > { %v7133_v5 = vpop.eup %7132  ;;  %v1637_v9 = vxor.u32 2147483648, %v7131_v42  ;;  %v1806_v25 = vadd.s32 536870912, %v1805_v38  ;;  %vm8321_vm13 = vcmp.le.f32.partialorder %v1849_v37, 0.7853982  ;;  %v1935_v31 = vsub.s32 4, %v8248_v44 }
 0x4b4   : > { %v1634_v17 = vxor.u32 2147483648, %v7133_v5  ;;  %2100 = vperm.xlu1 %7040, %v8016_v48   ;;  %v1924_v62 = vor.u32 %v1923_v4, %v1922_v35  ;;  %v1929_v14 = vand.u32 2147483647, %v1928_v13  ;;  %vm1747_vm15 = vcmp.lt.s32.totalorder %v8082_v33, 0 }
 0x4b5   : > { %v1638_v0 = vsel %vm1636_vm9, %v1637_v9, %v7133_v5  ;;  %v1807_v50 = vshrl.u32 %v1806_v25, 30  ;;  %v1936_v37 = vsel %vm1851_vm14, %v1935_v31, %v8248_v44  ;;  %vm1746_vm0 = vcmp.le.f32.partialorder %v1745_v1, 0.7853982 }
 0x4b6   : > { %v1635_v34 = vsel %vm1633_vm8, %v7131_v42, %v1634_v17  ;;  %v1931_v16 = vcvt.s32.f32 %v1924_v62  ;;  %v1938_v19 = vsel %vm8321_vm13, 0, %v1936_v37 }
 0x4b7   : > { %v1639_v58 = vsel %vm1632_vm10, %v1635_v34, %v1638_v0  ;;  %v1808_v20 = vshll.u32 %v1807_v50, 30  ;;  %v1831_v42 = vsub.s32 4, %v1807_v50  ;;  %v1942_v9 = vadd.s32 3, %v1938_v19 }
 0x4b8   : > { %v1640_v36 = vsel %vm1629_vm11, nan, %v1639_v58  ;;  %2104 = vperm.xlu1 %7040, %v8007_v56   ;;  %v1932_v48 = vmul.f32 %v1931_v16, %v1929_v14  ;;  %v1801_v56 = vadd.s32 %v8285_v22, %v8296_v60  ;;  %vm1941_vm11 = vweird.f32 %v8076_v40 }
 0x4b9   : > { %v6659_v51 = vpack.c.bf16 %v1744_v63, %v1640_v36  ;;  %v1809_v26 = vsub.s32 %v1805_v38, %v1808_v20  ;;  %v1832_v10 = vsel %vm1747_vm15, %v1831_v42, %v1807_v50  ;;  %v1943_v17 = vand.u32 3, %v1942_v9 }
 0x4ba   : > { %v1933_v27 = vxor.u32 2147483648, %v1932_v48  ;;  %v1834_v44 = vsel %vm1746_vm0, 0, %v1832_v10  ;;  %v7378_v9 = vmov 6  }
 0x4bb   : > { %6660 = vmatprep.subr.bf16.mxu1 %v6659_v51  ;;  %v1811_v23 = vsub.s32 0, %v1809_v26  ;;  %v1838_v0 = vadd.s32 3, %v1834_v44  ;;  %vm1945_vm6 = vcmp.eq.s32.totalorder %v1943_v17, 0  ;;  %vm1948_vm7 = vcmp.eq.s32.totalorder %v1943_v17, 2  ;;  %7042 = vset.pattern.permute.xlu0 %v7378_v9  ;;  %v5955_v44 = vld [vmem:[%s10332_s1 + $0xb0] sm:$0xff] }
 0x4bc   : > { %6662 = vmatpush3.bf16.msra.mxu1 %v6659_v51  ;;  %v1934_v2 = vsel %vm1851_vm14, %v1933_v27, %v1932_v48  ;;  %vm1944_vm9 = vcmp.lt.s32.totalorder %v1943_v17, 2  ;;  %vm1837_vm14 = vweird.f32 %v8082_v33  ;;  %v5930_v48 = vld [vmem:[%s10293_s2 + $0x48] sm:$0xff]  ;;  %7043 = vset.pattern.permute.xlu1 %v7378_v9  ;;  %v8409_v17 = vld [vmem:[%s10294_s3 + $0x10] sm:$0xff] }
 0x4bd   : > { %v5922_v52 = vmin.u32 %v1811_v23, %v1809_v26  ;;  %v1937_v24 = vsel %vm8321_vm13, %v8076_v40, %v1934_v2  ;;  %v1839_v34 = vand.u32 3, %v1838_v0  ;;  %v5932_v40 = vld [vmem:[%s10293_s2 + $0x58] sm:$0xff]  ;;  %v5953_v2 = vld [vmem:[%s10332_s1 + $0xa0] sm:$0xff]  ;;  %vm392_vm13 = vcmask 31744  }
 0x4be   : > { %7134 = vcosq.f32 %v1937_v24  ;;  %6435 = vmatprep.mubr.msk.f32.mxu0 %vm406_vm1, %v5953_v2  ;;  %v8414_v0 = vld [vmem:[%s10294_s3 + $0x18] sm:$0xff]  ;;  %v5933_v2 = vld [vmem:[%s10293_s2 + $0x60] sm:$0xff] }
 0x4bf   : > { %v1813_v12 = vclz %v5922_v52  ;;  %7136 = vsinq.f32 %v1937_v24  ;;  %vm1844_vm8 = vcmp.eq.s32.totalorder %v1839_v34, 2  ;;  %vm1841_vm10 = vcmp.eq.s32.totalorder %v1839_v34, 0  ;;  %v5931_v52 = vld [vmem:[%s10293_s2 + $0x50] sm:$0xff] }
 0x4c1   : > { %v5923_v21 = vadd.s32 4294967294, %v1813_v12 }
 0x4c3   : > { %vm5924_vm12 = vcmp.lt.s32.totalorder %v5923_v21, 0 }
 0x4c4   : > { %v1816_v28 = vsel %vm5924_vm12, 0, %v5923_v21  ;;  %vm1840_vm12 = vcmp.lt.s32.totalorder %v1839_v34, 2  ;;  %v2147_v34 = vld [vmem:[#allocation2 + $0x48] sm:$0xff] }
 0x4c5   : > { %v1817_v18 = vsub.s32 32, %v1816_v28  ;;  %v1821_v7 = vsub.s32 4294967266, %v1816_v28  ;;  %v1818_v59 = vshll.u32 %v1809_v26, %v1816_v28 }
 0x4c7   : > { %v1819_v61 = vshrl.u32 %v1801_v56, %v1817_v18  ;;  %v1822_v41 = vadd.s32 127, %v1821_v7 }
 0x4c8   : > { %v7135_v32 = vpop.eup %7134 }
 0x4c9   : > { %v1820_v54 = vor.u32 %v1819_v61, %v1818_v59  ;;  %v1823_v3 = vshll.u32 %v1822_v41, 23  ;;  %v7137_v38 = vpop.eup %7136  ;;  %v1949_v25 = vxor.u32 2147483648, %v7135_v32 }
 0x4ca   : > { %v1946_v4 = vxor.u32 2147483648, %v7137_v38 }
 0x4cb   : > { %v1824_v22 = vor.u32 4788187, %v1823_v3  ;;  %v1827_v63 = vcvt.s32.f32 %v1820_v54  ;;  %v1950_v35 = vsel %vm1948_vm7, %v1949_v25, %v7137_v38  ;;  %v5954_v38 = vld [vmem:[%s10332_s1 + $0xa8] sm:$0xff]  ;;  %v5949_v25 = vld [vmem:[%s10332_s1 + $0x80] sm:$0xff] }
 0x4cc   : > { %v1947_v58 = vsel %vm1945_vm6, %v7135_v32, %v1946_v4  ;;  %v8396_v32 = vld [vmem:[%s10294_s3] sm:$0xff]  ;;  %v5956_v4 = vld [vmem:[%s10332_s1 + $0xb8] sm:$0xff] }
 0x4cd   : > { %v1825_v60 = vand.u32 2147483647, %v1824_v22  ;;  %v1951_v36 = vsel %vm1944_vm9, %v1947_v58, %v1950_v35  ;;  %v2146_v58 = vld [vmem:[#allocation2 + $0x40] sm:$0xff] }
 0x4ce   : > { %v1952_v14 = vsel %vm1941_vm11, nan, %v1951_v36  ;;  %v2149_v36 = vld [vmem:[#allocation2 + $0x58] sm:$0xff] }
 0x4cf   : > { %v1828_v29 = vmul.f32 %v1827_v63, %v1825_v60 }
 0x4d1   : > { %v1829_v30 = vxor.u32 2147483648, %v1828_v29 }
 0x4d3   : > { %v1830_v5 = vsel %vm1747_vm15, %v1829_v30, %v1828_v29  ;;  %vm2144_vm15 = vcmp.ge.s32.totalorder %v7617_v53, 4 }
 0x4d4   : > { %v1833_v8 = vsel %vm1746_vm0, %v8082_v33, %v1830_v5  ;;  %v8352_v33 = vpop.f32.mrb[4].mxu1 }
 0x4d5   : > { %7138 = vcosq.f32 %v1833_v8  ;;  %10346 = vst [vmem:[#allocation11_spill] sm:$0xff] %v8352_v33  ;;  %v8354_v12 = vpop.f32.mrb[5].mxu1 }
 0x4d6   : > { %7140 = vsinq.f32 %v1833_v8  ;;  %v8356_v27 = vpop.f32.mrb[6].mxu1  ;;  %v8391_v8 = vld [vmem:[%s10294_s3 + $0x8] sm:$0xff] }
 0x4d7   : > { %10347 = vst [vmem:[#allocation12_spill] sm:$0xff] %v8356_v27  ;;  %v8358_v21 = vpop.f32.mrb[7].mxu1 }
 0x4d8   : > { %10348 = vst [vmem:[#allocation13_spill] sm:$0xff] %v8358_v21 }
 0x4df   : > { %v7139_v1 = vpop.eup %7138 }
 0x4e0   : > { %v7141_v13 = vpop.eup %7140  ;;  %v1845_v50 = vxor.u32 2147483648, %v7139_v1 }
 0x4e1   : > { %v1842_v51 = vxor.u32 2147483648, %v7141_v13 }
 0x4e2   : > { %v1846_v62 = vsel %vm1844_vm8, %v1845_v50, %v7141_v13 }
 0x4e3   : > { %v1843_v20 = vsel %vm1841_vm10, %v7139_v1, %v1842_v51 }
 0x4e4   : > { %v1847_v26 = vsel %vm1840_vm12, %v1843_v20, %v1846_v62  ;;  %v2148_v62 = vld [vmem:[#allocation2 + $0x50] sm:$0xff] }
 0x4e5   : > { %v1848_v16 = vsel %vm1837_vm14, nan, %v1847_v26 }
 0x4e6   : > { %v6663_v23 = vpack.c.bf16 %v1952_v14, %v1848_v16 }
 0x4e8   : > { %6664 = vmatprep.subr.bf16.mxu1 %v6663_v23 }
 0x4e9   : > { %6666 = vmatpush3.bf16.msra.mxu1 %v6663_v23 }
 0x4ec   : > { %6416 = vmatmul.mubr.msk.f32.vlgmr.msra.gmra.mrb[8].mxu1 %vm406_vm1, %v5930_v48  ;;  %v5950_v48 = vld [vmem:[%s10332_s1 + $0x88] sm:$0xff] }
 0x4ed   : > { %6418 = vmatprep.mubr.msk.f32.mxu1 %vm406_vm1, %v5931_v52  ;;  %v5951_v52 = vld [vmem:[%s10332_s1 + $0x90] sm:$0xff] }
 0x4f0   : > { %6419 = vmatmul.mubr.msk.f32.gmra.mrb[10].mxu1 %vm406_vm1, %v5932_v40  ;;  %v5952_v40 = vld [vmem:[%s10332_s1 + $0x98] sm:$0xff] }
 0x4f1   : > { %6421 = vmatprep.mubr.msk.f32.mxu1 %vm406_vm1, %v5933_v2 }
 0x52f   : > { %v2093_v28 = vpop.permute.xlu1 %2092  ;;  %v2097_v18 = vpop.permute.xlu0 %2096 }
 0x533   : > { %v2101_v56 = vpop.permute.xlu1 %2100 }
 0x537   : > { %v2105_v24 = vpop.permute.xlu1 %2104 }
 0x5bf   : > { %v6417_v7 = vpop.f32.mrb[8].mxu1 }
 0x5c0   : > { %v2108_v55 = vadd.f32 %v6417_v7, %v2097_v18  ;;  %v2052_v59 = vpop.f32.mrb[9].mxu1  ;;  %v5935_v18 = vld [vmem:[%s10293_s2 + $0x70] sm:$0xff] }
 0x5c1   : > { %v2107_v61 = vadd.f32 %v2093_v28, %v2052_v59 }
 0x5c2   : > { %v2137_v41 = vadd.f32 %v2108_v55, %v7965_v15 }
 0x5c3   : > { %v2136_v54 = vadd.f32 %v2107_v61, %v7967_v46  ;;  %v6420_v3 = vpop.f32.mrb[10].mxu1 }
 0x5c4   : > { %v8366_v31 = vmul.f32 0.5, %v2137_v41  ;;  %v2110_v22 = vadd.f32 %v6420_v3, %v2105_v24  ;;  %v2062_v60 = vpop.f32.mrb[11].mxu1  ;;  %v5936_v24 = vld [vmem:[%s10293_s2 + $0x78] sm:$0xff] }
 0x5c5   : > { %v8368_v63 = vmul.f32 0.5, %v2136_v54  ;;  %v2109_v37 = vadd.f32 %v2101_v56, %v2062_v60  ;;  %v5934_v56 = vld [vmem:[%s10293_s2 + $0x68] sm:$0xff] }
 0x5c6   : > { %v2139_v29 = vadd.f32 %v2110_v22, %v7975_v11  ;;  %2156 = vrot.lane.b32.xlu1 %v8366_v31, %s10303_s11  ;;  %6422 = vmatmul.mubr.msk.f32.gmra.mrb[12].mxu1 %vm406_vm1, %v5934_v56 }
 0x5c7   : > { %v2138_v42 = vadd.f32 %v2109_v37, %v7977_v6  ;;  %2154 = vrot.lane.b32.xlu0 %v8368_v63, %s10303_s11  ;;  %v6667_v19 = vpack.c.bf16 %v8366_v31, %v8368_v63  ;;  %6424 = vmatprep.mubr.msk.f32.mxu1 %vm406_vm1, %v5935_v18 }
 0x5c8   : > { %v8378_v30 = vmul.f32 0.5, %v2139_v29 }
 0x5c9   : > { %v8380_v5 = vmul.f32 0.5, %v2138_v42  ;;  %6668 = vmatprep.subr.bf16.mxu0 %v6667_v19 }
 0x5ca   : > { %6670 = vmatpush3.bf16.msra.mxu0 %v6667_v19  ;;  %2160 = vrot.lane.b32.xlu1 %v8378_v30, %s10303_s11 }
 0x5cb   : > { %2158 = vrot.lane.b32.xlu0 %v8380_v5, %s10303_s11  ;;  %v6671_v10 = vpack.c.bf16 %v8378_v30, %v8380_v5  ;;  %6425 = vmatmul.mubr.msk.f32.gmra.mrb[14].mxu1 %vm406_vm1, %v5936_v24  ;;  %s10362_s11 = smov 125  }
 0x5cd   : > { %6672 = vmatprep.subr.bf16.mxu0 %v6671_v10 }
 0x5ce   : > { %6674 = vmatpush3.bf16.msra.mxu0 %v6671_v10  ;;  %2389 = vperm.xlu1 %7043, %v8391_v8  }
 0x5cf   : > { %2384 = vperm.xlu0 %7042, %v8396_v32  }
 0x5d1   : > { %6436 = vmatmul.mubr.msk.f32.vlgmr.msra.gmra.mrb[8].mxu0 %vm406_vm1, %v5954_v38 }
 0x5d2   : > { %6438 = vmatprep.mubr.msk.f32.mxu0 %vm406_vm1, %v5955_v44  ;;  %2394 = vperm.xlu1 %7043, %v8409_v17  }
 0x5d3   : > { %2399 = vperm.xlu0 %7042, %v8414_v0  }
 0x5d5   : > { %6439 = vmatmul.mubr.msk.f32.gmra.mrb[10].mxu0 %vm406_vm1, %v5956_v4 }
 0x5d6   : > { %6449 = vmatprep.mubr.msk.f32.mxu0 %vm406_vm1, %v5949_v25 }
 0x638   : > { %v2157_v35 = vpop.permute.xlu1 %2156 }
 0x639   : > { %v2167_v1 = vsel %vm392_vm13, %v2147_v34, %v2157_v35  ;;  %2171 = vst.msk [vmem:[#allocation2 + $0x48] sm:$0xff] %vm392_vm13, %v2157_v35  ;;  %v2155_v13 = vpop.permute.xlu0 %2154 }
 0x63a   : > { %v2166_v50 = vsel %vm392_vm13, %v2146_v58, %v2155_v13  ;;  %2170 = vst.msk [vmem:[#allocation2 + $0x40] sm:$0xff] %vm392_vm13, %v2155_v13 }
 0x63b   : > { %v6675_v51 = vpack.c.bf16 %v2167_v1, %v2166_v50 }
 0x63c   : > { %v2161_v20 = vpop.permute.xlu1 %2160 }
 0x63d   : > { %v2169_v14 = vsel %vm392_vm13, %v2149_v36, %v2161_v20  ;;  %2173 = vst.msk [vmem:[#allocation2 + $0x58] sm:$0xff] %vm392_vm13, %v2161_v20  ;;  %v2159_v26 = vpop.permute.xlu0 %2158  ;;  %6676 = vmatprep.subr.bf16.mxu0 %v6675_v51 }
 0x63e   : > { %v2168_v16 = vsel %vm392_vm13, %v2148_v62, %v2159_v26  ;;  %2172 = vst.msk [vmem:[#allocation2 + $0x50] sm:$0xff] %vm392_vm13, %v2159_v26  ;;  %6678 = vmatpush3.bf16.msra.mxu0 %v6675_v51 }
 0x63f   : > { %v6679_v23 = vpack.c.bf16 %v2169_v14, %v2168_v16 }
 0x641   : > { %6680 = vmatprep.subr.bf16.mxu0 %v6679_v23 }
 0x642   : > { %6682 = vmatpush3.bf16.msra.mxu0 %v6679_v23 }
 0x645   : > { %6450 = vmatmul.mubr.msk.f32.vlgmr.msra.gmra.mrb[8].mxu0 %vm406_vm1, %v5950_v48 }
 0x646   : > { %6452 = vmatprep.mubr.msk.f32.mxu0 %vm406_vm1, %v5951_v52 }
 0x649   : > { %6453 = vmatmul.mubr.msk.f32.gmra.mrb[10].mxu0 %vm406_vm1, %v5952_v40 }
 0x64d   : > { %v2390_v7 = vpop.permute.xlu1 %2389 }
 0x64e   : > { %v2385_v28 = vpop.permute.xlu0 %2384 }
 0x651   : > { %v2395_v35 = vpop.permute.xlu1 %2394 }
 0x652   : > { %v2400_v60 = vpop.permute.xlu0 %2399 }
 0x718   : > { %v6451_v55 = vpop.f32.mrb[8].mxu0 }
 0x719   : > { %v2403_v59 = vadd.f32 %v6451_v55, %v2390_v7  ;;  %v2359_v61 = vpop.f32.mrb[9].mxu0 }
 0x71a   : > { %v2402_v41 = vadd.f32 %v2385_v28, %v2359_v61 }
 0x71b   : > { %v8466_v54 = vsel %vm2144_vm15, %v2403_v59, 0.0 }
 0x71c   : > { %v2516_v3 = vand.u32 2147483647, %v8466_v54  ;;  %v2519_v22 = vand.u32 2139095040, %v8466_v54  ;;  %v8472_v37 = vsel %vm2144_vm15, %v2402_v41, 0.0  ;;  %v6454_v29 = vpop.f32.mrb[10].mxu0 }
 0x71d   : > { %v2412_v42 = vand.u32 2147483647, %v8472_v37  ;;  %v2415_v19 = vand.u32 2139095040, %v8472_v37  ;;  %v2405_v10 = vadd.f32 %v6454_v29, %v2400_v60  ;;  %v2369_v9 = vpop.f32.mrb[11].mxu0 }
 0x71e   : > { %v2520_v38 = vshrl.u32 %v2519_v22, 23  ;;  %v2523_v44 = vand.u32 8388607, %v2516_v3  ;;  %v2404_v51 = vadd.f32 %v2395_v35, %v2369_v9 }
 0x71f   : > { %v2416_v4 = vshrl.u32 %v2415_v19, 23  ;;  %v2419_v25 = vand.u32 8388607, %v2412_v42  ;;  %v8483_v34 = vsel %vm2144_vm15, %v2405_v10, 0.0 }
 0x720   : > { %v5969_v58 = vadd.s32 4294967169, %v2520_v38  ;;  %v2727_v13 = vand.u32 2139095040, %v8483_v34  ;;  %v2524_v50 = vor.u32 8388608, %v2523_v44  ;;  %v10305_v14 = vand.u32 2147483647, %v8483_v34  ;;  %v5981_v38 = vld [vmem:[%s10293_s2 + $0x80] sm:$0xff] }
 0x721   : > { %v5965_v1 = vadd.s32 4294967169, %v2416_v4  ;;  %v2420_v62 = vor.u32 8388608, %v2419_v25  ;;  %v8489_v28 = vsel %vm2144_vm15, %v2404_v51, 0.0  ;;  %6463 = vmatprep.mubr.msk.f32.mxu1 %vm406_vm1, %v5981_v38 }
 0x722   : > { %v2526_v36 = vadd.s32 1, %v5969_v58  ;;  %v2728_v26 = vshrl.u32 %v2727_v13, 23  ;;  %v8491_v2 = vshll.u32 %v2524_v50, 8  ;;  %v8499_v7 = vand.u32 8388607, %v10305_v14 }
 0x723   : > { %v2422_v20 = vadd.s32 1, %v5965_v1  ;;  %v8495_v18 = vshll.u32 %v2420_v62, 8 }
 0x724   : > { %vm2527_vm0 = vcmp.gt.s32.totalorder %v2526_v36, 0  ;;  %v5977_v23 = vadd.s32 4294967169, %v2728_v26 }
 0x725   : > { %v2528_v16 = vsel %vm2527_vm0, %v2526_v36, 0  ;;  %vm2423_vm6 = vcmp.gt.s32.totalorder %v2422_v20, 0 }
 0x726   : > { %v2529_v48 = vshrl.u32 %v2528_v16, 5  ;;  %v2530_v52 = vand.u32 31, %v2528_v16  ;;  %v2424_v40 = vsel %vm2423_vm6, %v2422_v20, 0  ;;  %v8502_v41 = vadd.s32 1, %v5977_v23 }
 0x727   : > { %v8493_v56 = vshrl.u32 %v2424_v40, 5  ;;  %v2426_v61 = vand.u32 31, %v2424_v40 }
 0x728   : > { %v2531_v55 = vsub.s32 32, %v2530_v52  ;;  %v2533_v59 = vshll.u32 %v10318_v39, %v2530_v52  ;;  %v2536_v24 = vshll.u32 %v10314_v43, %v2530_v52  ;;  %v2539_v22 = vshll.u32 %v10312_v45, %v2530_v52 }
 0x729   : > { %v2542_v60 = vshll.u32 %v10316_v47, %v2530_v52  ;;  %v2545_v29 = vshll.u32 %v10308_v49, %v2530_v52  ;;  %vm2548_vm7 = vcmp.lt.s32.totalorder %v2529_v48, 1  ;;  %vm2549_vm9 = vcmp.lt.s32.totalorder %v2529_v48, 2 }
 0x72a   : > { %v2534_v19 = vshrl.u32 %v10314_v43, %v2531_v55  ;;  %v2537_v10 = vshrl.u32 %v10312_v45, %v2531_v55  ;;  %v2540_v9 = vshrl.u32 %v10316_v47, %v2531_v55  ;;  %v2532_v44 = vshrl.u32 %v10318_v39, %v2531_v55 }
 0x72b   : > { %v2543_v4 = vshrl.u32 %v10308_v49, %v2531_v55  ;;  %v2546_v25 = vshrl.u32 %v10306_v57, %v2531_v55  ;;  %v2427_v13 = vsub.s32 32, %v2426_v61  ;;  %vm2550_vm8 = vcmp.lt.s32.totalorder %v2529_v48, 3 }
 0x72c   : > { %v2535_v58 = vor.u32 %v2534_v19, %v2533_v59  ;;  %v2538_v35 = vor.u32 %v2537_v10, %v2536_v24  ;;  %v2541_v1 = vor.u32 %v2540_v9, %v2539_v22  ;;  %vm2551_vm10 = vcmp.lt.s32.totalorder %v2529_v48, 4 }
 0x72d   : > { %v2544_v50 = vor.u32 %v2543_v4, %v2542_v60  ;;  %v2547_v36 = vor.u32 %v2546_v25, %v2545_v29  ;;  %v2429_v40 = vshll.u32 %v10318_v39, %v2426_v61  ;;  %v2430_v24 = vshrl.u32 %v10314_v43, %v2427_v13 }
 0x72e   : > { %v2552_v51 = vsel %vm2548_vm7, %v2532_v44, %v2535_v58  ;;  %v2553_v62 = vsel %vm2551_vm10, %v2541_v1, 2102212464  ;;  %v2556_v20 = vsel %vm2548_vm7, %v2535_v58, %v2538_v35  ;;  %v2560_v26 = vsel %vm2548_vm7, %v2538_v35, %v2541_v1 }
 0x72f   : > { %v2554_v16 = vsel %vm2550_vm8, %v2538_v35, %v2553_v62  ;;  %v2557_v23 = vsel %vm2551_vm10, %v2544_v50, 920167782  ;;  %v2561_v52 = vsel %vm2551_vm10, %v2547_v36, 1326507024  ;;  %v2432_v22 = vshll.u32 %v10314_v43, %v2426_v61 }
 0x730   : > { %v2558_v55 = vsel %vm2550_vm8, %v2541_v1, %v2557_v23  ;;  %v2562_v59 = vsel %vm2550_vm8, %v2544_v50, %v2561_v52  ;;  %v2555_v60 = vsel %vm2549_vm9, %v2552_v51, %v2554_v16  ;;  %v2433_v10 = vshrl.u32 %v10312_v45, %v2427_v13 }
 0x731   : > { %v2559_v29 = vsel %vm2549_vm9, %v2556_v20, %v2558_v55  ;;  %v2563_v19 = vsel %vm2549_vm9, %v2560_v26, %v2562_v59  ;;  %v2431_v25 = vor.u32 %v2430_v24, %v2429_v40  ;;  %v2435_v35 = vshll.u32 %v10312_v45, %v2426_v61 }
 0x732   : > { %v8529_v9 = vmul.u32.u64.low %v8491_v2, %v2563_v19  ;;  %v8530_v38 = vmul.u32.u64.high %v8491_v2, %v2563_v19, %v8529_v9  ;;  %v8533_v44 = vmul.u32.u64.low %v8491_v2, %v2559_v29  ;;  %v8534_v4 = vmul.u32.u64.high %v8491_v2, %v2559_v29, %v8533_v44 }
 0x733   : > { %v2434_v58 = vor.u32 %v2433_v10, %v2432_v22  ;;  %v2436_v1 = vshrl.u32 %v10316_v47, %v2427_v13  ;;  %v2428_v50 = vshrl.u32 %v10318_v39, %v2427_v13  ;;  %v2438_v48 = vshll.u32 %v10316_v47, %v2426_v61 }
 0x734   : > { %v2439_v36 = vshrl.u32 %v10308_v49, %v2427_v13  ;;  %v2442_v51 = vshrl.u32 %v10306_v57, %v2427_v13  ;;  %v2571_v62 = vmul.u32 %v8491_v2, %v2555_v60  ;;  %v2441_v26 = vshll.u32 %v10308_v49, %v2426_v61 }
 0x735   : > { %v2437_v20 = vor.u32 %v2436_v1, %v2435_v35  ;;  %vm2444_vm11 = vcmp.lt.s32.totalorder %v8493_v56, 1  ;;  %vm2573_vm12 = vc.u32 %v8530_v38, %v8533_v44  ;;  %v2574_v16 = vadd.s32 1, %v8534_v4 }
 0x736   : > { %v2440_v23 = vor.u32 %v2439_v36, %v2438_v48  ;;  %vm2445_vm14 = vcmp.lt.s32.totalorder %v8493_v56, 2  ;;  %v2443_v52 = vor.u32 %v2442_v51, %v2441_v26  ;;  %vm2446_vm0 = vcmp.lt.s32.totalorder %v8493_v56, 3 }
 0x737   : > { %vm2447_vm6 = vcmp.lt.s32.totalorder %v8493_v56, 4  ;;  %v2452_v13 = vsel %vm2444_vm11, %v2431_v25, %v2434_v58  ;;  %v2575_v2 = vsel %vm2573_vm12, %v2574_v16, %v8534_v4  ;;  %v2456_v61 = vsel %vm2444_vm11, %v2434_v58, %v2437_v20 }
 0x738   : > { %v2449_v40 = vsel %vm2447_vm6, %v2437_v20, 2102212464  ;;  %v2453_v55 = vsel %vm2447_vm6, %v2440_v23, 920167782  ;;  %v2576_v59 = vadd.s32 %v2575_v2, %v2571_v62  ;;  %v2448_v24 = vsel %vm2444_vm11, %v2428_v50, %v2431_v25 }
 0x739   : > { %v2454_v22 = vsel %vm2446_vm0, %v2437_v20, %v2453_v55  ;;  %v2457_v60 = vsel %vm2447_vm6, %v2443_v52, 1326507024  ;;  %v2450_v29 = vsel %vm2446_vm0, %v2434_v58, %v2449_v40  ;;  %vm2735_vm7 = vcmp.gt.s32.totalorder %v8502_v41, 0 }
 0x73a   : > { %v2455_v19 = vsel %vm2445_vm14, %v2452_v13, %v2454_v22  ;;  %v2458_v10 = vsel %vm2446_vm0, %v2440_v23, %v2457_v60  ;;  %v2577_v9 = vadd.s32 536870912, %v2576_v59  ;;  %v2736_v58 = vsel %vm2735_vm7, %v8502_v41, 0 }
 0x73b   : > { %v2459_v35 = vsel %vm2445_vm14, %v2456_v61, %v2458_v10  ;;  %v8557_v4 = vmul.u32.u64.low %v8495_v18, %v2455_v19  ;;  %v8558_v1 = vmul.u32.u64.high %v8495_v18, %v2455_v19, %v8557_v4  ;;  %v2451_v36 = vsel %vm2445_vm14, %v2448_v24, %v2450_v29 }
 0x73c   : > { %v8562_v25 = vmul.u32.u64.low %v8495_v18, %v2459_v35  ;;  %v8563_v50 = vmul.u32.u64.high %v8495_v18, %v2459_v35, %v8562_v25  ;;  %v2578_v48 = vshrl.u32 %v2577_v9, 30  ;;  %v2732_v51 = vor.u32 8388608, %v8499_v7 }
 0x73d   : > { %v2738_v62 = vand.u32 31, %v2736_v58  ;;  %v2623_v20 = vand.u32 2139095040, %v8489_v28  ;;  %v2470_v16 = vadd.s32 1, %v8558_v1  ;;  %v2467_v52 = vmul.u32 %v8495_v18, %v2451_v36 }
 0x73e   : > { %v2579_v26 = vshll.u32 %v2578_v48, 30  ;;  %vm2469_vm9 = vc.u32 %v8563_v50, %v8557_v4  ;;  %v8577_v56 = vshll.u32 %v2732_v51, 8  ;;  %v2620_v7 = vand.u32 2147483647, %v8489_v28 }
 0x73f   : > { %v2739_v23 = vsub.s32 32, %v2738_v62  ;;  %v2471_v41 = vsel %vm2469_vm9, %v2470_v16, %v8558_v1  ;;  %v2624_v61 = vshrl.u32 %v2623_v20, 23  ;;  %vm2518_vm8 = vcmp.lt.s32.totalorder %v8466_v54, 0 }
 0x740   : > { %v8574_v13 = vsub.s32 %v2576_v59, %v2579_v26  ;;  %v2472_v2 = vadd.s32 %v2471_v41, %v2467_v52  ;;  %v2572_v18 = vadd.s32 %v8533_v44, %v8530_v38  ;;  %v2747_v59 = vshll.u32 %v10312_v45, %v2738_v62 }
 0x741   : > { %v2742_v40 = vshrl.u32 %v10314_v43, %v2739_v23  ;;  %v2745_v55 = vshrl.u32 %v10312_v45, %v2739_v23  ;;  %v2748_v22 = vshrl.u32 %v10316_v47, %v2739_v23  ;;  %v2737_v29 = vshrl.u32 %v2736_v58, 5 }
 0x742   : > { %v2582_v24 = vsub.s32 0, %v8574_v13  ;;  %v2473_v60 = vadd.s32 536870912, %v2472_v2  ;;  %v2741_v19 = vshll.u32 %v10318_v39, %v2738_v62  ;;  %v2744_v10 = vshll.u32 %v10314_v43, %v2738_v62 }
 0x743   : > { %v2749_v35 = vor.u32 %v2748_v22, %v2747_v59  ;;  %v2750_v1 = vshll.u32 %v10316_v47, %v2738_v62  ;;  %v2751_v25 = vshrl.u32 %v10308_v49, %v2739_v23  ;;  %v2754_v51 = vshrl.u32 %v10306_v57, %v2739_v23 }
 0x744   : > { %v5970_v9 = vmin.u32 %v2582_v24, %v8574_v13  ;;  %v2474_v38 = vshrl.u32 %v2473_v60, 30  ;;  %v2743_v44 = vor.u32 %v2742_v40, %v2741_v19  ;;  %v2746_v36 = vor.u32 %v2745_v55, %v2744_v10 }
 0x745   : > { %v2602_v26 = vsub.s32 4, %v2578_v48  ;;  %v2752_v16 = vor.u32 %v2751_v25, %v2750_v1  ;;  %v5973_v58 = vadd.s32 4294967169, %v2624_v61  ;;  %v2740_v41 = vshrl.u32 %v10318_v39, %v2739_v23 }
 0x746   : > { %v2584_v20 = vclz %v5970_v9  ;;  %v2475_v52 = vshll.u32 %v2474_v38, 30  ;;  %v2753_v14 = vshll.u32 %v10308_v49, %v2738_v62  ;;  %vm2759_vm10 = vcmp.lt.s32.totalorder %v2737_v29, 4 }
 0x747   : > { %vm2756_vm11 = vcmp.lt.s32.totalorder %v2737_v29, 1  ;;  %vm2758_vm12 = vcmp.lt.s32.totalorder %v2737_v29, 3  ;;  %v2761_v59 = vsel %vm2759_vm10, %v2749_v35, 2102212464  ;;  %vm8598_vm14 = vcmp.le.f32.partialorder %v2516_v3, 0.7853982 }
 0x748   : > { %v5971_v24 = vadd.s32 4294967294, %v2584_v20  ;;  %vm2414_vm0 = vcmp.lt.s32.totalorder %v8472_v37, 0  ;;  %v8603_v55 = vsub.s32 %v2472_v2, %v2475_v52  ;;  %v2755_v61 = vor.u32 %v2754_v51, %v2753_v14 }
 0x749   : > { %v2764_v23 = vsel %vm2756_vm11, %v2743_v44, %v2746_v36  ;;  %v2765_v62 = vsel %vm2759_vm10, %v2752_v16, 920167782  ;;  %v2760_v22 = vsel %vm2756_vm11, %v2740_v41, %v2743_v44  ;;  %v2762_v60 = vsel %vm2758_vm12, %v2746_v36, %v2761_v59 }
 0x74a   : > { %vm5972_vm6 = vcmp.lt.s32.totalorder %v5971_v24, 0  ;;  %v2766_v19 = vsel %vm2758_vm12, %v2749_v35, %v2765_v62  ;;  %v2603_v10 = vsel %vm2518_vm8, %v2602_v26, %v2578_v48  ;;  %v2478_v9 = vsub.s32 0, %v8603_v55 }
 0x74b   : > { %v2587_v3 = vsel %vm5972_vm6, 0, %v5971_v24  ;;  %vm2757_vm7 = vcmp.lt.s32.totalorder %v2737_v29, 2  ;;  %v2768_v25 = vsel %vm2756_vm11, %v2746_v36, %v2749_v35  ;;  %v2498_v20 = vsub.s32 4, %v2474_v38 }
 0x74c   : > { %v2588_v2 = vsub.s32 32, %v2587_v3  ;;  %v2592_v14 = vsub.s32 4294967266, %v2587_v3  ;;  %v2767_v1 = vsel %vm2757_vm7, %v2764_v23, %v2766_v19  ;;  %v5966_v51 = vmin.u32 %v2478_v9, %v8603_v55 }
 0x74d   : > { %v2763_v44 = vsel %vm2757_vm7, %v2760_v22, %v2762_v60  ;;  %v2769_v52 = vsel %vm2759_vm10, %v2755_v61, 1326507024  ;;  %v2589_v41 = vshll.u32 %v8574_v13, %v2587_v3  ;;  %vm8629_vm9 = vcmp.le.f32.partialorder %v2412_v42, 0.7853982 }
 0x74e   : > { %v2590_v24 = vshrl.u32 %v2572_v18, %v2588_v2  ;;  %v2593_v59 = vadd.s32 127, %v2592_v14  ;;  %v2770_v48 = vsel %vm2758_vm12, %v2752_v16, %v2769_v52  ;;  %v2480_v26 = vclz %v5966_v51 }
 0x74f   : > { %v2771_v62 = vsel %vm2757_vm7, %v2768_v25, %v2770_v48  ;;  %v8619_v57 = vmul.u32.u64.low %v8577_v56, %v2767_v1  ;;  %v8620_v49 = vmul.u32.u64.high %v8577_v56, %v2767_v1, %v8619_v57  ;;  %v2627_v29 = vand.u32 8388607, %v2620_v7 }
 0x750   : > { %v2591_v35 = vor.u32 %v2590_v24, %v2589_v41  ;;  %v2594_v36 = vshll.u32 %v2593_v59, 23  ;;  %v8624_v23 = vmul.u32.u64.low %v8577_v56, %v2771_v62  ;;  %v8625_v22 = vmul.u32.u64.high %v8577_v56, %v2771_v62, %v8624_v23 }
 0x751   : > { %v5967_v18 = vadd.s32 4294967294, %v2480_v26  ;;  %v2630_v16 = vadd.s32 1, %v5973_v58  ;;  %v2605_v60 = vsel %vm8598_vm14, 0, %v2603_v10  ;;  %v2468_v19 = vadd.s32 %v8557_v4, %v8563_v50 }
 0x752   : > { %v2595_v61 = vor.u32 4788187, %v2594_v36  ;;  %v2499_v3 = vsel %vm2414_vm0, %v2498_v20, %v2474_v38  ;;  %v2779_v42 = vmul.u32 %v8577_v56, %v2763_v44  ;;  %v2782_v9 = vadd.s32 1, %v8620_v49 }
 0x753   : > { %vm5968_vm10 = vcmp.lt.s32.totalorder %v5967_v18, 0  ;;  %vm2631_vm11 = vcmp.gt.s32.totalorder %v2630_v16, 0  ;;  %v2598_v14 = vcvt.s32.f32 %v2591_v35  ;;  %vm2781_vm12 = vc.u32 %v8625_v22, %v8619_v57 }
 0x754   : > { %v2596_v2 = vand.u32 2147483647, %v2595_v61  ;;  %v2483_v1 = vsel %vm5968_vm10, 0, %v5967_v18  ;;  %v2609_v58 = vadd.s32 3, %v2605_v60  ;;  %v2783_v4 = vsel %vm2781_vm12, %v2782_v9, %v8620_v49 }
 0x755   : > { %v2484_v10 = vsub.s32 32, %v2483_v1  ;;  %v2488_v25 = vsub.s32 4294967266, %v2483_v1  ;;  %v2501_v38 = vsel %vm8629_vm9, 0, %v2499_v3  ;;  %v2784_v51 = vadd.s32 %v2783_v4, %v2779_v42 }
 0x756   : > { %v2599_v50 = vmul.f32 %v2598_v14, %v2596_v2  ;;  %v2632_v56 = vsel %vm2631_vm11, %v2630_v16, 0  ;;  %v2485_v20 = vshll.u32 %v8603_v55, %v2483_v1  ;;  %v8651_v49 = vand.u32 3, %v2609_v58 }
 0x757   : > { %v2486_v44 = vshrl.u32 %v2468_v19, %v2484_v10  ;;  %v2489_v52 = vadd.s32 127, %v2488_v25  ;;  %v2634_v41 = vand.u32 31, %v2632_v56  ;;  %v2785_v59 = vadd.s32 536870912, %v2784_v51 }
 0x758   : > { %v2600_v24 = vxor.u32 2147483648, %v2599_v50  ;;  %v8653_v36 = vadd.s32 3, %v2501_v38  ;;  %v2628_v16 = vor.u32 8388608, %v2627_v29  ;;  %v2633_v40 = vshrl.u32 %v2632_v56, 5 }
 0x759   : > { %v2487_v48 = vor.u32 %v2486_v44, %v2485_v20  ;;  %v2490_v26 = vshll.u32 %v2489_v52, 23  ;;  %v2635_v62 = vsub.s32 32, %v2634_v41  ;;  %v8655_v23 = vshrl.u32 %v2785_v59, 30 }
 0x75a   : > { %v2601_v35 = vsel %vm2518_vm8, %v2600_v24, %v2599_v50  ;;  %v2637_v61 = vshll.u32 %v10318_v39, %v2634_v41  ;;  %v2640_v1 = vshll.u32 %v10314_v43, %v2634_v41  ;;  %v2643_v29 = vshll.u32 %v10312_v45, %v2634_v41 }
 0x75b   : > { %v2604_v55 = vsel %vm8598_vm14, %v8466_v54, %v2601_v35  ;;  %v2491_v18 = vor.u32 4788187, %v2490_v26  ;;  %v2494_v60 = vcvt.s32.f32 %v2487_v48  ;;  %v2787_v19 = vshll.u32 %v8655_v23, 30 }
 0x75c   : > { %7142 = vcosq.f32 %v2604_v55  ;;  %v2638_v3 = vshrl.u32 %v10314_v43, %v2635_v62  ;;  %v2641_v9 = vshrl.u32 %v10312_v45, %v2635_v62  ;;  %v2644_v2 = vshrl.u32 %v10316_v47, %v2635_v62 }
 0x75d   : > { %7144 = vsinq.f32 %v2604_v55  ;;  %v2492_v42 = vand.u32 2147483647, %v2491_v18  ;;  %v8665_v14 = vsub.s32 %v2784_v51, %v2787_v19  ;;  %v2646_v25 = vshll.u32 %v10316_v47, %v2634_v41 }
 0x75e   : > { %v2639_v10 = vor.u32 %v2638_v3, %v2637_v61  ;;  %v8670_v4 = vshll.u32 %v2628_v16, 8  ;;  %v2642_v38 = vor.u32 %v2641_v9, %v2640_v1  ;;  %v2645_v20 = vor.u32 %v2644_v2, %v2643_v29 }
 0x75f   : > { %v2495_v58 = vmul.f32 %v2494_v60, %v2492_v42  ;;  %v2790_v50 = vsub.s32 0, %v8665_v14  ;;  %v10353_v44 = vmov 920167782   ;;  %v10354_v56 = vmov 1326507024  }
 0x760   : > { %v2647_v52 = vshrl.u32 %v10353_v44, %v2635_v62  ;;  %v2649_v51 = vshll.u32 %v10353_v44, %v2634_v41  ;;  %v2650_v59 = vshrl.u32 %v10354_v56, %v2635_v62  ;;  %vm2615_vm8 = vcmp.eq.s32.totalorder %v8651_v49, 2 }
 0x761   : > { %v2496_v24 = vxor.u32 2147483648, %v2495_v58  ;;  %v5978_v48 = vmin.u32 %v2790_v50, %v8665_v14  ;;  %v2636_v26 = vshrl.u32 %v10318_v39, %v2635_v62  ;;  %vm2652_vm14 = vcmp.lt.s32.totalorder %v2633_v40, 1 }
 0x762   : > { %v2648_v35 = vor.u32 %v2647_v52, %v2646_v25  ;;  %v2651_v18 = vor.u32 %v2650_v59, %v2649_v51  ;;  %vm2653_vm6 = vcmp.lt.s32.totalorder %v2633_v40, 2  ;;  %vm2655_vm7 = vcmp.lt.s32.totalorder %v2633_v40, 4 }
 0x763   : > { %v2497_v55 = vsel %vm2414_vm0, %v2496_v24, %v2495_v58  ;;  %v2792_v16 = vclz %v5978_v48  ;;  %v2657_v61 = vsel %vm2655_vm7, %v2645_v20, 2102212464  ;;  %v2660_v60 = vsel %vm2652_vm14, %v2639_v10, %v2642_v38 }
 0x764   : > { %v2500_v41 = vsel %vm8629_vm9, %v8472_v37, %v2497_v55  ;;  %vm2654_vm10 = vcmp.lt.s32.totalorder %v2633_v40, 3  ;;  %v2656_v62 = vsel %vm2652_vm14, %v2636_v26, %v2639_v10  ;;  %v2661_v19 = vsel %vm2655_vm7, %v2648_v35, 920167782 }
 0x765   : > { %7146 = vcosq.f32 %v2500_v41  ;;  %v5979_v42 = vadd.s32 4294967294, %v2792_v16  ;;  %v2662_v9 = vsel %vm2654_vm10, %v2645_v20, %v2661_v19  ;;  %v2664_v2 = vsel %vm2652_vm14, %v2642_v38, %v2645_v20 }
 0x766   : > { %v7143_v3 = vpop.eup %7142  ;;  %7148 = vsinq.f32 %v2500_v41  ;;  %v2658_v13 = vsel %vm2654_vm10, %v2642_v38, %v2657_v61  ;;  %v2663_v29 = vsel %vm2653_vm6, %v2660_v60, %v2662_v9  ;;  %v2665_v58 = vsel %vm2655_vm7, %v2651_v18, 1326507024 }
 0x767   : > { %v7145_v1 = vpop.eup %7144  ;;  %v2616_v25 = vxor.u32 2147483648, %v7143_v3  ;;  %vm5980_vm0 = vcmp.lt.s32.totalorder %v5979_v42, 0  ;;  %v2666_v50 = vsel %vm2654_vm10, %v2648_v35, %v2665_v58  ;;  %vm2608_vm9 = vweird.f32 %v8466_v54 }
 0x768   : > { %v8692_v52 = vmul.u32.u64.low %v8670_v4, %v2663_v29  ;;  %v8693_v10 = vmul.u32.u64.high %v8670_v4, %v2663_v29, %v8692_v52  ;;  %v2795_v24 = vsel %vm5980_vm0, 0, %v5979_v42  ;;  %v2667_v51 = vsel %vm2653_vm6, %v2664_v2, %v2666_v50 }
 0x769   : > { %v2613_v59 = vxor.u32 2147483648, %v7145_v1  ;;  %v2617_v20 = vsel %vm2615_vm8, %v2616_v25, %v7145_v1  ;;  %v2800_v38 = vsub.s32 4294967266, %v2795_v24  ;;  %vm2612_vm11 = vcmp.eq.s32.totalorder %v8651_v49, 0 }
 0x76a   : > { %v8702_v48 = vmul.u32.u64.low %v8670_v4, %v2667_v51  ;;  %v8703_v26 = vmul.u32.u64.high %v8670_v4, %v2667_v51, %v8702_v48  ;;  %vm2611_vm12 = vcmp.lt.s32.totalorder %v8651_v49, 2  ;;  %v2506_v55 = vand.u32 3, %v8653_v36 }
 0x76b   : > { %v2614_v35 = vsel %vm2612_vm11, %v7143_v3, %v2613_v59  ;;  %v2659_v18 = vsel %vm2653_vm6, %v2656_v62, %v2658_v13  ;;  %v2678_v41 = vadd.s32 1, %v8693_v10  ;;  %v2801_v61 = vadd.s32 127, %v2800_v38 }
 0x76c   : > { %v2618_v16 = vsel %vm2611_vm12, %v2614_v35, %v2617_v20  ;;  %v7379_v19 = vmov 7   ;;  %v2796_v42 = vsub.s32 32, %v2795_v24  ;;  %v2675_v9 = vmul.u32 %v8670_v4, %v2659_v18 }
 0x76d   : > { %v2619_v60 = vsel %vm2608_vm9, nan, %v2618_v16  ;;  %7044 = vset.pattern.permute.xlu1 %v7379_v19  ;;  %7045 = vset.pattern.permute.xlu0 %v7379_v19  ;;  %vm2677_vm8 = vc.u32 %v8703_v26, %v8692_v52  ;;  %vm2511_vm14 = vcmp.eq.s32.totalorder %v2506_v55, 2  ;;  %v2780_v62 = vadd.s32 %v8619_v57, %v8625_v22 }
 0x76e   : > { %2967 = vperm.xlu1 %7044, %v8396_v32   ;;  %2971 = vperm.xlu0 %7045, %v8391_v8   ;;  %v2679_v36 = vsel %vm2677_vm8, %v2678_v41, %v8693_v10  ;;  %v2802_v3 = vshll.u32 %v2801_v61, 23  ;;  %vm2508_vm6 = vcmp.eq.s32.totalorder %v2506_v55, 0  ;;  %vm2507_vm7 = vcmp.lt.s32.totalorder %v2506_v55, 2 }
 0x76f   : > { %v7147_v54 = vpop.eup %7146  ;;  %v2680_v2 = vadd.s32 %v2679_v36, %v2675_v9  ;;  %v2798_v13 = vshrl.u32 %v2780_v62, %v2796_v42  ;;  %vm2504_vm10 = vweird.f32 %v8472_v37  ;;  %v2797_v32 = vshll.u32 %v8665_v14, %v2795_v24 }
 0x770   : > { %v7149_v49 = vpop.eup %7148  ;;  %v2512_v40 = vxor.u32 2147483648, %v7147_v54  ;;  %v2803_v25 = vor.u32 4788187, %v2802_v3  ;;  %vm2726_vm9 = vcmp.lt.s32.totalorder %v8483_v34, 0  ;;  %v10355_v61 = vand.u32 2147483647, %v8483_v34 }
 0x771   : > { %v2509_v1 = vxor.u32 2147483648, %v7149_v49  ;;  %v2681_v29 = vadd.s32 536870912, %v2680_v2  ;;  %v2799_v22 = vor.u32 %v2798_v13, %v2797_v32  ;;  %vm2622_vm12 = vcmp.lt.s32.totalorder %v8489_v28, 0 }
 0x772   : > { %v2513_v4 = vsel %vm2511_vm14, %v2512_v40, %v7149_v49  ;;  %2975 = vperm.xlu1 %7044, %v8409_v17   ;;  %v2804_v59 = vand.u32 2147483647, %v2803_v25  ;;  %vm8728_vm11 = vcmp.le.f32.partialorder %v10355_v61, 0.7853982  ;;  %v2810_v40 = vsub.s32 4, %v8655_v23  ;;  %v5983_v61 = vld [vmem:[%s10293_s2 + $0x90] sm:$0xff] }
 0x773   : > { %v2510_v58 = vsel %vm2508_vm6, %v7147_v54, %v2509_v1  ;;  %v2682_v50 = vshrl.u32 %v2681_v29, 30  ;;  %v2806_v38 = vcvt.s32.f32 %v2799_v22  ;;  %vm2621_vm8 = vcmp.le.f32.partialorder %v2620_v7, 0.7853982 }
 0x774   : > { %v2514_v8 = vsel %vm2507_vm7, %v2510_v58, %v2513_v4  ;;  %v2811_v3 = vsel %vm2726_vm9, %v2810_v40, %v8655_v23  ;;  %v3023_v40 = vld [vmem:[#allocation2 + $0x78] sm:$0xff] }
 0x775   : > { %v2515_v10 = vsel %vm2504_vm10, nan, %v2514_v8  ;;  %v2683_v51 = vshll.u32 %v2682_v50, 30  ;;  %v2807_v17 = vmul.f32 %v2806_v38, %v2804_v59  ;;  %v2706_v1 = vsub.s32 4, %v2682_v50 }
 0x776   : > { %v6683_v57 = vpack.c.bf16 %v2619_v60, %v2515_v10  ;;  %2979 = vperm.xlu1 %7044, %v8414_v0   ;;  %v2676_v0 = vadd.s32 %v8692_v52, %v8703_v26  ;;  %v2813_v4 = vsel %vm8728_vm11, 0, %v2811_v3 }
 0x777   : > { %v2684_v20 = vsub.s32 %v2680_v2, %v2683_v51  ;;  %v2808_v55 = vxor.u32 2147483648, %v2807_v17  ;;  %v2707_v58 = vsel %vm2622_vm12, %v2706_v1, %v2682_v50  ;;  %v2817_v8 = vadd.s32 3, %v2813_v4 }
 0x778   : > { %6684 = vmatprep.subr.bf16.mxu1 %v6683_v57  ;;  %v2709_v23 = vsel %vm2621_vm8, 0, %v2707_v58 }
 0x779   : > { %6686 = vmatpush3.bf16.msra.mxu1 %v6683_v57  ;;  %v2686_v48 = vsub.s32 0, %v2684_v20  ;;  %v2809_v24 = vsel %vm2726_vm9, %v2808_v55, %v2807_v17  ;;  %v2818_v57 = vand.u32 3, %v2817_v8  ;;  %v2713_v22 = vadd.s32 3, %v2709_v23 }
 0x77a   : > { %v2812_v9 = vsel %vm8728_vm11, %v8483_v34, %v2809_v24  ;;  %vm2816_vm9 = vweird.f32 %v8483_v34  ;;  %v5984_v34 = vld [vmem:[%s10293_s2 + $0x98] sm:$0xff] }
 0x77b   : > { %v5974_v35 = vmin.u32 %v2686_v48, %v2684_v20  ;;  %7150 = vcosq.f32 %v2812_v9  ;;  %vm2820_vm14 = vcmp.eq.s32.totalorder %v2818_v57, 0  ;;  %vm2823_vm6 = vcmp.eq.s32.totalorder %v2818_v57, 2 }
 0x77c   : > { %7152 = vsinq.f32 %v2812_v9  ;;  %vm2819_vm7 = vcmp.lt.s32.totalorder %v2818_v57, 2  ;;  %v3021_v9 = vld [vmem:[#allocation2 + $0x68] sm:$0xff] }
 0x77d   : > { %v2688_v37 = vclz %v5974_v35 }
 0x77f   : > { %v5975_v18 = vadd.s32 4294967294, %v2688_v37 }
 0x781   : > { %vm5976_vm0 = vcmp.lt.s32.totalorder %v5975_v18, 0 }
 0x782   : > { %v2691_v14 = vsel %vm5976_vm0, 0, %v5975_v18 }
 0x783   : > { %v2692_v41 = vsub.s32 32, %v2691_v14  ;;  %v2696_v16 = vsub.s32 4294967266, %v2691_v14  ;;  %v2693_v19 = vshll.u32 %v2684_v20, %v2691_v14  ;;  %v2714_v20 = vand.u32 3, %v2713_v22 }
 0x785   : > { %v2694_v54 = vshrl.u32 %v2676_v0, %v2692_v41  ;;  %v2697_v42 = vadd.s32 127, %v2696_v16  ;;  %v7151_v25 = vpop.eup %7150  ;;  %vm2719_vm10 = vcmp.eq.s32.totalorder %v2714_v20, 2  ;;  %vm2716_vm0 = vcmp.eq.s32.totalorder %v2714_v20, 0  ;;  %v5982_v16 = vld [vmem:[%s10293_s2 + $0x88] sm:$0xff] }
 0x786   : > { %v7153_v10 = vpop.eup %7152  ;;  %v2824_v59 = vxor.u32 2147483648, %v7151_v25  ;;  %vm2715_vm11 = vcmp.lt.s32.totalorder %v2714_v20, 2 }
 0x787   : > { %v2695_v49 = vor.u32 %v2694_v54, %v2693_v19  ;;  %v2698_v36 = vshll.u32 %v2697_v42, 23  ;;  %v2821_v51 = vxor.u32 2147483648, %v7153_v10  ;;  %v3020_v42 = vld [vmem:[#allocation2 + $0x60] sm:$0xff] }
 0x788   : > { %v2825_v48 = vsel %vm2823_vm6, %v2824_v59, %v7153_v10 }
 0x789   : > { %v2699_v52 = vor.u32 4788187, %v2698_v36  ;;  %v2702_v62 = vcvt.s32.f32 %v2695_v49  ;;  %v2822_v38 = vsel %vm2820_vm14, %v7151_v25, %v2821_v51  ;;  %v7046_v49 = vpack.i.bf16 %v3021_v9, %v3020_v42  ;;  %v3022_v36 = vld [vmem:[#allocation2 + $0x70] sm:$0xff] }
 0x78a   : > { %v2826_v35 = vsel %vm2819_vm7, %v2822_v38, %v2825_v48 }
 0x78b   : > { %v2700_v26 = vand.u32 2147483647, %v2699_v52  ;;  %v2827_v14 = vsel %vm2816_vm9, nan, %v2826_v35  ;;  %7047 = vrot.lane.b32.xlu0 %v7046_v49, %s10362_s11  ;;  %v7051_v52 = vpack.i.bf16 %v3023_v40, %v3022_v36  ;;  %v8806_v35 = vld [vmem:[%s10294_s3 + $0x8] sm:$0xff] }
 0x78d   : > { %v2703_v2 = vmul.f32 %v2702_v62, %v2700_v26 }
 0x78f   : > { %v2704_v13 = vxor.u32 2147483648, %v2703_v2  ;;  %7052 = vrot.lane.b32.xlu0 %v7051_v52, %s10362_s11  ;;  %s10382_s11 = smov 2  }
 0x791   : > { %v2705_v29 = vsel %vm2622_vm12, %v2704_v13, %v2703_v2  ;;  %vm2712_vm12 = vweird.f32 %v8489_v28  ;;  %v6005_v13 = vld [vmem:[%s10332_s1 + $0xe0] sm:$0xff] }
 0x792   : > { %v2708_v32 = vsel %vm2621_vm8, %v8489_v28, %v2705_v29  ;;  %v8759_v28 = vpop.f32.mrb[12].mxu1  ;;  %6483 = vmatprep.mubr.msk.f32.mxu0 %vm406_vm1, %v6005_v13 }
 0x793   : > { %7154 = vcosq.f32 %v2708_v32  ;;  %10358 = vst [vmem:[#allocation14_spill] sm:$0xff] %v8759_v28  ;;  %v8761_v60 = vpop.f32.mrb[13].mxu1 }
 0x794   : > { %7156 = vsinq.f32 %v2708_v32  ;;  %10359 = vst [vmem:[#allocation15_spill] sm:$0xff] %v8761_v60  ;;  %v8763_v19 = vpop.f32.mrb[14].mxu1 }
 0x795   : > { %10360 = vst [vmem:[#allocation16_spill] sm:$0xff] %v8763_v19  ;;  %v8765_v54 = vpop.f32.mrb[15].mxu1 }
 0x796   : > { %10361 = vst [vmem:[#allocation17_spill] sm:$0xff] %v8765_v54 }
 0x79d   : > { %v7155_v7 = vpop.eup %7154 }
 0x79e   : > { %v7157_v50 = vpop.eup %7156  ;;  %v2720_v17 = vxor.u32 2147483648, %v7155_v7 }
 0x79f   : > { %v2717_v37 = vxor.u32 2147483648, %v7157_v50 }
 0x7a0   : > { %v2721_v55 = vsel %vm2719_vm10, %v2720_v17, %v7157_v50  ;;  %v6006_v50 = vld [vmem:[%s10332_s1 + $0xe8] sm:$0xff]  ;;  %v7380_v17 = vmov 9  }
 0x7a1   : > { %v2718_v18 = vsel %vm2716_vm0, %v7155_v7, %v2717_v37  ;;  %7067 = vset.pattern.permute.xlu1 %v7380_v17  ;;  %v6007_v37 = vld [vmem:[%s10332_s1 + $0xf0] sm:$0xff]  ;;  %7066 = vset.pattern.permute.xlu0 %v7380_v17 }
 0x7a2   : > { %v2722_v24 = vsel %vm2715_vm11, %v2718_v18, %v2721_v55  ;;  %v8817_v55 = vld [vmem:[%s10294_s3 + $0x18] sm:$0xff] }
 0x7a3   : > { %v2723_v0 = vsel %vm2712_vm12, nan, %v2722_v24  ;;  %v6008_v18 = vld [vmem:[%s10332_s1 + $0xf8] sm:$0xff]  ;;  %v6001_v24 = vld [vmem:[%s10332_s1 + $0xc0] sm:$0xff] }
 0x7a4   : > { %v6687_v41 = vpack.c.bf16 %v2827_v14, %v2723_v0  ;;  %v8826_v14 = vld [vmem:[%s10294_s3 + $0x10] sm:$0xff] }
 0x7a6   : > { %6688 = vmatprep.subr.bf16.mxu1 %v6687_v41 }
 0x7a7   : > { %6690 = vmatpush3.bf16.msra.mxu1 %v6687_v41 }
 0x7aa   : > { %6464 = vmatmul.mubr.msk.f32.vlgmr.msra.gmra.mrb[16].mxu1 %vm406_vm1, %v5982_v16 }
 0x7ab   : > { %6466 = vmatprep.mubr.msk.f32.mxu1 %vm406_vm1, %v5983_v61 }
 0x7ae   : > { %6467 = vmatmul.mubr.msk.f32.gmra.mrb[18].mxu1 %vm406_vm1, %v5984_v34 }
 0x7ed   : > { %v2968_v26 = vpop.permute.xlu1 %2967  ;;  %v2972_v3 = vpop.permute.xlu0 %2971 }
 0x7f1   : > { %v2976_v62 = vpop.permute.xlu1 %2975 }
 0x7f5   : > { %v2980_v8 = vpop.permute.xlu1 %2979 }
 0x7fd   : > { %v7048_v0 = vpop.permute.xlu0 %7047 }
 0x7fe   : > { %v7050_v41 = vunpack.i.h.bf16 %v7048_v0  ;;  %v7049_v16 = vunpack.i.l.bf16 %v7048_v0 }
 0x801   : > { %v7053_v34 = vpop.permute.xlu0 %7052 }
 0x802   : > { %v7055_v49 = vunpack.i.h.bf16 %v7053_v34  ;;  %v7054_v36 = vunpack.i.l.bf16 %v7053_v34 }
 0x87d   : > { %v6465_v2 = vpop.f32.mrb[16].mxu1 }
 0x87e   : > { %v2983_v1 = vadd.f32 %v6465_v2, %v2972_v3  ;;  %v2927_v4 = vpop.f32.mrb[17].mxu1 }
 0x87f   : > { %v2982_v29 = vadd.f32 %v2968_v26, %v2927_v4 }
 0x880   : > { %v3012_v58 = vadd.f32 %v2983_v1, %v8366_v31 }
 0x881   : > { %v3011_v32 = vadd.f32 %v2982_v29, %v8368_v63  ;;  %v6468_v25 = vpop.f32.mrb[18].mxu1  ;;  %v6002_v29 = vld [vmem:[%s10332_s1 + $0xc8] sm:$0xff] }
 0x882   : > { %v8775_v10 = vmul.f32 0.5, %v3012_v58  ;;  %v2985_v23 = vadd.f32 %v6468_v25, %v2980_v8  ;;  %v2937_v57 = vpop.f32.mrb[19].mxu1  ;;  %v6003_v58 = vld [vmem:[%s10332_s1 + $0xd0] sm:$0xff]  ;;  %v6004_v8 = vld [vmem:[%s10332_s1 + $0xd8] sm:$0xff]  ;;  %v5985_v25 = vld [vmem:[%s10293_s2 + $0xa0] sm:$0xff] }
 0x883   : > { %v8777_v22 = vmul.f32 0.5, %v3011_v32  ;;  %v2984_v51 = vadd.f32 %v2976_v62, %v2937_v57  ;;  %v5987_v57 = vld [vmem:[%s10293_s2 + $0xb0] sm:$0xff]  ;;  %6469 = vmatprep.mubr.msk.f32.mxu1 %vm406_vm1, %v5985_v25 }
 0x884   : > { %v3014_v59 = vadd.f32 %v2985_v23, %v8378_v30  ;;  %v5986_v23 = vld [vmem:[%s10293_s2 + $0xa8] sm:$0xff] }
 0x885   : > { %v3013_v20 = vadd.f32 %v2984_v51, %v8380_v5  ;;  %v7056_v38 = vpack.i.bf16 %v8775_v10, %v8777_v22  ;;  %v6691_v31 = vpack.c.bf16 %v8775_v10, %v8777_v22  ;;  %v8798_v5 = vld [vmem:[%s10294_s3] sm:$0xff]  ;;  %6470 = vmatmul.mubr.msk.f32.gmra.mrb[20].mxu1 %vm406_vm1, %v5986_v23 }
 0x886   : > { %v8785_v48 = vmul.f32 0.5, %v3014_v59  ;;  %3286 = vperm.xlu0 %7066, %v8798_v5   ;;  %6472 = vmatprep.mubr.msk.f32.mxu1 %vm406_vm1, %v5987_v57 }
 0x887   : > { %v8787_v63 = vmul.f32 0.5, %v3013_v20  ;;  %7057 = vrot.lane.b32.xlu1 %v7056_v38, %s7364_s27  ;;  %6692 = vmatprep.subr.bf16.mxu0 %v6691_v31 }
 0x888   : > { %6694 = vmatpush3.bf16.msra.mxu0 %v6691_v31 }
 0x889   : > { %v7061_v7 = vpack.i.bf16 %v8785_v48, %v8787_v63  ;;  %v6695_v30 = vpack.c.bf16 %v8785_v48, %v8787_v63 }
 0x88a   : > { %3301 = vperm.xlu0 %7066, %v8817_v55  }
 0x88b   : > { %7062 = vrot.lane.b32.xlu1 %v7061_v7, %s7364_s27  ;;  %6696 = vmatprep.subr.bf16.mxu0 %v6695_v30  ;;  %v5988_v7 = vld [vmem:[%s10293_s2 + $0xb8] sm:$0xff]  ;;  %s6158_s27 = sshll.u32 %s7348_s22, 3  ;;  %s10179_s22 = sadd.s32 %s7344_s21, %s6884_s0 }
 0x88c   : > { %6698 = vmatpush3.bf16.msra.mxu0 %v6695_v30  ;;  %6473 = vmatmul.mubr.msk.f32.gmra.mrb[22].mxu1 %vm406_vm1, %v5988_v7 }
 0x88f   : > { %6484 = vmatmul.mubr.msk.f32.vlgmr.msra.gmra.mrb[12].mxu0 %vm406_vm1, %v6006_v50  ;;  %3291 = vperm.xlu1 %7067, %v8806_v35  }
 0x890   : > { %6486 = vmatprep.mubr.msk.f32.mxu0 %vm406_vm1, %v6007_v37 }
 0x893   : > { %6487 = vmatmul.mubr.msk.f32.gmra.mrb[14].mxu0 %vm406_vm1, %v6008_v18  ;;  %3296 = vperm.xlu1 %7067, %v8826_v14  }
 0x894   : > { %6497 = vmatprep.mubr.msk.f32.mxu0 %vm406_vm1, %v6001_v24 }
 0x8f9   : > { %v7058_v61 = vpop.permute.xlu1 %7057 }
 0x8fa   : > { %v7060_v42 = vunpack.i.h.bf16 %v7058_v61  ;;  %v7059_v9 = vunpack.i.l.bf16 %v7058_v61 }
 0x8fc   : > { %v3056_v40 = vsel %vm375_vm2, %v7049_v16, %v7059_v9  ;;  %v3057_v52 = vsel %vm375_vm2, %v7050_v41, %v7060_v42 }
 0x8fd   : > { %v7063_v26 = vpop.permute.xlu1 %7062  ;;  %v6699_v62 = vpack.c.bf16 %v3057_v52, %v3056_v40 }
 0x8fe   : > { %v7065_v3 = vunpack.i.h.bf16 %v7063_v26  ;;  %v7064_v2 = vunpack.i.l.bf16 %v7063_v26 }
 0x8ff   : > { %6700 = vmatprep.subr.bf16.mxu0 %v6699_v62 }
 0x900   : > { %6702 = vmatpush3.bf16.msra.mxu0 %v6699_v62  ;;  %v3058_v1 = vsel %vm375_vm2, %v7054_v36, %v7064_v2  ;;  %v3059_v4 = vsel %vm375_vm2, %v7055_v49, %v7065_v3 }
 0x901   : > { %v6703_v13 = vpack.c.bf16 %v3059_v4, %v3058_v1 }
 0x903   : > { %6704 = vmatprep.subr.bf16.mxu0 %v6703_v13 }
 0x904   : > { %6706 = vmatpush3.bf16.msra.mxu0 %v6703_v13 }
 0x905   : > { %v3287_v32 = vpop.permute.xlu0 %3286 }
 0x907   : > { %6498 = vmatmul.mubr.msk.f32.vlgmr.msra.gmra.mrb[12].mxu0 %vm406_vm1, %v6002_v29 }
 0x908   : > { %6500 = vmatprep.mubr.msk.f32.mxu0 %vm406_vm1, %v6003_v58 }
 0x909   : > { %v3302_v37 = vpop.permute.xlu0 %3301 }
 0x90b   : > { %6501 = vmatmul.mubr.msk.f32.gmra.mrb[14].mxu0 %vm406_vm1, %v6004_v8 }
 0x90e   : > { %v3292_v51 = vpop.permute.xlu1 %3291 }
 0x912   : > { %v3297_v52 = vpop.permute.xlu1 %3296 }
 0x9da   : > { %v6499_v59 = vpop.f32.mrb[12].mxu0 }
 0x9db   : > { %v3305_v20 = vadd.f32 %v6499_v59, %v3292_v51  ;;  %v3261_v38 = vpop.f32.mrb[13].mxu0 }
 0x9dc   : > { %v3304_v31 = vadd.f32 %v3287_v32, %v3261_v38 }
 0x9dd   : > { %v8868_v30 = vsel %vm338_vm3, %v3305_v20, 0.0 }
 0x9de   : > { %v3416_v50 = vand.u32 2147483647, %v8868_v30  ;;  %v3419_v17 = vand.u32 2139095040, %v8868_v30  ;;  %v8874_v18 = vsel %vm338_vm3, %v3304_v31, 0.0  ;;  %v6502_v24 = vpop.f32.mrb[14].mxu0 }
 0x9df   : > { %v10311_v0 = vand.u32 2147483647, %v8874_v18  ;;  %v3315_v41 = vand.u32 2139095040, %v8874_v18  ;;  %v3307_v16 = vadd.f32 %v6502_v24, %v3302_v37  ;;  %v3271_v61 = vpop.f32.mrb[15].mxu0 }
 0x9e0   : > { %v3420_v34 = vshrl.u32 %v3419_v17, 23  ;;  %v3423_v42 = vand.u32 8388607, %v3416_v50  ;;  %v3306_v1 = vadd.f32 %v3297_v52, %v3271_v61 }
 0x9e1   : > { %v3316_v9 = vshrl.u32 %v3315_v41, 23  ;;  %v3319_v49 = vand.u32 8388607, %v10311_v0  ;;  %v8885_v36 = vsel %vm338_vm3, %v3307_v16, 0.0 }
 0x9e2   : > { %v6021_v40 = vadd.s32 4294967169, %v3420_v34  ;;  %v3627_v62 = vand.u32 2139095040, %v8885_v36  ;;  %v3424_v3 = vor.u32 8388608, %v3423_v42  ;;  %v10310_v29 = vand.u32 2147483647, %v8885_v36 }
 0x9e3   : > { %v6017_v26 = vadd.s32 4294967169, %v3316_v9  ;;  %v3320_v4 = vor.u32 8388608, %v3319_v49  ;;  %v8891_v51 = vsel %vm338_vm3, %v3306_v1, 0.0 }
 0x9e4   : > { %v3426_v2 = vadd.s32 1, %v6021_v40  ;;  %v3628_v58 = vshrl.u32 %v3627_v62, 23  ;;  %v8893_v59 = vshll.u32 %v3424_v3, 8  ;;  %v8901_v31 = vand.u32 8388607, %v10310_v29  ;;  %v6033_v40 = vld [vmem:[%s10293_s2 + $0xc0] sm:$0xff] }
 0x9e5   : > { %v3322_v13 = vadd.s32 1, %v6017_v26  ;;  %v8897_v38 = vshll.u32 %v3320_v4, 8  ;;  %6511 = vmatprep.mubr.msk.f32.mxu1 %vm406_vm1, %v6033_v40 }
 0x9e6   : > { %vm3427_vm2 = vcmp.gt.s32.totalorder %v3426_v2, 0  ;;  %v6029_v32 = vadd.s32 4294967169, %v3628_v58 }
 0x9e7   : > { %v3428_v8 = vsel %vm3427_vm2, %v3426_v2, 0  ;;  %vm3323_vm8 = vcmp.gt.s32.totalorder %v3322_v13, 0 }
 0x9e8   : > { %v3429_v25 = vshrl.u32 %v3428_v8, 5  ;;  %v3430_v23 = vand.u32 31, %v3428_v8  ;;  %v3324_v57 = vsel %vm3323_vm8, %v3322_v13, 0  ;;  %v8904_v24 = vadd.s32 1, %v6029_v32 }
 0x9e9   : > { %v8895_v20 = vshrl.u32 %v3324_v57, 5  ;;  %v3326_v37 = vand.u32 31, %v3324_v57 }
 0x9ea   : > { %v3431_v7 = vsub.s32 32, %v3430_v23  ;;  %v3433_v17 = vshll.u32 %v10318_v39, %v3430_v23  ;;  %v3436_v41 = vshll.u32 %v10314_v43, %v3430_v23  ;;  %v3439_v16 = vshll.u32 %v10312_v45, %v3430_v23 }
 0x9eb   : > { %v3442_v61 = vshll.u32 %v10316_v47, %v3430_v23  ;;  %v3445_v34 = vshll.u32 %v10353_v44, %v3430_v23  ;;  %vm3448_vm3 = vcmp.lt.s32.totalorder %v3429_v25, 1  ;;  %vm3449_vm14 = vcmp.lt.s32.totalorder %v3429_v25, 2 }
 0x9ec   : > { %v3434_v42 = vshrl.u32 %v10314_v43, %v3431_v7  ;;  %v3437_v9 = vshrl.u32 %v10312_v45, %v3431_v7  ;;  %v3440_v49 = vshrl.u32 %v10316_v47, %v3431_v7  ;;  %v3432_v52 = vshrl.u32 %v10318_v39, %v3431_v7 }
 0x9ed   : > { %v3443_v26 = vshrl.u32 %v10353_v44, %v3431_v7  ;;  %v3446_v62 = vshrl.u32 %v10354_v56, %v3431_v7  ;;  %v3327_v4 = vsub.s32 32, %v3326_v37  ;;  %vm3450_vm6 = vcmp.lt.s32.totalorder %v3429_v25, 3 }
 0x9ee   : > { %v3435_v3 = vor.u32 %v3434_v42, %v3433_v17  ;;  %v3438_v2 = vor.u32 %v3437_v9, %v3436_v41  ;;  %v3441_v1 = vor.u32 %v3440_v49, %v3439_v16  ;;  %vm3451_vm7 = vcmp.lt.s32.totalorder %v3429_v25, 4 }
 0x9ef   : > { %v3444_v13 = vor.u32 %v3443_v26, %v3442_v61  ;;  %v3447_v58 = vor.u32 %v3446_v62, %v3445_v34  ;;  %v3329_v40 = vshll.u32 %v10318_v39, %v3326_v37  ;;  %v3330_v16 = vshrl.u32 %v10314_v43, %v3327_v4 }
 0x9f0   : > { %v3452_v8 = vsel %vm3448_vm3, %v3432_v52, %v3435_v3  ;;  %v3453_v32 = vsel %vm3451_vm7, %v3441_v1, 2102212464  ;;  %v3456_v23 = vsel %vm3448_vm3, %v3435_v3, %v3438_v2  ;;  %v3460_v57 = vsel %vm3448_vm3, %v3438_v2, %v3441_v1 }
 0x9f1   : > { %v3454_v29 = vsel %vm3450_vm6, %v3438_v2, %v3453_v32  ;;  %v3457_v7 = vsel %vm3451_vm7, %v3444_v13, 920167782  ;;  %v3461_v0 = vsel %vm3451_vm7, %v3447_v58, 1326507024  ;;  %v3332_v61 = vshll.u32 %v10314_v43, %v3326_v37 }
 0x9f2   : > { %v3458_v17 = vsel %vm3450_vm6, %v3441_v1, %v3457_v7  ;;  %v3462_v41 = vsel %vm3450_vm6, %v3444_v13, %v3461_v0  ;;  %v3455_v34 = vsel %vm3449_vm14, %v3452_v8, %v3454_v29  ;;  %v3333_v49 = vshrl.u32 %v10312_v45, %v3327_v4 }
 0x9f3   : > { %v3459_v42 = vsel %vm3449_vm14, %v3456_v23, %v3458_v17  ;;  %v3463_v9 = vsel %vm3449_vm14, %v3460_v57, %v3462_v41  ;;  %v3331_v0 = vor.u32 %v3330_v16, %v3329_v40  ;;  %v3335_v1 = vshll.u32 %v10312_v45, %v3326_v37 }
 0x9f4   : > { %v8931_v52 = vmul.u32.u64.low %v8893_v59, %v3463_v9  ;;  %v8932_v26 = vmul.u32.u64.high %v8893_v59, %v3463_v9, %v8931_v52  ;;  %v8935_v62 = vmul.u32.u64.low %v8893_v59, %v3459_v42  ;;  %v8936_v3 = vmul.u32.u64.high %v8893_v59, %v3459_v42, %v8935_v62 }
 0x9f5   : > { %v3334_v2 = vor.u32 %v3333_v49, %v3332_v61  ;;  %v3336_v29 = vshrl.u32 %v10316_v47, %v3327_v4  ;;  %v3328_v13 = vshrl.u32 %v10318_v39, %v3327_v4  ;;  %v3338_v25 = vshll.u32 %v10316_v47, %v3326_v37 }
 0x9f6   : > { %v3339_v58 = vshrl.u32 %v10353_v44, %v3327_v4  ;;  %v3342_v8 = vshrl.u32 %v10354_v56, %v3327_v4  ;;  %v3471_v32 = vmul.u32 %v8893_v59, %v3455_v34  ;;  %v3341_v57 = vshll.u32 %v10353_v44, %v3326_v37 }
 0x9f7   : > { %v3337_v23 = vor.u32 %v3336_v29, %v3335_v1  ;;  %vm3344_vm10 = vcmp.lt.s32.totalorder %v8895_v20, 1  ;;  %vm3473_vm0 = vc.u32 %v8932_v26, %v8935_v62  ;;  %v3474_v7 = vadd.s32 1, %v8936_v3 }
 0x9f8   : > { %v3340_v40 = vor.u32 %v3339_v58, %v3338_v25  ;;  %vm3345_vm9 = vcmp.lt.s32.totalorder %v8895_v20, 2  ;;  %v3343_v17 = vor.u32 %v3342_v8, %v3341_v57  ;;  %vm3346_vm11 = vcmp.lt.s32.totalorder %v8895_v20, 3 }
 0x9f9   : > { %vm3347_vm12 = vcmp.lt.s32.totalorder %v8895_v20, 4  ;;  %v3352_v4 = vsel %vm3344_vm10, %v3331_v0, %v3334_v2  ;;  %v3475_v59 = vsel %vm3473_vm0, %v3474_v7, %v8936_v3  ;;  %v3356_v37 = vsel %vm3344_vm10, %v3334_v2, %v3337_v23 }
 0x9fa   : > { %v3349_v41 = vsel %vm3347_vm12, %v3337_v23, 2102212464  ;;  %v3353_v16 = vsel %vm3347_vm12, %v3340_v40, 920167782  ;;  %v3476_v61 = vadd.s32 %v3475_v59, %v3471_v32  ;;  %v3348_v34 = vsel %vm3344_vm10, %v3328_v13, %v3331_v0 }
 0x9fb   : > { %v3354_v42 = vsel %vm3346_vm11, %v3337_v23, %v3353_v16  ;;  %v3357_v9 = vsel %vm3347_vm12, %v3343_v17, 1326507024  ;;  %v3350_v49 = vsel %vm3346_vm11, %v3334_v2, %v3349_v41  ;;  %vm3635_vm2 = vcmp.gt.s32.totalorder %v8904_v24, 0 }
 0x9fc   : > { %v3355_v52 = vsel %vm3345_vm9, %v3352_v4, %v3354_v42  ;;  %v3358_v1 = vsel %vm3346_vm11, %v3340_v40, %v3357_v9  ;;  %v3477_v29 = vadd.s32 536870912, %v3476_v61  ;;  %v3636_v2 = vsel %vm3635_vm2, %v8904_v24, 0 }
 0x9fd   : > { %v3359_v25 = vsel %vm3345_vm9, %v3356_v37, %v3358_v1  ;;  %v8959_v3 = vmul.u32.u64.low %v8897_v38, %v3355_v52  ;;  %v8960_v58 = vmul.u32.u64.high %v8897_v38, %v3355_v52, %v8959_v3  ;;  %v3351_v32 = vsel %vm3345_vm9, %v3348_v34, %v3350_v49 }
 0x9fe   : > { %v8964_v0 = vmul.u32.u64.low %v8897_v38, %v3359_v25  ;;  %v8965_v13 = vmul.u32.u64.high %v8897_v38, %v3359_v25, %v8964_v0  ;;  %v3478_v8 = vshrl.u32 %v3477_v29, 30  ;;  %v3632_v23 = vor.u32 8388608, %v8901_v31 }
 0x9ff   : > { %v3638_v57 = vand.u32 31, %v3636_v2  ;;  %v3523_v7 = vand.u32 2139095040, %v8891_v51  ;;  %v3370_v17 = vadd.s32 1, %v8960_v58  ;;  %v3367_v59 = vmul.u32 %v8897_v38, %v3351_v32 }
 0xa00   : > { %v3479_v40 = vshll.u32 %v3478_v8, 30  ;;  %vm3369_vm8 = vc.u32 %v8965_v13, %v8959_v3  ;;  %v8979_v20 = vshll.u32 %v3632_v23, 8  ;;  %vm3418_vm3 = vcmp.lt.s32.totalorder %v8868_v30, 0 }
 0xa01   : > { %v3639_v4 = vsub.s32 32, %v3638_v57  ;;  %v3371_v24 = vsel %vm3369_vm8, %v3370_v17, %v8960_v58  ;;  %v3524_v42 = vshrl.u32 %v3523_v7, 23  ;;  %v3472_v38 = vadd.s32 %v8935_v62, %v8932_v26 }
 0xa02   : > { %v8976_v41 = vsub.s32 %v3476_v61, %v3479_v40  ;;  %v3372_v16 = vadd.s32 %v3371_v24, %v3367_v59  ;;  %v3647_v61 = vshll.u32 %v10312_v45, %v3638_v57  ;;  %v3637_v1 = vshrl.u32 %v3636_v2, 5 }
 0xa03   : > { %v3642_v37 = vshrl.u32 %v10314_v43, %v3639_v4  ;;  %v3645_v34 = vshrl.u32 %v10312_v45, %v3639_v4  ;;  %v3648_v49 = vshrl.u32 %v10316_v47, %v3639_v4  ;;  %v3641_v29 = vshll.u32 %v10318_v39, %v3638_v57 }
 0xa04   : > { %v3482_v9 = vsub.s32 0, %v8976_v41  ;;  %v3373_v52 = vadd.s32 536870912, %v3372_v16  ;;  %v3644_v25 = vshll.u32 %v10314_v43, %v3638_v57  ;;  %v3650_v32 = vshll.u32 %v10316_v47, %v3638_v57 }
 0xa05   : > { %v3649_v0 = vor.u32 %v3648_v49, %v3647_v61  ;;  %v3651_v23 = vshrl.u32 %v10353_v44, %v3639_v4  ;;  %v3643_v62 = vor.u32 %v3642_v37, %v3641_v29  ;;  %v3654_v40 = vshrl.u32 %v10354_v56, %v3639_v4 }
 0xa06   : > { %v6022_v58 = vmin.u32 %v3482_v9, %v8976_v41  ;;  %v3374_v26 = vshrl.u32 %v3373_v52, 30  ;;  %v3646_v7 = vor.u32 %v3645_v34, %v3644_v25  ;;  %v3502_v59 = vsub.s32 4, %v3478_v8 }
 0xa07   : > { %v3652_v24 = vor.u32 %v3651_v23, %v3650_v32  ;;  %v6025_v2 = vadd.s32 4294967169, %v3524_v42  ;;  %v3640_v31 = vshrl.u32 %v10318_v39, %v3639_v4  ;;  %v3653_v43 = vshll.u32 %v10353_v44, %v3638_v57 }
 0xa08   : > { %v3484_v17 = vclz %v6022_v58  ;;  %v3375_v45 = vshll.u32 %v3374_v26, 30  ;;  %vm3659_vm14 = vcmp.lt.s32.totalorder %v3637_v1, 4  ;;  %vm3656_vm6 = vcmp.lt.s32.totalorder %v3637_v1, 1 }
 0xa09   : > { %vm3658_vm7 = vcmp.lt.s32.totalorder %v3637_v1, 3  ;;  %v3661_v61 = vsel %vm3659_vm14, %v3649_v0, 2102212464  ;;  %vm9000_vm10 = vcmp.le.f32.partialorder %v3416_v50, 0.7853982  ;;  %vm3314_vm0 = vcmp.lt.s32.totalorder %v8874_v18, 0 }
 0xa0a   : > { %v6023_v9 = vadd.s32 4294967294, %v3484_v17  ;;  %v9005_v34 = vsub.s32 %v3372_v16, %v3375_v45  ;;  %v3655_v42 = vor.u32 %v3654_v40, %v3653_v43  ;;  %v3664_v4 = vsel %vm3656_vm6, %v3643_v62, %v3646_v7 }
 0xa0b   : > { %v3665_v57 = vsel %vm3659_vm14, %v3652_v24, 920167782  ;;  %v3660_v49 = vsel %vm3656_vm6, %v3640_v31, %v3643_v62  ;;  %v3662_v52 = vsel %vm3658_vm7, %v3646_v7, %v3661_v61  ;;  %v3503_v25 = vsel %vm3418_vm3, %v3502_v59, %v3478_v8 }
 0xa0c   : > { %vm6024_vm9 = vcmp.lt.s32.totalorder %v6023_v9, 0  ;;  %v3666_v29 = vsel %vm3658_vm7, %v3649_v0, %v3665_v57  ;;  %v3378_v58 = vsub.s32 0, %v9005_v34  ;;  %vm3657_vm11 = vcmp.lt.s32.totalorder %v3637_v1, 2 }
 0xa0d   : > { %v3487_v50 = vsel %vm6024_vm9, 0, %v6023_v9  ;;  %v3667_v16 = vsel %vm3657_vm11, %v3664_v4, %v3666_v29  ;;  %v3668_v32 = vsel %vm3656_vm6, %v3646_v7, %v3649_v0  ;;  %v3398_v40 = vsub.s32 4, %v3374_v26 }
 0xa0e   : > { %v3488_v45 = vsub.s32 32, %v3487_v50  ;;  %v3492_v43 = vsub.s32 4294967266, %v3487_v50  ;;  %v6018_v23 = vmin.u32 %v3378_v58, %v9005_v34  ;;  %v3663_v31 = vsel %vm3657_vm11, %v3660_v49, %v3662_v52 }
 0xa0f   : > { %v3669_v62 = vsel %vm3659_vm14, %v3655_v42, 1326507024  ;;  %v3489_v17 = vshll.u32 %v8976_v41, %v3487_v50  ;;  %v9021_v47 = vmul.u32.u64.low %v8979_v20, %v3667_v16  ;;  %v9022_v39 = vmul.u32.u64.high %v8979_v20, %v3667_v16, %v9021_v47 }
 0xa10   : > { %v3490_v9 = vshrl.u32 %v3472_v38, %v3488_v45  ;;  %v3493_v61 = vadd.s32 127, %v3492_v43  ;;  %v3670_v8 = vsel %vm3658_vm7, %v3652_v24, %v3669_v62  ;;  %v3380_v59 = vclz %v6018_v23 }
 0xa11   : > { %v3671_v57 = vsel %vm3657_vm11, %v3668_v32, %v3670_v8  ;;  %v10365_v42 = vand.u32 2147483647, %v8874_v18  ;;  %v10368_v1 = vand.u32 2147483647, %v8891_v51  ;;  %v3530_v52 = vadd.s32 1, %v6025_v2 }
 0xa12   : > { %v3491_v0 = vor.u32 %v3490_v9, %v3489_v17  ;;  %v3494_v7 = vshll.u32 %v3493_v61, 23  ;;  %v9026_v4 = vmul.u32.u64.low %v8979_v20, %v3671_v57  ;;  %v9027_v49 = vmul.u32.u64.high %v8979_v20, %v3671_v57, %v9026_v4 }
 0xa13   : > { %vm9031_vm12 = vcmp.le.f32.partialorder %v10365_v42, 0.7853982  ;;  %v6019_v38 = vadd.s32 4294967294, %v3380_v59  ;;  %v3527_v24 = vand.u32 8388607, %v10368_v1  ;;  %v3505_v50 = vsel %vm9000_vm10, 0, %v3503_v25 }
 0xa14   : > { %v3495_v29 = vor.u32 4788187, %v3494_v7  ;;  %v3368_v58 = vadd.s32 %v8959_v3, %v8965_v13  ;;  %v3399_v45 = vsel %vm3314_vm0, %v3398_v40, %v3374_v26  ;;  %v3679_v43 = vmul.u32 %v8979_v20, %v3663_v31 }
 0xa15   : > { %vm6020_vm2 = vcmp.lt.s32.totalorder %v6019_v38, 0  ;;  %v3682_v16 = vadd.s32 1, %v9022_v39  ;;  %vm3531_vm8 = vcmp.gt.s32.totalorder %v3530_v52, 0  ;;  %v3498_v23 = vcvt.s32.f32 %v3491_v0 }
 0xa16   : > { %v3496_v32 = vand.u32 2147483647, %v3495_v29  ;;  %v3383_v62 = vsel %vm6020_vm2, 0, %v6019_v38  ;;  %vm3681_vm14 = vc.u32 %v9027_v49, %v9021_v47  ;;  %v3509_v2 = vadd.s32 3, %v3505_v50 }
 0xa17   : > { %v3384_v25 = vsub.s32 32, %v3383_v62  ;;  %v3388_v17 = vsub.s32 4294967266, %v3383_v62  ;;  %v3683_v3 = vsel %vm3681_vm14, %v3682_v16, %v9022_v39  ;;  %v3401_v26 = vsel %vm9031_vm12, 0, %v3399_v45 }
 0xa18   : > { %v3499_v13 = vmul.f32 %v3498_v23, %v3496_v32  ;;  %v3684_v40 = vadd.s32 %v3683_v3, %v3679_v43  ;;  %v3532_v20 = vsel %vm3531_vm8, %v3530_v52, 0  ;;  %v3385_v31 = vshll.u32 %v9005_v34, %v3383_v62 }
 0xa19   : > { %v3386_v9 = vshrl.u32 %v3368_v58, %v3384_v25  ;;  %v3389_v61 = vadd.s32 127, %v3388_v17  ;;  %v3534_v8 = vand.u32 31, %v3532_v20  ;;  %v9053_v39 = vand.u32 3, %v3509_v2 }
 0xa1a   : > { %v3500_v59 = vxor.u32 2147483648, %v3499_v13  ;;  %v3685_v57 = vadd.s32 536870912, %v3684_v40  ;;  %v9055_v38 = vadd.s32 3, %v3401_v26  ;;  %v3528_v29 = vor.u32 8388608, %v3527_v24 }
 0xa1b   : > { %v3387_v0 = vor.u32 %v3386_v9, %v3385_v31  ;;  %v3390_v7 = vshll.u32 %v3389_v61, 23  ;;  %v3535_v4 = vsub.s32 32, %v3534_v8  ;;  %v10369_v50 = vmov 683565275  }
 0xa1c   : > { %v3501_v42 = vsel %vm3418_vm3, %v3500_v59, %v3499_v13  ;;  %v9057_v1 = vshrl.u32 %v3685_v57, 30  ;;  %v3537_v58 = vshll.u32 %v10369_v50, %v3534_v8  ;;  %v10370_v16 = vmov 2475754826  }
 0xa1d   : > { %v3504_v34 = vsel %vm9000_vm10, %v8868_v30, %v3501_v42  ;;  %v3391_v52 = vor.u32 4788187, %v3390_v7  ;;  %v3394_v45 = vcvt.s32.f32 %v3387_v0  ;;  %v3538_v32 = vshrl.u32 %v10370_v16, %v3535_v4 }
 0xa1e   : > { %7158 = vcosq.f32 %v3504_v34  ;;  %v3687_v43 = vshll.u32 %v9057_v1, 30  ;;  %v10371_v62 = vmov 2131351028   ;;  %v10372_v25 = vmov 2102212464  }
 0xa1f   : > { %7160 = vsinq.f32 %v3504_v34  ;;  %v3392_v23 = vand.u32 2147483647, %v3391_v52  ;;  %v3541_v2 = vshrl.u32 %v10371_v62, %v3535_v4  ;;  %v3544_v17 = vshrl.u32 %v10372_v25, %v3535_v4 }
 0xa20   : > { %v9067_v3 = vsub.s32 %v3684_v40, %v3687_v43  ;;  %v3533_v37 = vshrl.u32 %v3532_v20, 5  ;;  %v3540_v13 = vshll.u32 %v10370_v16, %v3534_v8  ;;  %v3543_v24 = vshll.u32 %v10371_v62, %v3534_v8 }
 0xa21   : > { %v3395_v26 = vmul.f32 %v3394_v45, %v3392_v23  ;;  %v3539_v31 = vor.u32 %v3538_v32, %v3537_v58  ;;  %v3546_v9 = vshll.u32 %v10372_v25, %v3534_v8  ;;  %v9072_v61 = vshll.u32 %v3528_v29, 8 }
 0xa22   : > { %v3690_v59 = vsub.s32 0, %v9067_v3  ;;  %v3542_v57 = vor.u32 %v3541_v2, %v3540_v13  ;;  %v3545_v0 = vor.u32 %v3544_v17, %v3543_v24  ;;  %v3547_v7 = vshrl.u32 %v10353_v44, %v3535_v4 }
 0xa23   : > { %v3396_v42 = vxor.u32 2147483648, %v3395_v26  ;;  %v3549_v40 = vshll.u32 %v10353_v44, %v3534_v8  ;;  %v3550_v20 = vshrl.u32 %v10354_v56, %v3535_v4  ;;  %vm3515_vm3 = vcmp.eq.s32.totalorder %v9053_v39, 2 }
 0xa24   : > { %v6030_v34 = vmin.u32 %v3690_v59, %v9067_v3  ;;  %v3536_v52 = vshrl.u32 %v10369_v50, %v3535_v4  ;;  %v3548_v58 = vor.u32 %v3547_v7, %v3546_v9  ;;  %vm3552_vm6 = vcmp.lt.s32.totalorder %v3533_v37, 1 }
 0xa25   : > { %v3397_v29 = vsel %vm3314_vm0, %v3396_v42, %v3395_v26  ;;  %v3551_v45 = vor.u32 %v3550_v20, %v3549_v40  ;;  %vm3553_vm7 = vcmp.lt.s32.totalorder %v3533_v37, 2  ;;  %vm3555_vm10 = vcmp.lt.s32.totalorder %v3533_v37, 4 }
 0xa26   : > { %v3400_v8 = vsel %vm9031_vm12, %v8874_v18, %v3397_v29  ;;  %v3692_v43 = vclz %v6030_v34  ;;  %v3557_v32 = vsel %vm3555_vm10, %v3545_v0, 2102212464  ;;  %v3560_v23 = vsel %vm3552_vm6, %v3539_v31, %v3542_v57 }
 0xa27   : > { %7162 = vcosq.f32 %v3400_v8  ;;  %vm3554_vm9 = vcmp.lt.s32.totalorder %v3533_v37, 3  ;;  %v3556_v4 = vsel %vm3552_vm6, %v3536_v52, %v3539_v31  ;;  %v3561_v2 = vsel %vm3555_vm10, %v3548_v58, 920167782 }
 0xa28   : > { %v7159_v17 = vpop.eup %7158  ;;  %7164 = vsinq.f32 %v3400_v8  ;;  %v6031_v13 = vadd.s32 4294967294, %v3692_v43  ;;  %v3562_v24 = vsel %vm3554_vm9, %v3545_v0, %v3561_v2  ;;  %v3564_v26 = vsel %vm3552_vm6, %v3542_v57, %v3545_v0 }
 0xa29   : > { %v7161_v9 = vpop.eup %7160  ;;  %v3558_v41 = vsel %vm3554_vm9, %v3542_v57, %v3557_v32  ;;  %v3563_v59 = vsel %vm3553_vm7, %v3560_v23, %v3562_v24  ;;  %v3565_v7 = vsel %vm3555_vm10, %v3551_v45, 1326507024  ;;  %v3516_v42 = vxor.u32 2147483648, %v7159_v17 }
 0xa2a   : > { %vm6032_vm0 = vcmp.lt.s32.totalorder %v6031_v13, 0  ;;  %v3566_v40 = vsel %vm3554_vm9, %v3548_v58, %v3565_v7  ;;  %v9094_v20 = vmul.u32.u64.low %v9072_v61, %v3563_v59  ;;  %v9095_v31 = vmul.u32.u64.high %v9072_v61, %v3563_v59, %v9094_v20 }
 0xa2b   : > { %v3695_v34 = vsel %vm6032_vm0, 0, %v6031_v13  ;;  %v3567_v52 = vsel %vm3553_vm7, %v3564_v26, %v3566_v40  ;;  %v3513_v29 = vxor.u32 2147483648, %v7161_v9  ;;  %v3517_v0 = vsel %vm3515_vm3, %v3516_v42, %v7161_v9 }
 0xa2c   : > { %v3700_v57 = vsub.s32 4294967266, %v3695_v34  ;;  %vm3508_vm11 = vweird.f32 %v8868_v30  ;;  %vm3512_vm12 = vcmp.eq.s32.totalorder %v9053_v39, 0  ;;  %vm3511_vm2 = vcmp.lt.s32.totalorder %v9053_v39, 2 }
 0xa2d   : > { %v9104_v45 = vmul.u32.u64.low %v9072_v61, %v3567_v52  ;;  %v9105_v58 = vmul.u32.u64.high %v9072_v61, %v3567_v52, %v9104_v45  ;;  %v3514_v8 = vsel %vm3512_vm12, %v7159_v17, %v3513_v29  ;;  %v3406_v43 = vand.u32 3, %v9055_v38 }
 0xa2e   : > { %v3559_v32 = vsel %vm3553_vm7, %v3556_v4, %v3558_v41  ;;  %v3578_v23 = vadd.s32 1, %v9095_v31  ;;  %v3518_v2 = vsel %vm3511_vm2, %v3514_v8, %v3517_v0  ;;  %v3701_v13 = vadd.s32 127, %v3700_v57 }
 0xa2f   : > { %v3519_v24 = vsel %vm3508_vm11, nan, %v3518_v2  ;;  %v7381_v26 = vmov 10   ;;  %v3696_v9 = vsub.s32 32, %v3695_v34  ;;  %v3575_v59 = vmul.u32 %v9072_v61, %v3559_v32 }
 0xa30   : > { %7068 = vset.pattern.permute.xlu1 %v7381_v26  ;;  %7069 = vset.pattern.permute.xlu0 %v7381_v26  ;;  %vm3577_vm8 = vc.u32 %v9105_v58, %v9094_v20  ;;  %vm3411_vm14 = vcmp.eq.s32.totalorder %v3406_v43, 2  ;;  %v3680_v4 = vadd.s32 %v9021_v47, %v9027_v49  ;;  %v3702_v17 = vshll.u32 %v3701_v13, 23 }
 0xa31   : > { %v7163_v30 = vpop.eup %7162  ;;  %3867 = vperm.xlu1 %7068, %v8798_v5   ;;  %3871 = vperm.xlu0 %7069, %v8806_v35   ;;  %v3579_v38 = vsel %vm3577_vm8, %v3578_v23, %v9095_v31  ;;  %vm3408_vm3 = vcmp.eq.s32.totalorder %v3406_v43, 0  ;;  %vm3407_vm6 = vcmp.lt.s32.totalorder %v3406_v43, 2  ;;  %vm3404_vm7 = vweird.f32 %v8874_v18 }
 0xa32   : > { %v7165_v39 = vpop.eup %7164  ;;  %v3412_v37 = vxor.u32 2147483648, %v7163_v30  ;;  %v3580_v41 = vadd.s32 %v3579_v38, %v3575_v59  ;;  %v3698_v42 = vshrl.u32 %v3680_v4, %v3696_v9  ;;  %v3697_v35 = vshll.u32 %v9067_v3, %v3695_v34 }
 0xa33   : > { %v3409_v7 = vxor.u32 2147483648, %v7165_v39  ;;  %v3703_v31 = vor.u32 4788187, %v3702_v17  ;;  %vm3626_vm9 = vcmp.lt.s32.totalorder %v8885_v36, 0  ;;  %vm3522_vm11 = vcmp.lt.s32.totalorder %v8891_v51, 0 }
 0xa34   : > { %v3413_v61 = vsel %vm3411_vm14, %v3412_v37, %v7165_v39  ;;  %v3581_v40 = vadd.s32 536870912, %v3580_v41  ;;  %v3699_v49 = vor.u32 %v3698_v42, %v3697_v35  ;;  %v10376_v35 = vand.u32 2147483647, %v8891_v51 }
 0xa35   : > { %v3410_v52 = vsel %vm3408_vm3, %v7163_v30, %v3409_v7  ;;  %3875 = vperm.xlu1 %7068, %v8826_v14   ;;  %v3704_v45 = vand.u32 2147483647, %v3703_v31  ;;  %v10373_v30 = vand.u32 2147483647, %v8885_v36 }
 0xa36   : > { %v3414_v5 = vsel %vm3407_vm6, %v3410_v52, %v3413_v61  ;;  %v3582_v29 = vshrl.u32 %v3581_v40, 30  ;;  %v3706_v43 = vcvt.s32.f32 %v3699_v49  ;;  %vm3521_vm12 = vcmp.le.f32.partialorder %v10376_v35, 0.7853982 }
 0xa37   : > { %v3415_v0 = vsel %vm3404_vm7, nan, %v3414_v5  ;;  %vm9130_vm0 = vcmp.le.f32.partialorder %v10373_v30, 0.7853982  ;;  %vm3716_vm7 = vweird.f32 %v8885_v36 }
 0xa38   : > { %v6707_v47 = vpack.c.bf16 %v3519_v24, %v3415_v0  ;;  %v3583_v57 = vshll.u32 %v3582_v29, 30  ;;  %v3707_v14 = vmul.f32 %v3706_v43, %v3704_v45  ;;  %v3606_v40 = vsub.s32 4, %v3582_v29 }
 0xa39   : > { %3879 = vperm.xlu1 %7068, %v8817_v55   ;;  %v3576_v55 = vadd.s32 %v9094_v20, %v9105_v58 }
 0xa3a   : > { %6708 = vmatprep.subr.bf16.mxu1 %v6707_v47  ;;  %v3584_v8 = vsub.s32 %v3580_v41, %v3583_v57  ;;  %v3708_v2 = vxor.u32 2147483648, %v3707_v14  ;;  %v3710_v41 = vsub.s32 4, %v9057_v1  ;;  %v3607_v0 = vsel %vm3522_vm11, %v3606_v40, %v3582_v29 }
 0xa3b   : > { %6710 = vmatpush3.bf16.msra.mxu1 %v6707_v47 }
 0xa3c   : > { %v3586_v32 = vsub.s32 0, %v3584_v8  ;;  %v3709_v34 = vsel %vm3626_vm9, %v3708_v2, %v3707_v14  ;;  %v3711_v61 = vsel %vm3626_vm9, %v3710_v41, %v9057_v1  ;;  %v3609_v1 = vsel %vm3521_vm12, 0, %v3607_v0 }
 0xa3d   : > { %v3712_v37 = vsel %vm9130_vm0, %v8885_v36, %v3709_v34  ;;  %v3713_v52 = vsel %vm9130_vm0, 0, %v3711_v61  ;;  %v3613_v43 = vadd.s32 3, %v3609_v1  ;;  %vm3612_vm9 = vweird.f32 %v8891_v51  ;;  %v6036_v36 = vld [vmem:[%s10293_s2 + $0xd8] sm:$0xff]  ;;  %v3922_v61 = vld [vmem:[#allocation2 + $0x90] sm:$0xff] }
 0xa3e   : > { %v6026_v23 = vmin.u32 %v3586_v32, %v3584_v8  ;;  %7166 = vcosq.f32 %v3712_v37  ;;  %v3717_v47 = vadd.s32 3, %v3713_v52 }
 0xa3f   : > { %7168 = vsinq.f32 %v3712_v37  ;;  %v6035_v37 = vld [vmem:[%s10293_s2 + $0xd0] sm:$0xff] }
 0xa40   : > { %v3588_v18 = vclz %v6026_v23  ;;  %v3614_v23 = vand.u32 3, %v3613_v43 }
 0xa42   : > { %v6027_v13 = vadd.s32 4294967294, %v3588_v18  ;;  %vm3619_vm3 = vcmp.eq.s32.totalorder %v3614_v23, 2  ;;  %vm3616_vm6 = vcmp.eq.s32.totalorder %v3614_v23, 0 }
 0xa44   : > { %vm6028_vm10 = vcmp.lt.s32.totalorder %v6027_v13, 0 }
 0xa45   : > { %v3591_v3 = vsel %vm6028_vm10, 0, %v6027_v13  ;;  %vm3615_vm10 = vcmp.lt.s32.totalorder %v3614_v23, 2 }
 0xa46   : > { %v3592_v24 = vsub.s32 32, %v3591_v3  ;;  %v3596_v26 = vsub.s32 4294967266, %v3591_v3  ;;  %v3593_v59 = vshll.u32 %v3584_v8, %v3591_v3  ;;  %v3718_v8 = vand.u32 3, %v3717_v47 }
 0xa48   : > { %v3594_v39 = vshrl.u32 %v3576_v55, %v3592_v24  ;;  %v3597_v38 = vadd.s32 127, %v3596_v26  ;;  %v7167_v57 = vpop.eup %7166  ;;  %vm3720_vm2 = vcmp.eq.s32.totalorder %v3718_v8, 0  ;;  %vm3723_vm8 = vcmp.eq.s32.totalorder %v3718_v8, 2 }
 0xa49   : > { %v7169_v45 = vpop.eup %7168  ;;  %v3724_v14 = vxor.u32 2147483648, %v7167_v57  ;;  %vm3719_vm14 = vcmp.lt.s32.totalorder %v3718_v8, 2 }
 0xa4a   : > { %v3595_v4 = vor.u32 %v3594_v39, %v3593_v59  ;;  %v3598_v17 = vshll.u32 %v3597_v38, 23  ;;  %v3721_v32 = vxor.u32 2147483648, %v7169_v45  ;;  %v6034_v38 = vld [vmem:[%s10293_s2 + $0xc8] sm:$0xff] }
 0xa4b   : > { %v3725_v2 = vsel %vm3723_vm8, %v3724_v14, %v7169_v45 }
 0xa4c   : > { %v3599_v20 = vor.u32 4788187, %v3598_v17  ;;  %v3602_v7 = vcvt.s32.f32 %v3595_v4  ;;  %v3722_v18 = vsel %vm3720_vm2, %v7167_v57, %v3721_v32 }
 0xa4d   : > { %v3726_v34 = vsel %vm3719_vm14, %v3722_v18, %v3725_v2 }
 0xa4e   : > { %v3600_v58 = vand.u32 2147483647, %v3599_v20  ;;  %v3727_v30 = vsel %vm3716_vm7, nan, %v3726_v34  ;;  %v3920_v20 = vld [vmem:[#allocation2 + $0x80] sm:$0xff] }
 0xa50   : > { %v3603_v42 = vmul.f32 %v3602_v7, %v3600_v58  ;;  %v3921_v58 = vld [vmem:[#allocation2 + $0x88] sm:$0xff] }
 0xa51   : > { %v7070_v7 = vpack.i.bf16 %v3921_v58, %v3920_v20  ;;  %v6060_v20 = vld [vmem:[%s10332_s1 + $0x138] sm:$0xff]  ;;  %v9228_v58 = vld [vmem:[%s10294_s3 + $0x10] sm:$0xff] }
 0xa52   : > { %v3604_v5 = vxor.u32 2147483648, %v3603_v42 }
 0xa53   : > { %7071 = vrot.lane.b32.xlu0 %v7070_v7, %s10381_s17  ;;  %v6053_v7 = vld [vmem:[%s10332_s1 + $0x100] sm:$0xff] }
 0xa54   : > { %v3605_v31 = vsel %vm3522_vm11, %v3604_v5, %v3603_v42  ;;  %v3923_v42 = vld [vmem:[#allocation2 + $0x98] sm:$0xff] }
 0xa55   : > { %v3608_v49 = vsel %vm3521_vm12, %v8891_v51, %v3605_v31  ;;  %v9161_v51 = vpop.f32.mrb[20].mxu1  ;;  %v7075_v40 = vpack.i.bf16 %v3923_v42, %v3922_v61 }
 0xa56   : > { %7170 = vcosq.f32 %v3608_v49  ;;  %10377 = vst [vmem:[#allocation18_spill] sm:$0xff] %v9161_v51  ;;  %v9163_v4 = vpop.f32.mrb[21].mxu1 }
 0xa57   : > { %7172 = vsinq.f32 %v3608_v49  ;;  %10378 = vst [vmem:[#allocation19_spill] sm:$0xff] %v9163_v4  ;;  %v9165_v17 = vpop.f32.mrb[22].mxu1  ;;  %7076 = vrot.lane.b32.xlu0 %v7075_v40, %s10381_s17  ;;  %v6057_v49 = vld [vmem:[%s10332_s1 + $0x120] sm:$0xff] }
 0xa58   : > { %10379 = vst [vmem:[#allocation20_spill] sm:$0xff] %v9165_v17  ;;  %v9167_v41 = vpop.f32.mrb[23].mxu1  ;;  %6531 = vmatprep.mubr.msk.f32.mxu0 %vm406_vm1, %v6057_v49 }
 0xa59   : > { %10380 = vst [vmem:[#allocation21_spill] sm:$0xff] %v9167_v41 }
 0xa60   : > { %v7171_v13 = vpop.eup %7170 }
 0xa61   : > { %v7173_v29 = vpop.eup %7172  ;;  %v3620_v3 = vxor.u32 2147483648, %v7171_v13 }
 0xa62   : > { %v3617_v55 = vxor.u32 2147483648, %v7173_v29 }
 0xa63   : > { %v3621_v24 = vsel %vm3619_vm3, %v3620_v3, %v7173_v29 }
 0xa64   : > { %v3618_v26 = vsel %vm3616_vm6, %v7171_v13, %v3617_v55 }
 0xa65   : > { %v3622_v9 = vsel %vm3615_vm10, %v3618_v26, %v3621_v24 }
 0xa66   : > { %v3623_v59 = vsel %vm3612_vm9, nan, %v3622_v9  ;;  %v9200_v9 = vld [vmem:[%s10294_s3] sm:$0xff] }
 0xa67   : > { %v6711_v39 = vpack.c.bf16 %v3727_v30, %v3623_v59  ;;  %v6058_v59 = vld [vmem:[%s10332_s1 + $0x128] sm:$0xff] }
 0xa69   : > { %6712 = vmatprep.subr.bf16.mxu1 %v6711_v39 }
 0xa6a   : > { %6714 = vmatpush3.bf16.msra.mxu1 %v6711_v39  ;;  %v7382_v39 = vmov 12  }
 0xa6b   : > { %7090 = vset.pattern.permute.xlu0 %v7382_v39  ;;  %7091 = vset.pattern.permute.xlu1 %v7382_v39 }
 0xa6c   : > { %4186 = vperm.xlu0 %7090, %v9200_v9  }
 0xa6d   : > { %6512 = vmatmul.mubr.msk.f32.vlgmr.msra.gmra.mrb[24].mxu1 %vm406_vm1, %v6034_v38  ;;  %v9208_v38 = vld [vmem:[%s10294_s3 + $0x8] sm:$0xff] }
 0xa6e   : > { %6514 = vmatprep.mubr.msk.f32.mxu1 %vm406_vm1, %v6035_v37  ;;  %v6059_v37 = vld [vmem:[%s10332_s1 + $0x130] sm:$0xff] }
 0xa71   : > { %6515 = vmatmul.mubr.msk.f32.gmra.mrb[26].mxu1 %vm406_vm1, %v6036_v36  ;;  %v9217_v36 = vld [vmem:[%s10294_s3 + $0x18] sm:$0xff] }
 0xa72   : > { %4201 = vperm.xlu0 %7090, %v9217_v36  }
 0xab0   : > { %v3868_v52 = vpop.permute.xlu1 %3867  ;;  %v3872_v35 = vpop.permute.xlu0 %3871 }
 0xab4   : > { %v3876_v5 = vpop.permute.xlu1 %3875 }
 0xab8   : > { %v3880_v1 = vpop.permute.xlu1 %3879 }
 0xac5   : > { %v7072_v61 = vpop.permute.xlu0 %7071 }
 0xac6   : > { %v7074_v42 = vunpack.i.h.bf16 %v7072_v61  ;;  %v7073_v40 = vunpack.i.l.bf16 %v7072_v61 }
 0xb40   : > { %v6513_v31 = vpop.f32.mrb[24].mxu1 }
 0xb41   : > { %v3883_v0 = vadd.f32 %v6513_v31, %v3872_v35  ;;  %v3827_v47 = vpop.f32.mrb[25].mxu1 }
 0xb42   : > { %v3882_v57 = vadd.f32 %v3868_v52, %v3827_v47 }
 0xb43   : > { %v3912_v45 = vadd.f32 %v3883_v0, %v8775_v10 }
 0xb44   : > { %v3911_v8 = vadd.f32 %v3882_v57, %v8777_v22  ;;  %v6516_v43 = vpop.f32.mrb[26].mxu1 }
 0xb45   : > { %v9177_v32 = vmul.f32 0.5, %v3912_v45  ;;  %v3885_v14 = vadd.f32 %v6516_v43, %v3880_v1  ;;  %v3837_v23 = vpop.f32.mrb[27].mxu1 }
 0xb46   : > { %v9179_v18 = vmul.f32 0.5, %v3911_v8  ;;  %v3884_v2 = vadd.f32 %v3876_v5, %v3837_v23  ;;  %v7077_v5 = vpop.permute.xlu0 %7076 }
 0xb47   : > { %v3914_v13 = vadd.f32 %v3885_v14, %v8785_v48  ;;  %v7079_v0 = vunpack.i.h.bf16 %v7077_v5  ;;  %v7078_v47 = vunpack.i.l.bf16 %v7077_v5 }
 0xb48   : > { %v3913_v29 = vadd.f32 %v3884_v2, %v8787_v63  ;;  %v7080_v3 = vpack.i.bf16 %v9177_v32, %v9179_v18  ;;  %v6715_v34 = vpack.c.bf16 %v9177_v32, %v9179_v18 }
 0xb49   : > { %v9187_v55 = vmul.f32 0.5, %v3914_v13  ;;  %v6054_v13 = vld [vmem:[%s10332_s1 + $0x108] sm:$0xff] }
 0xb4a   : > { %v9189_v24 = vmul.f32 0.5, %v3913_v29  ;;  %7081 = vrot.lane.b32.xlu1 %v7080_v3, %s10382_s11  ;;  %6716 = vmatprep.subr.bf16.mxu0 %v6715_v34  ;;  %v6055_v29 = vld [vmem:[%s10332_s1 + $0x110] sm:$0xff]  ;;  %v6056_v3 = vld [vmem:[%s10332_s1 + $0x118] sm:$0xff] }
 0xb4b   : > { %6718 = vmatpush3.bf16.msra.mxu0 %v6715_v34  ;;  %v4187_v34 = vpop.permute.xlu0 %4186 }
 0xb4c   : > { %v7085_v26 = vpack.i.bf16 %v9187_v55, %v9189_v24  ;;  %v6719_v30 = vpack.c.bf16 %v9187_v55, %v9189_v24 }
 0xb4e   : > { %7086 = vrot.lane.b32.xlu1 %v7085_v26, %s10382_s11  ;;  %6720 = vmatprep.subr.bf16.mxu0 %v6719_v30  ;;  %v6037_v26 = vld [vmem:[%s10293_s2 + $0xe0] sm:$0xff] }
 0xb4f   : > { %6722 = vmatpush3.bf16.msra.mxu0 %v6719_v30  ;;  %v6038_v30 = vld [vmem:[%s10293_s2 + $0xe8] sm:$0xff]  ;;  %6517 = vmatprep.mubr.msk.f32.mxu1 %vm406_vm1, %v6037_v26 }
 0xb50   : > { %6518 = vmatmul.mubr.msk.f32.gmra.mrb[28].mxu1 %vm406_vm1, %v6038_v30 }
 0xb52   : > { %6532 = vmatmul.mubr.msk.f32.vlgmr.msra.gmra.mrb[16].mxu0 %vm406_vm1, %v6058_v59  ;;  %4191 = vperm.xlu1 %7091, %v9208_v38   ;;  %v6039_v59 = vld [vmem:[%s10293_s2 + $0xf0] sm:$0xff] }
 0xb53   : > { %6534 = vmatprep.mubr.msk.f32.mxu0 %vm406_vm1, %v6059_v37  ;;  %6520 = vmatprep.mubr.msk.f32.mxu1 %vm406_vm1, %v6039_v59 }
 0xb56   : > { %6535 = vmatmul.mubr.msk.f32.gmra.mrb[18].mxu0 %vm406_vm1, %v6060_v20  ;;  %4196 = vperm.xlu1 %7091, %v9228_v58  }
 0xb57   : > { %6545 = vmatprep.mubr.msk.f32.mxu0 %vm406_vm1, %v6053_v7 }
 0xbbc   : > { %v7082_v52 = vpop.permute.xlu1 %7081 }
 0xbbd   : > { %v7084_v35 = vunpack.i.h.bf16 %v7082_v52  ;;  %v7083_v31 = vunpack.i.l.bf16 %v7082_v52 }
 0xbbf   : > { %v3956_v49 = vsel %vm1278_vm4, %v7073_v40, %v7083_v31  ;;  %v3957_v57 = vsel %vm1278_vm4, %v7074_v42, %v7084_v35  ;;  %v6040_v42 = vld [vmem:[%s10293_s2 + $0xf8] sm:$0xff]  ;;  %v4202_v35 = vpop.permute.xlu0 %4201 }
 0xbc0   : > { %v7087_v45 = vpop.permute.xlu1 %7086  ;;  %v6723_v1 = vpack.c.bf16 %v3957_v57, %v3956_v49  ;;  %6521 = vmatmul.mubr.msk.f32.gmra.mrb[30].mxu1 %vm406_vm1, %v6040_v42 }
 0xbc1   : > { %v7089_v8 = vunpack.i.h.bf16 %v7087_v45  ;;  %v7088_v43 = vunpack.i.l.bf16 %v7087_v45 }
 0xbc2   : > { %6724 = vmatprep.subr.bf16.mxu0 %v6723_v1 }
 0xbc3   : > { %6726 = vmatpush3.bf16.msra.mxu0 %v6723_v1  ;;  %v3958_v14 = vsel %vm1278_vm4, %v7078_v47, %v7088_v43  ;;  %v3959_v23 = vsel %vm1278_vm4, %v7079_v0, %v7089_v8 }
 0xbc4   : > { %v6727_v2 = vpack.c.bf16 %v3959_v23, %v3958_v14 }
 0xbc6   : > { %6728 = vmatprep.subr.bf16.mxu0 %v6727_v2 }
 0xbc7   : > { %6730 = vmatpush3.bf16.msra.mxu0 %v6727_v2 }
 0xbca   : > { %6546 = vmatmul.mubr.msk.f32.vlgmr.msra.gmra.mrb[16].mxu0 %vm406_vm1, %v6054_v13 }
 0xbcb   : > { %6548 = vmatprep.mubr.msk.f32.mxu0 %vm406_vm1, %v6055_v29 }
 0xbce   : > { %6549 = vmatmul.mubr.msk.f32.gmra.mrb[18].mxu0 %vm406_vm1, %v6056_v3 }
 0xbd1   : > { %v4192_v39 = vpop.permute.xlu1 %4191 }
 0xbd5   : > { %v4197_v13 = vpop.permute.xlu1 %4196 }
 0xc9d   : > { %v6547_v37 = vpop.f32.mrb[16].mxu0 }
 0xc9e   : > { %v4205_v20 = vadd.f32 %v6547_v37, %v4192_v39  ;;  %v4161_v7 = vpop.f32.mrb[17].mxu0 }
 0xc9f   : > { %v4204_v61 = vadd.f32 %v4187_v34, %v4161_v7 }
 0xca0   : > { %v9270_v40 = vsel %vm1240_vm5, %v4205_v20, 0.0 }
 0xca1   : > { %v10322_v52 = vand.u32 2147483647, %v9270_v40  ;;  %v4319_v5 = vand.u32 2139095040, %v9270_v40  ;;  %v9276_v31 = vsel %vm1240_vm5, %v4204_v61, 0.0  ;;  %v6550_v0 = vpop.f32.mrb[18].mxu0 }
 0xca2   : > { %v10321_v47 = vand.u32 2147483647, %v9276_v31  ;;  %v4215_v49 = vand.u32 2139095040, %v9276_v31  ;;  %v4207_v57 = vadd.f32 %v6550_v0, %v4202_v35  ;;  %v4171_v45 = vpop.f32.mrb[19].mxu0 }
 0xca3   : > { %v4320_v1 = vshrl.u32 %v4319_v5, 23  ;;  %v4323_v8 = vand.u32 8388607, %v10322_v52  ;;  %v4206_v30 = vadd.f32 %v4197_v13, %v4171_v45 }
 0xca4   : > { %v4216_v43 = vshrl.u32 %v4215_v49, 23  ;;  %v4219_v14 = vand.u32 8388607, %v10321_v47  ;;  %v9287_v23 = vsel %vm1240_vm5, %v4207_v57, 0.0 }
 0xca5   : > { %v6073_v2 = vadd.s32 4294967169, %v4320_v1  ;;  %v4527_v3 = vand.u32 2139095040, %v9287_v23  ;;  %v4324_v34 = vor.u32 8388608, %v4323_v8  ;;  %v10320_v37 = vand.u32 2147483647, %v9287_v23 }
 0xca6   : > { %v6069_v29 = vadd.s32 4294967169, %v4216_v43  ;;  %v4220_v59 = vor.u32 8388608, %v4219_v14  ;;  %v9293_v0 = vsel %vm1240_vm5, %v4206_v30, 0.0 }
 0xca7   : > { %v4326_v26 = vadd.s32 1, %v6073_v2  ;;  %v4528_v20 = vshrl.u32 %v4527_v3, 23  ;;  %v9295_v49 = vshll.u32 %v4324_v34, 8  ;;  %v9303_v1 = vand.u32 8388607, %v10320_v37 }
 0xca8   : > { %v4222_v39 = vadd.s32 1, %v6069_v29  ;;  %v9299_v45 = vshll.u32 %v4220_v59, 8 }
 0xca9   : > { %vm4327_vm4 = vcmp.gt.s32.totalorder %v4326_v26, 0  ;;  %v6081_v61 = vadd.s32 4294967169, %v4528_v20 }
 0xcaa   : > { %v4328_v7 = vsel %vm4327_vm4, %v4326_v26, 0  ;;  %vm4223_vm0 = vcmp.gt.s32.totalorder %v4222_v39, 0  ;;  %vm4318_vm4 = vcmp.lt.s32.totalorder %v9270_v40, 0 }
 0xcab   : > { %v4329_v42 = vshrl.u32 %v4328_v7, 5  ;;  %v4330_v5 = vand.u32 31, %v4328_v7  ;;  %v4224_v35 = vsel %vm4223_vm0, %v4222_v39, 0  ;;  %v9306_v2 = vadd.s32 1, %v6081_v61  ;;  %v6085_v39 = vld [vmem:[%s10293_s2 + $0x100] sm:$0xff] }
 0xcac   : > { %v9297_v57 = vshrl.u32 %v4224_v35, 5  ;;  %v4226_v14 = vand.u32 31, %v4224_v35  ;;  %6559 = vmatprep.mubr.msk.f32.mxu1 %vm406_vm1, %v6085_v39 }
 0xcad   : > { %v4331_v8 = vsub.s32 32, %v4330_v5  ;;  %v4333_v43 = vshll.u32 %v10369_v50, %v4330_v5  ;;  %v4336_v13 = vshll.u32 %v10370_v16, %v4330_v5  ;;  %v4339_v29 = vshll.u32 %v10371_v62, %v4330_v5 }
 0xcae   : > { %v4342_v3 = vshll.u32 %v10372_v25, %v4330_v5  ;;  %v4345_v34 = vshll.u32 %v10353_v44, %v4330_v5  ;;  %vm4348_vm5 = vcmp.lt.s32.totalorder %v4329_v42, 1  ;;  %vm4349_vm11 = vcmp.lt.s32.totalorder %v4329_v42, 2 }
 0xcaf   : > { %v4334_v26 = vshrl.u32 %v10370_v16, %v4331_v8  ;;  %v4337_v30 = vshrl.u32 %v10371_v62, %v4331_v8  ;;  %v4340_v59 = vshrl.u32 %v10372_v25, %v4331_v8  ;;  %v4332_v20 = vshrl.u32 %v10369_v50, %v4331_v8 }
 0xcb0   : > { %v4343_v7 = vshrl.u32 %v10353_v44, %v4331_v8  ;;  %v4346_v61 = vshrl.u32 %v10354_v56, %v4331_v8  ;;  %v4227_v47 = vsub.s32 32, %v4226_v14  ;;  %vm4350_vm12 = vcmp.lt.s32.totalorder %v4329_v42, 3 }
 0xcb1   : > { %v4335_v5 = vor.u32 %v4334_v26, %v4333_v43  ;;  %v4338_v35 = vor.u32 %v4337_v30, %v4336_v13  ;;  %v4341_v37 = vor.u32 %v4340_v59, %v4339_v29  ;;  %vm4351_vm2 = vcmp.lt.s32.totalorder %v4329_v42, 4 }
 0xcb2   : > { %v4344_v52 = vor.u32 %v4343_v7, %v4342_v3  ;;  %v4347_v53 = vor.u32 %v4346_v61, %v4345_v34  ;;  %v4229_v39 = vshll.u32 %v10369_v50, %v4226_v14  ;;  %v4230_v29 = vshrl.u32 %v10370_v16, %v4227_v47 }
 0xcb3   : > { %v4352_v17 = vsel %vm4348_vm5, %v4332_v20, %v4335_v5  ;;  %v4353_v41 = vsel %vm4351_vm2, %v4341_v37, 2102212464  ;;  %v4356_v4 = vsel %vm4348_vm5, %v4335_v5, %v4338_v35  ;;  %v4360_v54 = vsel %vm4348_vm5, %v4338_v35, %v4341_v37 }
 0xcb4   : > { %v4354_v51 = vsel %vm4350_vm12, %v4338_v35, %v4353_v41  ;;  %v4357_v8 = vsel %vm4351_vm2, %v4344_v52, 920167782  ;;  %v4361_v28 = vsel %vm4351_vm2, %v4347_v53, 1326507024  ;;  %v4232_v3 = vshll.u32 %v10370_v16, %v4226_v14 }
 0xcb5   : > { %v4358_v43 = vsel %vm4350_vm12, %v4341_v37, %v4357_v8  ;;  %v4362_v13 = vsel %vm4350_vm12, %v4344_v52, %v4361_v28  ;;  %v4355_v34 = vsel %vm4349_vm11, %v4352_v17, %v4354_v51  ;;  %v4233_v59 = vshrl.u32 %v10371_v62, %v4227_v47 }
 0xcb6   : > { %v4359_v26 = vsel %vm4349_vm11, %v4356_v4, %v4358_v43  ;;  %v4363_v30 = vsel %vm4349_vm11, %v4360_v54, %v4362_v13  ;;  %v4231_v28 = vor.u32 %v4230_v29, %v4229_v39  ;;  %v4235_v7 = vshll.u32 %v10371_v62, %v4226_v14 }
 0xcb7   : > { %v9333_v41 = vmul.u32.u64.low %v9295_v49, %v4363_v30  ;;  %v9334_v20 = vmul.u32.u64.high %v9295_v49, %v4363_v30, %v9333_v41  ;;  %v9337_v53 = vmul.u32.u64.low %v9295_v49, %v4359_v26  ;;  %v9338_v37 = vmul.u32.u64.high %v9295_v49, %v4359_v26, %v9337_v53 }
 0xcb8   : > { %v4234_v52 = vor.u32 %v4233_v59, %v4232_v3  ;;  %v4236_v51 = vshrl.u32 %v10372_v25, %v4227_v47  ;;  %v4228_v4 = vshrl.u32 %v10369_v50, %v4227_v47  ;;  %v4238_v54 = vshll.u32 %v10372_v25, %v4226_v14 }
 0xcb9   : > { %v4239_v17 = vshrl.u32 %v10353_v44, %v4227_v47  ;;  %v4242_v42 = vshrl.u32 %v10354_v56, %v4227_v47  ;;  %v4371_v61 = vmul.u32 %v9295_v49, %v4355_v34  ;;  %v4241_v35 = vshll.u32 %v10353_v44, %v4226_v14 }
 0xcba   : > { %v4237_v5 = vor.u32 %v4236_v51, %v4235_v7  ;;  %vm4244_vm8 = vcmp.lt.s32.totalorder %v9297_v57, 1  ;;  %vm4373_vm14 = vc.u32 %v9334_v20, %v9337_v53  ;;  %v4374_v8 = vadd.s32 1, %v9338_v37 }
 0xcbb   : > { %v4240_v39 = vor.u32 %v4239_v17, %v4238_v54  ;;  %vm4245_vm3 = vcmp.lt.s32.totalorder %v9297_v57, 2  ;;  %v4243_v43 = vor.u32 %v4242_v42, %v4241_v35  ;;  %vm4246_vm6 = vcmp.lt.s32.totalorder %v9297_v57, 3 }
 0xcbc   : > { %vm4247_vm7 = vcmp.lt.s32.totalorder %v9297_v57, 4  ;;  %v4252_v47 = vsel %vm4244_vm8, %v4231_v28, %v4234_v52  ;;  %v4375_v49 = vsel %vm4373_vm14, %v4374_v8, %v9338_v37  ;;  %v4256_v14 = vsel %vm4244_vm8, %v4234_v52, %v4237_v5 }
 0xcbd   : > { %v4249_v13 = vsel %vm4247_vm7, %v4237_v5, 2102212464  ;;  %v4253_v29 = vsel %vm4247_vm7, %v4240_v39, 920167782  ;;  %v4376_v3 = vadd.s32 %v4375_v49, %v4371_v61  ;;  %v4248_v34 = vsel %vm4244_vm8, %v4228_v4, %v4231_v28 }
 0xcbe   : > { %v4254_v26 = vsel %vm4246_vm6, %v4237_v5, %v4253_v29  ;;  %v4257_v30 = vsel %vm4247_vm7, %v4243_v43, 1326507024  ;;  %v4250_v59 = vsel %vm4246_vm6, %v4234_v52, %v4249_v13  ;;  %vm4535_vm10 = vcmp.gt.s32.totalorder %v9306_v2, 0 }
 0xcbf   : > { %v4255_v41 = vsel %vm4245_vm3, %v4252_v47, %v4254_v26  ;;  %v4258_v7 = vsel %vm4246_vm6, %v4240_v39, %v4257_v30  ;;  %v4377_v51 = vadd.s32 536870912, %v4376_v3  ;;  %v4536_v52 = vsel %vm4535_vm10, %v9306_v2, 0 }
 0xcc0   : > { %v4259_v54 = vsel %vm4245_vm3, %v4256_v14, %v4258_v7  ;;  %v9361_v37 = vmul.u32.u64.low %v9299_v45, %v4255_v41  ;;  %v9362_v17 = vmul.u32.u64.high %v9299_v45, %v4255_v41, %v9361_v37  ;;  %v4251_v61 = vsel %vm4245_vm3, %v4248_v34, %v4250_v59 }
 0xcc1   : > { %v9366_v28 = vmul.u32.u64.low %v9299_v45, %v4259_v54  ;;  %v9367_v4 = vmul.u32.u64.high %v9299_v45, %v4259_v54, %v9366_v28  ;;  %v4378_v42 = vshrl.u32 %v4377_v51, 30  ;;  %v4532_v5 = vor.u32 8388608, %v9303_v1 }
 0xcc2   : > { %v4538_v35 = vand.u32 31, %v4536_v52  ;;  %v4423_v8 = vand.u32 2139095040, %v9293_v0  ;;  %v4270_v43 = vadd.s32 1, %v9362_v17  ;;  %v4267_v49 = vmul.u32 %v9299_v45, %v4251_v61 }
 0xcc3   : > { %v4379_v39 = vshll.u32 %v4378_v42, 30  ;;  %vm4269_vm9 = vc.u32 %v9367_v4, %v9361_v37  ;;  %v9381_v57 = vshll.u32 %v4532_v5, 8  ;;  %v4372_v45 = vadd.s32 %v9337_v53, %v9334_v20 }
 0xcc4   : > { %v4539_v47 = vsub.s32 32, %v4538_v35  ;;  %v4271_v2 = vsel %vm4269_vm9, %v4270_v43, %v9362_v17  ;;  %v4424_v26 = vshrl.u32 %v4423_v8, 23  ;;  %v4537_v7 = vshrl.u32 %v4536_v52, 5 }
 0xcc5   : > { %v9378_v13 = vsub.s32 %v4376_v3, %v4379_v39  ;;  %v4272_v29 = vadd.s32 %v4271_v2, %v4267_v49  ;;  %v4547_v3 = vshll.u32 %v10371_v62, %v4538_v35  ;;  %v4541_v51 = vshll.u32 %v10369_v50, %v4538_v35 }
 0xcc6   : > { %v4542_v14 = vshrl.u32 %v10370_v16, %v4539_v47  ;;  %v4545_v34 = vshrl.u32 %v10371_v62, %v4539_v47  ;;  %v4548_v59 = vshrl.u32 %v10372_v25, %v4539_v47  ;;  %v4544_v54 = vshll.u32 %v10370_v16, %v4538_v35 }
 0xcc7   : > { %v4382_v30 = vsub.s32 0, %v9378_v13  ;;  %v4273_v41 = vadd.s32 536870912, %v4272_v29  ;;  %v4550_v61 = vshll.u32 %v10372_v25, %v4538_v35  ;;  %v4551_v5 = vshrl.u32 %v10353_v44, %v4539_v47 }
 0xcc8   : > { %v4549_v28 = vor.u32 %v4548_v59, %v4547_v3  ;;  %v4543_v53 = vor.u32 %v4542_v14, %v4541_v51  ;;  %v4546_v8 = vor.u32 %v4545_v34, %v4544_v54  ;;  %v4554_v39 = vshrl.u32 %v10354_v56, %v4539_v47 }
 0xcc9   : > { %v6074_v17 = vmin.u32 %v4382_v30, %v9378_v13  ;;  %v4274_v20 = vshrl.u32 %v4273_v41, 30  ;;  %v4402_v49 = vsub.s32 4, %v4378_v42  ;;  %v4552_v2 = vor.u32 %v4551_v5, %v4550_v61 }
 0xcca   : > { %v6077_v52 = vadd.s32 4294967169, %v4424_v26  ;;  %v4540_v19 = vshrl.u32 %v10369_v50, %v4539_v47  ;;  %v4553_v60 = vshll.u32 %v10353_v44, %v4538_v35  ;;  %vm4559_vm0 = vcmp.lt.s32.totalorder %v4537_v7, 4 }
 0xccb   : > { %v4384_v43 = vclz %v6074_v17  ;;  %v4275_v1 = vshll.u32 %v4274_v20, 30  ;;  %vm4556_vm5 = vcmp.lt.s32.totalorder %v4537_v7, 1  ;;  %vm4558_vm11 = vcmp.lt.s32.totalorder %v4537_v7, 3 }
 0xccc   : > { %v4561_v3 = vsel %vm4559_vm0, %v4549_v28, 2102212464  ;;  %v10383_v14 = vand.u32 2147483647, %v9270_v40  ;;  %vm4214_vm2 = vcmp.lt.s32.totalorder %v9276_v31, 0  ;;  %v4555_v59 = vor.u32 %v4554_v39, %v4553_v60 }
 0xccd   : > { %v6075_v30 = vadd.s32 4294967294, %v4384_v43  ;;  %v9407_v26 = vsub.s32 %v4272_v29, %v4275_v1  ;;  %v4564_v47 = vsel %vm4556_vm5, %v4543_v53, %v4546_v8  ;;  %v4565_v35 = vsel %vm4559_vm0, %v4552_v2, 920167782 }
 0xcce   : > { %vm9402_vm12 = vcmp.le.f32.partialorder %v10383_v14, 0.7853982  ;;  %v4560_v41 = vsel %vm4556_vm5, %v4540_v19, %v4543_v53  ;;  %v4562_v51 = vsel %vm4558_vm11, %v4546_v8, %v4561_v3  ;;  %v4566_v54 = vsel %vm4558_vm11, %v4549_v28, %v4565_v35 }
 0xccf   : > { %vm6076_vm8 = vcmp.lt.s32.totalorder %v6075_v30, 0  ;;  %v4403_v61 = vsel %vm4318_vm4, %v4402_v49, %v4378_v42  ;;  %v4278_v5 = vsub.s32 0, %v9407_v26  ;;  %vm4557_vm14 = vcmp.lt.s32.totalorder %v4537_v7, 2 }
 0xcd0   : > { %v4387_v17 = vsel %vm6076_vm8, 0, %v6075_v30  ;;  %v4567_v29 = vsel %vm4557_vm14, %v4564_v47, %v4566_v54  ;;  %v4568_v39 = vsel %vm4556_vm5, %v4546_v8, %v4549_v28  ;;  %v4298_v14 = vsub.s32 4, %v4274_v20 }
 0xcd1   : > { %v4388_v1 = vsub.s32 32, %v4387_v17  ;;  %v4392_v60 = vsub.s32 4294967266, %v4387_v17  ;;  %v6070_v43 = vmin.u32 %v4278_v5, %v9407_v26  ;;  %v4563_v19 = vsel %vm4557_vm14, %v4560_v41, %v4562_v51 }
 0xcd2   : > { %v4569_v53 = vsel %vm4559_vm0, %v4555_v59, 1326507024  ;;  %v4389_v3 = vshll.u32 %v9378_v13, %v4387_v17  ;;  %v9423_v21 = vmul.u32.u64.low %v9381_v57, %v4567_v29  ;;  %v9424_v33 = vmul.u32.u64.high %v9381_v57, %v4567_v29, %v9423_v21 }
 0xcd3   : > { %v4390_v30 = vshrl.u32 %v4372_v45, %v4388_v1  ;;  %v4393_v35 = vadd.s32 127, %v4392_v60  ;;  %v4570_v42 = vsel %vm4558_vm11, %v4552_v2, %v4569_v53  ;;  %v4280_v49 = vclz %v6070_v43 }
 0xcd4   : > { %v4571_v27 = vsel %vm4557_vm14, %v4568_v39, %v4570_v42  ;;  %v10386_v59 = vand.u32 2147483647, %v9276_v31  ;;  %v10389_v7 = vand.u32 2147483647, %v9293_v0  ;;  %v4430_v51 = vadd.s32 1, %v6077_v52 }
 0xcd5   : > { %v4391_v28 = vor.u32 %v4390_v30, %v4389_v3  ;;  %v4394_v8 = vshll.u32 %v4393_v35, 23  ;;  %v9428_v47 = vmul.u32.u64.low %v9381_v57, %v4571_v27  ;;  %v9429_v41 = vmul.u32.u64.high %v9381_v57, %v4571_v27, %v9428_v47 }
 0xcd6   : > { %vm9433_vm3 = vcmp.le.f32.partialorder %v10386_v59, 0.7853982  ;;  %v6071_v45 = vadd.s32 4294967294, %v4280_v49  ;;  %v4427_v2 = vand.u32 8388607, %v10389_v7  ;;  %v4405_v17 = vsel %vm9402_vm12, 0, %v4403_v61 }
 0xcd7   : > { %v4395_v54 = vor.u32 4788187, %v4394_v8  ;;  %v4268_v5 = vadd.s32 %v9361_v37, %v9367_v4  ;;  %v4299_v27 = vsel %vm4214_vm2, %v4298_v14, %v4274_v20  ;;  %v4579_v1 = vmul.u32 %v9381_v57, %v4563_v19 }
 0xcd8   : > { %vm6072_vm6 = vcmp.lt.s32.totalorder %v6071_v45, 0  ;;  %v4582_v60 = vadd.s32 1, %v9424_v33  ;;  %vm4431_vm7 = vcmp.gt.s32.totalorder %v4430_v51, 0  ;;  %v4398_v39 = vcvt.s32.f32 %v4391_v28 }
 0xcd9   : > { %v4396_v29 = vand.u32 2147483647, %v4395_v54  ;;  %v4283_v43 = vsel %vm6072_vm6, 0, %v6071_v45  ;;  %vm4581_vm10 = vc.u32 %v9429_v41, %v9423_v21  ;;  %v4409_v52 = vadd.s32 3, %v4405_v17 }
 0xcda   : > { %v4284_v61 = vsub.s32 32, %v4283_v43  ;;  %v4288_v53 = vsub.s32 4294967266, %v4283_v43  ;;  %v4583_v37 = vsel %vm4581_vm10, %v4582_v60, %v9424_v33  ;;  %v4301_v20 = vsel %vm9433_vm3, 0, %v4299_v27 }
 0xcdb   : > { %v4399_v4 = vmul.f32 %v4398_v39, %v4396_v29  ;;  %v4584_v14 = vadd.s32 %v4583_v37, %v4579_v1  ;;  %v4432_v57 = vsel %vm4431_vm7, %v4430_v51, 0  ;;  %v4285_v19 = vshll.u32 %v9407_v26, %v4283_v43 }
 0xcdc   : > { %v4286_v3 = vshrl.u32 %v4268_v5, %v4284_v61  ;;  %v4289_v30 = vadd.s32 127, %v4288_v53  ;;  %v4434_v35 = vand.u32 31, %v4432_v57  ;;  %v9455_v33 = vand.u32 3, %v4409_v52 }
 0xcdd   : > { %v4400_v42 = vxor.u32 2147483648, %v4399_v4  ;;  %v4585_v49 = vadd.s32 536870912, %v4584_v14  ;;  %v9457_v45 = vadd.s32 3, %v4301_v20  ;;  %v4428_v54 = vor.u32 8388608, %v4427_v2 }
 0xcde   : > { %v4287_v28 = vor.u32 %v4286_v3, %v4285_v19  ;;  %v4290_v8 = vshll.u32 %v4289_v30, 23  ;;  %v4435_v47 = vsub.s32 32, %v4434_v35  ;;  %v4437_v17 = vshll.u32 %v10369_v50, %v4434_v35 }
 0xcdf   : > { %v4401_v59 = vsel %vm4318_vm4, %v4400_v42, %v4399_v4  ;;  %v9459_v7 = vshrl.u32 %v4585_v49, 30  ;;  %v4433_v34 = vshrl.u32 %v4432_v57, 5  ;;  %v4440_v52 = vshll.u32 %v10370_v16, %v4434_v35 }
 0xce0   : > { %v4404_v26 = vsel %vm9402_vm12, %v9270_v40, %v4401_v59  ;;  %v4291_v51 = vor.u32 4788187, %v4290_v8  ;;  %v4294_v5 = vcvt.s32.f32 %v4287_v28  ;;  %v4438_v1 = vshrl.u32 %v10370_v16, %v4435_v47 }
 0xce1   : > { %7174 = vcosq.f32 %v4404_v26  ;;  %v4587_v27 = vshll.u32 %v9459_v7, 30  ;;  %v4441_v29 = vshrl.u32 %v10371_v62, %v4435_v47  ;;  %v4444_v39 = vshrl.u32 %v10372_v25, %v4435_v47 }
 0xce2   : > { %7176 = vsinq.f32 %v4404_v26  ;;  %v4292_v60 = vand.u32 2147483647, %v4291_v51  ;;  %v4443_v2 = vshll.u32 %v10371_v62, %v4434_v35  ;;  %v4439_v53 = vor.u32 %v4438_v1, %v4437_v17 }
 0xce3   : > { %v9469_v43 = vsub.s32 %v4584_v14, %v4587_v27  ;;  %v4446_v37 = vshll.u32 %v10372_v25, %v4434_v35  ;;  %v9474_v4 = vshll.u32 %v4428_v54, 8  ;;  %v4442_v19 = vor.u32 %v4441_v29, %v4440_v52 }
 0xce4   : > { %v4295_v61 = vmul.f32 %v4294_v5, %v4292_v60  ;;  %v4445_v3 = vor.u32 %v4444_v39, %v4443_v2  ;;  %v4447_v30 = vshrl.u32 %v10353_v44, %v4435_v47  ;;  %v4449_v14 = vshll.u32 %v10353_v44, %v4434_v35 }
 0xce5   : > { %v4590_v20 = vsub.s32 0, %v9469_v43  ;;  %v4450_v57 = vshrl.u32 %v10354_v56, %v4435_v47  ;;  %vm4415_vm9 = vcmp.eq.s32.totalorder %v9455_v33, 2  ;;  %v4436_v28 = vshrl.u32 %v10369_v50, %v4435_v47 }
 0xce6   : > { %v4296_v42 = vxor.u32 2147483648, %v4295_v61  ;;  %v4448_v8 = vor.u32 %v4447_v30, %v4446_v37  ;;  %vm4452_vm4 = vcmp.lt.s32.totalorder %v4433_v34, 1  ;;  %vm4453_vm0 = vcmp.lt.s32.totalorder %v4433_v34, 2 }
 0xce7   : > { %v6082_v49 = vmin.u32 %v4590_v20, %v9469_v43  ;;  %v4451_v26 = vor.u32 %v4450_v57, %v4449_v14  ;;  %vm4455_vm5 = vcmp.lt.s32.totalorder %v4433_v34, 4  ;;  %v4460_v17 = vsel %vm4452_vm4, %v4439_v53, %v4442_v19 }
 0xce8   : > { %v4297_v59 = vsel %vm4214_vm2, %v4296_v42, %v4295_v61  ;;  %v4457_v54 = vsel %vm4455_vm5, %v4445_v3, 2102212464  ;;  %vm4454_vm11 = vcmp.lt.s32.totalorder %v4433_v34, 3  ;;  %v4456_v47 = vsel %vm4452_vm4, %v4436_v28, %v4439_v53 }
 0xce9   : > { %v4300_v35 = vsel %vm9433_vm3, %v9276_v31, %v4297_v59  ;;  %v4592_v51 = vclz %v6082_v49  ;;  %v4461_v5 = vsel %vm4455_vm5, %v4448_v8, 920167782  ;;  %v4464_v29 = vsel %vm4452_vm4, %v4442_v19, %v4445_v3 }
 0xcea   : > { %7178 = vcosq.f32 %v4300_v35  ;;  %v4462_v60 = vsel %vm4454_vm11, %v4445_v3, %v4461_v5  ;;  %v4458_v13 = vsel %vm4454_vm11, %v4442_v19, %v4457_v54  ;;  %v4465_v2 = vsel %vm4455_vm5, %v4451_v26, 1326507024 }
 0xceb   : > { %v7175_v27 = vpop.eup %7174  ;;  %7180 = vsinq.f32 %v4300_v35  ;;  %v6083_v1 = vadd.s32 4294967294, %v4592_v51  ;;  %v4463_v52 = vsel %vm4453_vm0, %v4460_v17, %v4462_v60  ;;  %v4466_v37 = vsel %vm4454_vm11, %v4448_v8, %v4465_v2 }
 0xcec   : > { %v7177_v39 = vpop.eup %7176  ;;  %v4416_v61 = vxor.u32 2147483648, %v7175_v27  ;;  %v9496_v20 = vmul.u32.u64.low %v9474_v4, %v4463_v52  ;;  %v9497_v53 = vmul.u32.u64.high %v9474_v4, %v4463_v52, %v9496_v20  ;;  %v4467_v42 = vsel %vm4453_vm0, %v4464_v29, %v4466_v37 }
 0xced   : > { %vm6084_vm12 = vcmp.lt.s32.totalorder %v6083_v1, 0  ;;  %v4413_v14 = vxor.u32 2147483648, %v7177_v39  ;;  %vm4408_vm2 = vweird.f32 %v9270_v40  ;;  %vm4412_vm8 = vcmp.eq.s32.totalorder %v9455_v33, 0 }
 0xcee   : > { %v4595_v30 = vsel %vm6084_vm12, 0, %v6083_v1  ;;  %v4417_v3 = vsel %vm4415_vm9, %v4416_v61, %v7177_v39  ;;  %v9506_v57 = vmul.u32.u64.low %v9474_v4, %v4467_v42  ;;  %v9507_v49 = vmul.u32.u64.high %v9474_v4, %v4467_v42, %v9506_v57 }
 0xcef   : > { %v4600_v19 = vsub.s32 4294967266, %v4595_v30  ;;  %vm4411_vm14 = vcmp.lt.s32.totalorder %v9455_v33, 2  ;;  %v4414_v28 = vsel %vm4412_vm8, %v7175_v27, %v4413_v14  ;;  %v4306_v8 = vand.u32 3, %v9457_v45 }
 0xcf0   : > { %v4459_v59 = vsel %vm4453_vm0, %v4456_v47, %v4458_v13  ;;  %v4478_v26 = vadd.s32 1, %v9497_v53  ;;  %v4418_v35 = vsel %vm4411_vm14, %v4414_v28, %v4417_v3  ;;  %v7383_v17 = vmov 13  }
 0xcf1   : > { %v4601_v51 = vadd.s32 127, %v4600_v19  ;;  %v4419_v54 = vsel %vm4408_vm2, nan, %v4418_v35  ;;  %7092 = vset.pattern.permute.xlu1 %v7383_v17  ;;  %7093 = vset.pattern.permute.xlu0 %v7383_v17  ;;  %v4596_v5 = vsub.s32 32, %v4595_v30  ;;  %v4475_v1 = vmul.u32 %v9474_v4, %v4459_v59 }
 0xcf2   : > { %vm4477_vm3 = vc.u32 %v9507_v49, %v9496_v20  ;;  %4767 = vperm.xlu1 %7092, %v9200_v9   ;;  %4771 = vperm.xlu0 %7093, %v9208_v38   ;;  %vm4311_vm6 = vcmp.eq.s32.totalorder %v4306_v8, 2  ;;  %v4580_v47 = vadd.s32 %v9423_v21, %v9429_v41  ;;  %vm4308_vm7 = vcmp.eq.s32.totalorder %v4306_v8, 0 }
 0xcf3   : > { %v4479_v45 = vsel %vm4477_vm3, %v4478_v26, %v9497_v53  ;;  %v4602_v27 = vshll.u32 %v4601_v51, 23  ;;  %vm4307_vm10 = vcmp.lt.s32.totalorder %v4306_v8, 2  ;;  %vm4304_vm9 = vweird.f32 %v9276_v31  ;;  %v6087_v51 = vld [vmem:[%s10293_s2 + $0x110] sm:$0xff] }
 0xcf4   : > { %v7179_v40 = vpop.eup %7178  ;;  %v4480_v60 = vadd.s32 %v4479_v45, %v4475_v1  ;;  %v4598_v39 = vshrl.u32 %v4580_v47, %v4596_v5  ;;  %v4597_v38 = vshll.u32 %v9469_v43, %v4595_v30  ;;  %vm4526_vm0 = vcmp.lt.s32.totalorder %v9287_v23, 0 }
 0xcf5   : > { %v7181_v33 = vpop.eup %7180  ;;  %v4312_v34 = vxor.u32 2147483648, %v7179_v40  ;;  %v4603_v2 = vor.u32 4788187, %v4602_v27  ;;  %v10390_v35 = vand.u32 2147483647, %v9287_v23  ;;  %v4610_v45 = vsub.s32 4, %v9459_v7 }
 0xcf6   : > { %v4309_v29 = vxor.u32 2147483648, %v7181_v33  ;;  %v4481_v13 = vadd.s32 536870912, %v4480_v60  ;;  %4775 = vperm.xlu1 %7092, %v9228_v58   ;;  %v4599_v41 = vor.u32 %v4598_v39, %v4597_v38  ;;  %vm4422_vm11 = vcmp.lt.s32.totalorder %v9293_v0, 0 }
 0xcf7   : > { %v4313_v4 = vsel %vm4311_vm6, %v4312_v34, %v7181_v33  ;;  %v4604_v42 = vand.u32 2147483647, %v4603_v2  ;;  %vm9532_vm5 = vcmp.le.f32.partialorder %v10390_v35, 0.7853982  ;;  %v4611_v47 = vsel %vm4526_vm0, %v4610_v45, %v9459_v7  ;;  %v6086_v35 = vld [vmem:[%s10293_s2 + $0x108] sm:$0xff] }
 0xcf8   : > { %v4310_v52 = vsel %vm4308_vm7, %v7179_v40, %v4309_v29  ;;  %v4482_v61 = vshrl.u32 %v4481_v13, 30  ;;  %v4606_v3 = vcvt.s32.f32 %v4599_v41  ;;  %v4613_v29 = vsel %vm9532_vm5, 0, %v4611_v47 }
 0xcf9   : > { %v4314_v9 = vsel %vm4307_vm10, %v4310_v52, %v4313_v4  ;;  %v10393_v39 = vand.u32 2147483647, %v9293_v0  ;;  %vm4616_vm7 = vweird.f32 %v9287_v23 }
 0xcfa   : > { %v4315_v37 = vsel %vm4304_vm9, nan, %v4314_v9  ;;  %v4483_v53 = vshll.u32 %v4482_v61, 30  ;;  %4779 = vperm.xlu1 %7092, %v9217_v36   ;;  %v4607_v58 = vmul.f32 %v4606_v3, %v4604_v42  ;;  %v4476_v36 = vadd.s32 %v9496_v20, %v9507_v49 }
 0xcfb   : > { %v6731_v21 = vpack.c.bf16 %v4419_v54, %v4315_v37  ;;  %vm4421_vm12 = vcmp.le.f32.partialorder %v10393_v39, 0.7853982  ;;  %v4617_v9 = vadd.s32 3, %v4613_v29  ;;  %vm4512_vm9 = vweird.f32 %v9293_v0 }
 0xcfc   : > { %v4484_v14 = vsub.s32 %v4480_v60, %v4483_v53  ;;  %v4608_v28 = vxor.u32 2147483648, %v4607_v58  ;;  %v4506_v60 = vsub.s32 4, %v4482_v61 }
 0xcfd   : > { %6732 = vmatprep.subr.bf16.mxu1 %v6731_v21 }
 0xcfe   : > { %6734 = vmatpush3.bf16.msra.mxu1 %v6731_v21  ;;  %v4486_v19 = vsub.s32 0, %v4484_v14  ;;  %v4609_v30 = vsel %vm4526_vm0, %v4608_v28, %v4607_v58  ;;  %v4507_v52 = vsel %vm4422_vm11, %v4506_v60, %v4482_v61  ;;  %v4618_v21 = vand.u32 3, %v4617_v9 }
 0xcff   : > { %v4612_v5 = vsel %vm9532_vm5, %v9287_v23, %v4609_v30  ;;  %v4509_v7 = vsel %vm4421_vm12, 0, %v4507_v52  ;;  %v6088_v23 = vld [vmem:[%s10293_s2 + $0x118] sm:$0xff] }
 0xd00   : > { %v6078_v57 = vmin.u32 %v4486_v19, %v4484_v14  ;;  %7182 = vcosq.f32 %v4612_v5  ;;  %v4513_v41 = vadd.s32 3, %v4509_v7  ;;  %vm4620_vm2 = vcmp.eq.s32.totalorder %v4618_v21, 0 }
 0xd01   : > { %7184 = vsinq.f32 %v4612_v5  ;;  %vm4623_vm8 = vcmp.eq.s32.totalorder %v4618_v21, 2  ;;  %vm4619_vm14 = vcmp.lt.s32.totalorder %v4618_v21, 2  ;;  %v7384_v5 = vmov 15  }
 0xd02   : > { %v4488_v31 = vclz %v6078_v57  ;;  %7095 = vset.pattern.permute.xlu1 %v7384_v5  ;;  %7094 = vset.pattern.permute.xlu0 %v7384_v5  ;;  %v7221_v5 = vld [vmem:[%s10294_s3 + $0x18] sm:$0xff] }
 0xd04   : > { %v6079_v8 = vadd.s32 4294967294, %v4488_v31 }
 0xd06   : > { %vm6080_vm4 = vcmp.lt.s32.totalorder %v6079_v8, 0 }
 0xd07   : > { %v4491_v43 = vsel %vm6080_vm4, 0, %v6079_v8 }
 0xd08   : > { %v4492_v59 = vsub.s32 32, %v4491_v43  ;;  %v4496_v26 = vsub.s32 4294967266, %v4491_v43  ;;  %v4493_v54 = vshll.u32 %v4484_v14, %v4491_v43  ;;  %v4514_v14 = vand.u32 3, %v4513_v41 }
 0xd0a   : > { %v4494_v17 = vshrl.u32 %v4476_v36, %v4492_v59  ;;  %v4497_v40 = vadd.s32 127, %v4496_v26  ;;  %v7183_v2 = vpop.eup %7182  ;;  %vm4519_vm3 = vcmp.eq.s32.totalorder %v4514_v14, 2  ;;  %vm4516_vm6 = vcmp.eq.s32.totalorder %v4514_v14, 0 }
 0xd0b   : > { %v7185_v37 = vpop.eup %7184  ;;  %v4624_v42 = vxor.u32 2147483648, %v7183_v2  ;;  %vm4515_vm10 = vcmp.lt.s32.totalorder %v4514_v14, 2  ;;  %v9602_v14 = vld [vmem:[%s10294_s3 + $0x8] sm:$0xff] }
 0xd0c   : > { %v4495_v1 = vor.u32 %v4494_v17, %v4493_v54  ;;  %v4498_v33 = vshll.u32 %v4497_v40, 23  ;;  %v4621_v53 = vxor.u32 2147483648, %v7185_v37 }
 0xd0d   : > { %v4625_v19 = vsel %vm4623_vm8, %v4624_v42, %v7185_v37 }
 0xd0e   : > { %v4499_v20 = vor.u32 4788187, %v4498_v33  ;;  %v4502_v34 = vcvt.s32.f32 %v4495_v1  ;;  %v4622_v3 = vsel %vm4620_vm2, %v7183_v2, %v4621_v53  ;;  %v6109_v33 = vld [vmem:[%s10332_s1 + $0x160] sm:$0xff] }
 0xd0f   : > { %v4626_v31 = vsel %vm4619_vm14, %v4622_v3, %v4625_v19  ;;  %6579 = vmatprep.mubr.msk.f32.mxu0 %vm406_vm1, %v6109_v33  ;;  %v6110_v3 = vld [vmem:[%s10332_s1 + $0x168] sm:$0xff]  ;;  %v9611_v19 = vld [vmem:[%s10294_s3] sm:$0xff] }
 0xd10   : > { %v4500_v49 = vand.u32 2147483647, %v4499_v20  ;;  %v4627_v30 = vsel %vm4616_vm7, nan, %v4626_v31  ;;  %v9631_v31 = vld [vmem:[%s10294_s3 + $0x18] sm:$0xff]  ;;  %v7225_v33 = vld [vmem:[%s10294_s3 + $0x8] sm:$0xff] }
 0xd12   : > { %v4503_v27 = vmul.f32 %v4502_v34, %v4500_v49 }
 0xd14   : > { %v4504_v4 = vxor.u32 2147483648, %v4503_v27 }
 0xd16   : > { %v4505_v13 = vsel %vm4422_vm11, %v4504_v4, %v4503_v27 }
 0xd17   : > { %v4508_v38 = vsel %vm4421_vm12, %v9293_v0, %v4505_v13  ;;  %v9563_v0 = vpop.f32.mrb[28].mxu1 }
 0xd18   : > { %7186 = vcosq.f32 %v4508_v38  ;;  %v9565_v54 = vpop.f32.mrb[29].mxu1 }
 0xd19   : > { %7188 = vsinq.f32 %v4508_v38  ;;  %v9567_v17 = vpop.f32.mrb[30].mxu1 }
 0xd1a   : > { %v9569_v40 = vpop.f32.mrb[31].mxu1 }
 0xd22   : > { %v7187_v58 = vpop.eup %7186 }
 0xd23   : > { %v7189_v61 = vpop.eup %7188  ;;  %v4520_v57 = vxor.u32 2147483648, %v7187_v58 }
 0xd24   : > { %v4517_v28 = vxor.u32 2147483648, %v7189_v61 }
 0xd25   : > { %v4521_v8 = vsel %vm4519_vm3, %v4520_v57, %v7189_v61  ;;  %v9621_v61 = vld [vmem:[%s10294_s3 + $0x10] sm:$0xff]  ;;  %v6112_v57 = vld [vmem:[%s10332_s1 + $0x178] sm:$0xff] }
 0xd26   : > { %v4518_v43 = vsel %vm4516_vm6, %v7187_v58, %v4517_v28  ;;  %v6111_v58 = vld [vmem:[%s10332_s1 + $0x170] sm:$0xff]  ;;  %v6105_v28 = vld [vmem:[%s10332_s1 + $0x140] sm:$0xff] }
 0xd27   : > { %v4522_v36 = vsel %vm4515_vm10, %v4518_v43, %v4521_v8  ;;  %v7214_v8 = vld [vmem:[%s7517_s13] sm:$0xff]  ;;  %v7215_v43 = vld [vmem:[%s7517_s13 + $0x8] sm:$0xff] }
 0xd28   : > { %v4523_v59 = vsel %vm4512_vm9, nan, %v4522_v36  ;;  %v7216_v36 = vld [vmem:[%s7517_s13 + $0x10] sm:$0xff] }
 0xd29   : > { %v6735_v26 = vpack.c.bf16 %v4627_v30, %v4523_v59  ;;  %v7385_v30 = vmov 2   ;;  %v7217_v59 = vld [vmem:[%s7517_s13 + $0x18] sm:$0xff]  ;;  %s5712_s13 = sadd.s32 %s7344_s21, %s6158_s27  ;;  %s6160_s21 = sshll.u32 %s10179_s22, 7 }
 0xd2a   : > { %s6159_s17 = sshll.u32 %s5712_s13, 7  ;;  %s7234_s27 = scalar_lea.vmem %s10176_s26, 512 }
 0xd2b   : > { %6736 = vmatprep.subr.bf16.mxu1 %v6735_v26  ;;  %s10185_s30 = scalar_lea.hbm %s10295_s4, %s6159_s17  ;;  %p7235_p2 = scmp.ne.s32.totalorder %s10176_s26, %s7234_s27 }
 0xd2c   : > { %6738 = vmatpush3.bf16.msra.mxu1 %v6735_v26  ;;  %v7218_v26 = vld [vmem:[%s10294_s3] sm:$0xff]  ;;  %s7392_s13 = smov [#allocation4]  }
 0xd2d   : > { %p7236_p3 = pnand %p7235_p2, %p7487_p8  ;;  %s7238_s0 = sshll.u32 %s7392_s13, 4  ;;  %s7239_s0 = int_to_ptr.vmem [resolvable:$false] %s7238_s0 }
 0xd2e   : > { %s7240_s17 = scalar_lea.vmem %s7239_s0, 1024  ;;  %p7241_p5 = scmp.lt.s32.totalorder %s10176_s26, %s7239_s0 }
 0xd2f   : > { %6560 = vmatmul.mubr.msk.f32.vlgmr.msra.gmra.mrb[32].mxu1 %vm406_vm1, %v6086_v35  ;;  %v7219_v35 = vld [vmem:[%s10294_s3 + $0x8] sm:$0xff]  ;;  %p7237_p4 = pneg %p7236_p3  ;;  %p7242_p6 = scmp.lt.s32.totalorder %s7240_s17, %s7234_s27 }
 0xd30   : > { %6562 = vmatprep.mubr.msk.f32.mxu1 %vm406_vm1, %v6087_v51  ;;  %v7220_v51 = vld [vmem:[%s10294_s3 + $0x10] sm:$0xff] }
 0xd31   : > { %p7243_p7 = por %p7242_p6, %p7241_p5 }
 0xd33   : > { %6563 = vmatmul.mubr.msk.f32.gmra.mrb[34].mxu1 %vm406_vm1, %v6088_v23  ;;  %v7386_v23 = vmov 5   ;;  %p7244_p10 = pnand %p7243_p7, %p7237_p4 }
 0xd71   : > { %v4768_v1 = vpop.permute.xlu1 %4767  ;;  %v4772_v20 = vpop.permute.xlu0 %4771 }
 0xd75   : > { %v4776_v45 = vpop.permute.xlu1 %4775 }
 0xd79   : > { %v4780_v29 = vpop.permute.xlu1 %4779 }
 0xe02   : > { %v6561_v49 = vpop.f32.mrb[32].mxu1 }
 0xe03   : > { %v4783_v34 = vadd.f32 %v6561_v49, %v4772_v20  ;;  %v4727_v47 = vpop.f32.mrb[33].mxu1  ;;  %v7227_v20 = vld [vmem:[%s10294_s3] sm:$0xff]  ;;  %v7228_v49 = vld [vmem:[%s10294_s3 + $0x10] sm:$0xff] }
 0xe04   : > { %v4782_v27 = vadd.f32 %v4768_v1, %v4727_v47  ;;  %v7222_v1 = vld [vmem:[%s10294_s3] sm:$0xff]  ;;  %v7390_v47 = vmov 14  }
 0xe05   : > { %v4812_v60 = vadd.f32 %v4783_v34, %v9177_v32  ;;  %v7389_v34 = vmov 11  }
 0xe06   : > { %v4811_v4 = vadd.f32 %v4782_v27, %v9179_v18  ;;  %v6564_v39 = vpop.f32.mrb[34].mxu1  ;;  %v7231_v27 = vld [vmem:[%s10294_s3] sm:$0xff] }
 0xe07   : > { %v9577_v13 = vmul.f32 0.5, %v4812_v60  ;;  %v4785_v52 = vadd.f32 %v6564_v39, %v4780_v29  ;;  %v4737_v9 = vpop.f32.mrb[35].mxu1  ;;  %v7233_v60 = vld [vmem:[%s10294_s3 + $0x18] sm:$0xff]  ;;  %v4820_v29 = vld [vmem:[#allocation2 + $0xa0] sm:$0xff] }
 0xe08   : > { %v9579_v38 = vmul.f32 0.5, %v4811_v4  ;;  %v4784_v2 = vadd.f32 %v4776_v45, %v4737_v9  ;;  %v7388_v45 = vmov 16   ;;  %v4823_v9 = vld [vmem:[#allocation2 + $0xb8] sm:$0xff] }
 0xe09   : > { %v4814_v37 = vadd.f32 %v4785_v52, %v9187_v55  ;;  %4830 = vrot.lane.b32.xlu1 %v9577_v13, %s10394_s16 }
 0xe0a   : > { %v4813_v7 = vadd.f32 %v4784_v2, %v9189_v24  ;;  %4828 = vrot.lane.b32.xlu0 %v9579_v38, %s10394_s16  ;;  %v6739_v21 = vpack.c.bf16 %v9577_v13, %v9579_v38 }
 0xe0b   : > { %v9589_v41 = vmul.f32 0.5, %v4814_v37  ;;  %v4822_v37 = vld [vmem:[#allocation2 + $0xb0] sm:$0xff] }
 0xe0c   : > { %v9591_v53 = vmul.f32 0.5, %v4813_v7  ;;  %6740 = vmatprep.subr.bf16.mxu0 %v6739_v21 }
 0xe0d   : > { %6742 = vmatpush3.bf16.msra.mxu0 %v6739_v21  ;;  %4834 = vrot.lane.b32.xlu1 %v9589_v41, %s10394_s16 }
 0xe0e   : > { %4832 = vrot.lane.b32.xlu0 %v9591_v53, %s10394_s16  ;;  %v6743_v42 = vpack.c.bf16 %v9589_v41, %v9591_v53 }
 0xe10   : > { %6744 = vmatprep.subr.bf16.mxu0 %v6743_v42 }
 0xe11   : > { %5063 = vperm.xlu1 %7095, %v9602_v14   ;;  %6746 = vmatpush3.bf16.msra.mxu0 %v6743_v42 }
 0xe12   : > { %5058 = vperm.xlu0 %7094, %v9611_v19  }
 0xe14   : > { %6580 = vmatmul.mubr.msk.f32.vlgmr.msra.gmra.mrb[20].mxu0 %vm406_vm1, %v6110_v3 }
 0xe15   : > { %5068 = vperm.xlu1 %7095, %v9621_v61   ;;  %6582 = vmatprep.mubr.msk.f32.mxu0 %vm406_vm1, %v6111_v58 }
 0xe16   : > { %5073 = vperm.xlu0 %7094, %v9631_v31  }
 0xe18   : > { %6583 = vmatmul.mubr.msk.f32.gmra.mrb[22].mxu0 %vm406_vm1, %v6112_v57 }
 0xe19   : > { %380 = vrot.lane.b32.xlu1 %v7214_v8, %s10394_s16  ;;  %6593 = vmatprep.mubr.msk.f32.mxu0 %vm406_vm1, %v6105_v28 }
 0xe1a   : > { %382 = vrot.lane.b32.xlu0 %v7215_v43, %s10394_s16  ;;  %7096 = vset.pattern.permute.xlu1 %v7385_v30 }
 0xe1b   : > { %7097 = vset.pattern.permute.xlu0 %v7385_v30 }
 0xe1d   : > { %384 = vrot.lane.b32.xlu1 %v7216_v36, %s10394_s16 }
 0xe1e   : > { %386 = vrot.lane.b32.xlu0 %v7217_v59, %s10394_s16 }
 0xe21   : > { %1209 = vperm.xlu1 %7096, %v7218_v26  }
 0xe22   : > { %1213 = vperm.xlu0 %7097, %v7219_v35   ;;  %v10395_v35 = vld [vmem:[#allocation11_spill] sm:$0xff] }
 0xe25   : > { %1217 = vperm.xlu1 %7096, %v7220_v51  }
 0xe26   : > { %1283 = vrot.lane.b32.xlu0 %v7967_v46, %s10394_s16  ;;  %v7223_v46 = vld [vmem:[%s10294_s3 + $0x18] sm:$0xff] }
 0xe27   : > { %7098 = vset.pattern.permute.xlu0 %v7386_v23 }
 0xe29   : > { %1221 = vperm.xlu1 %7096, %v7221_v5   ;;  %v10396_v5 = vld [vmem:[#allocation13_spill] sm:$0xff] }
 0xe2a   : > { %1287 = vrot.lane.b32.xlu0 %v7977_v6, %s10394_s16  ;;  %v7224_v6 = vld [vmem:[%s10294_s3 + $0x8] sm:$0xff] }
 0xe2d   : > { %1285 = vrot.lane.b32.xlu1 %v7965_v15, %s10394_s16  ;;  %v7387_v15 = vmov 8  }
 0xe2e   : > { %2112 = vperm.xlu0 %7098, %v7222_v1   ;;  %7099 = vset.pattern.permute.xlu1 %v7386_v23 }
 0xe31   : > { %1289 = vrot.lane.b32.xlu1 %v7975_v11, %s10394_s16  ;;  %v7226_v11 = vld [vmem:[%s10294_s3 + $0x10] sm:$0xff] }
 0xe32   : > { %2124 = vperm.xlu0 %7098, %v7223_v46  }
 0xe35   : > { %2116 = vperm.xlu1 %7099, %v7224_v6  }
 0xe36   : > { %7101 = vset.pattern.permute.xlu0 %v7387_v15 }
 0xe37   : > { %2991 = vperm.xlu0 %7101, %v7225_v33  }
 0xe39   : > { %2120 = vperm.xlu1 %7099, %v7226_v11  }
 0xe3b   : > { %3060 = vrot.lane.b32.xlu0 %v8777_v22, %s10394_s16  ;;  %v7229_v22 = vld [vmem:[%s10294_s3 + $0x18] sm:$0xff] }
 0xe3c   : > { %7102 = vset.pattern.permute.xlu0 %v7388_v45 }
 0xe3d   : > { %7100 = vset.pattern.permute.xlu1 %v7387_v15  ;;  %v10397_v15 = vld [vmem:[#allocation12_spill] sm:$0xff] }
 0xe3e   : > { %2987 = vperm.xlu1 %7100, %v7227_v20   ;;  %v10398_v20 = vld [vmem:[#allocation15_spill] sm:$0xff] }
 0xe3f   : > { %3064 = vrot.lane.b32.xlu0 %v8787_v63, %s10394_s16  ;;  %v7230_v63 = vld [vmem:[%s10294_s3 + $0x8] sm:$0xff] }
 0xe42   : > { %2995 = vperm.xlu1 %7100, %v7228_v49  }
 0xe43   : > { %5639 = vperm.xlu0 %7102, %v9611_v19  }
 0xe46   : > { %2999 = vperm.xlu1 %7100, %v7229_v22  }
 0xe47   : > { %5651 = vperm.xlu0 %7102, %v9631_v31  }
 0xe4a   : > { %3062 = vrot.lane.b32.xlu1 %v8775_v10, %s10394_s16  ;;  %v7391_v10 = vmov 17  }
 0xe4b   : > { %7105 = vset.pattern.permute.xlu0 %v7389_v34  ;;  %7103 = vset.pattern.permute.xlu1 %v7388_v45 }
 0xe4c   : > { %3891 = vperm.xlu0 %7105, %v7230_v63   ;;  %v10399_v63 = vld [vmem:[#allocation16_spill] sm:$0xff] }
 0xe4e   : > { %3066 = vrot.lane.b32.xlu1 %v8785_v48, %s10394_s16  ;;  %v7232_v48 = vld [vmem:[%s10294_s3 + $0x10] sm:$0xff] }
 0xe50   : > { %7106 = vset.pattern.permute.xlu0 %v7390_v47 }
 0xe51   : > { %4787 = vperm.xlu0 %7106, %v9611_v19  }
 0xe52   : > { %5643 = vperm.xlu1 %7103, %v9602_v14  }
 0xe55   : > { %4799 = vperm.xlu0 %7106, %v9631_v31  }
 0xe56   : > { %5647 = vperm.xlu1 %7103, %v9621_v61  }
 0xe59   : > { %7109 = vset.pattern.permute.xlu0 %v7391_v10 }
 0xe5a   : > { %7104 = vset.pattern.permute.xlu1 %v7389_v34  ;;  %5663 = vperm.xlu0 %7109, %v9602_v14  }
 0xe5b   : > { %3887 = vperm.xlu1 %7104, %v7231_v27   ;;  %v10400_v27 = vld [vmem:[#allocation14_spill] sm:$0xff] }
 0xe5e   : > { %3960 = vrot.lane.b32.xlu0 %v9179_v18, %s10394_s16  ;;  %v4821_v18 = vld [vmem:[#allocation2 + $0xa8] sm:$0xff] }
 0xe5f   : > { %3895 = vperm.xlu1 %7104, %v7232_v48  }
 0xe62   : > { %3964 = vrot.lane.b32.xlu0 %v9189_v24, %s10394_s16 }
 0xe63   : > { %3899 = vperm.xlu1 %7104, %v7233_v60  }
 0xe67   : > { %7107 = vset.pattern.permute.xlu1 %v7390_v47 }
 0xe68   : > { %4791 = vperm.xlu1 %7107, %v9602_v14  }
 0xe6c   : > { %4795 = vperm.xlu1 %7107, %v9621_v61  }
 0xe70   : > { %7108 = vset.pattern.permute.xlu1 %v7391_v10 }
 0xe71   : > { %5659 = vperm.xlu1 %7108, %v9611_v19   ;;  %v6107_v19 = vld [vmem:[%s10332_s1 + $0x150] sm:$0xff] }
 0xe75   : > { %5667 = vperm.xlu1 %7108, %v9621_v61  }
 0xe79   : > { %5671 = vperm.xlu1 %7108, %v9631_v31  }
 0xe7b   : > { %v4831_v24 = vpop.permute.xlu1 %4830 }
 0xe7c   : > { %v4841_v4 = vsel %vm392_vm13, %v4821_v18, %v4831_v24  ;;  %4845 = vst.msk [vmem:[#allocation2 + $0xa8] sm:$0xff] %vm392_vm13, %v4831_v24  ;;  %v4829_v39 = vpop.permute.xlu0 %4828  ;;  %v10401_v18 = vld [vmem:[#allocation18_spill] sm:$0xff] }
 0xe7d   : > { %v4840_v52 = vsel %vm392_vm13, %v4820_v29, %v4829_v39  ;;  %4844 = vst.msk [vmem:[#allocation2 + $0xa0] sm:$0xff] %vm392_vm13, %v4829_v39  ;;  %3962 = vrot.lane.b32.xlu1 %v9177_v32, %s10394_s16  ;;  %v6106_v32 = vld [vmem:[%s10332_s1 + $0x148] sm:$0xff] }
 0xe7e   : > { %v6747_v2 = vpack.c.bf16 %v4841_v4, %v4840_v52  ;;  %v10402_v4 = vld [vmem:[#allocation17_spill] sm:$0xff] }
 0xe7f   : > { %v4835_v7 = vpop.permute.xlu1 %4834 }
 0xe80   : > { %v4843_v21 = vsel %vm392_vm13, %v4823_v9, %v4835_v7  ;;  %4847 = vst.msk [vmem:[#allocation2 + $0xb8] sm:$0xff] %vm392_vm13, %v4835_v7  ;;  %v4833_v42 = vpop.permute.xlu0 %4832  ;;  %6748 = vmatprep.subr.bf16.mxu0 %v6747_v2 }
 0xe81   : > { %v4842_v14 = vsel %vm392_vm13, %v4822_v37, %v4833_v42  ;;  %4846 = vst.msk [vmem:[#allocation2 + $0xb0] sm:$0xff] %vm392_vm13, %v4833_v42  ;;  %3966 = vrot.lane.b32.xlu1 %v9187_v55, %s10394_s16  ;;  %6750 = vmatpush3.bf16.msra.mxu0 %v6747_v2  ;;  %v6108_v55 = vld [vmem:[%s10332_s1 + $0x158] sm:$0xff]  ;;  %v10403_v2 = vld [vmem:[#allocation19_spill] sm:$0xff] }
 0xe82   : > { %v6751_v3 = vpack.c.bf16 %v4843_v21, %v4842_v14  ;;  %v10404_v42 = vld [vmem:[#allocation21_spill] sm:$0xff] }
 0xe84   : > { %6752 = vmatprep.subr.bf16.mxu0 %v6751_v3 }
 0xe85   : > { %6754 = vmatpush3.bf16.msra.mxu0 %v6751_v3 }
 0xe88   : > { %6594 = vmatmul.mubr.msk.f32.vlgmr.msra.gmra.mrb[20].mxu0 %vm406_vm1, %v6106_v32 }
 0xe89   : > { %6596 = vmatprep.mubr.msk.f32.mxu0 %vm406_vm1, %v6107_v19  ;;  %v10405_v19 = vld [vmem:[#allocation20_spill] sm:$0xff] }
 0xe8c   : > { %6597 = vmatmul.mubr.msk.f32.gmra.mrb[22].mxu0 %vm406_vm1, %v6108_v55 }
 0xe90   : > { %v9751_v58 = vpop.permute.xlu1 %5063 }
 0xe91   : > { %v9753_v61 = vpop.permute.xlu0 %5058 }
 0xe94   : > { %v9755_v57 = vpop.permute.xlu1 %5068 }
 0xe95   : > { %v9757_v31 = vpop.permute.xlu0 %5073 }
 0xe98   : > { %v381_v28 = vpop.permute.xlu1 %380 }
 0xe99   : > { %393 = vst.msk [vmem:[#allocation2] sm:$0xff] %vm392_vm13, %v381_v28  ;;  %v383_v8 = vpop.permute.xlu0 %382 }
 0xe9a   : > { %394 = vst.msk [vmem:[#allocation2 + $0x8] sm:$0xff] %vm392_vm13, %v383_v8 }
 0xe9c   : > { %v385_v43 = vpop.permute.xlu1 %384 }
 0xe9d   : > { %395 = vst.msk [vmem:[#allocation2 + $0x10] sm:$0xff] %vm392_vm13, %v385_v43  ;;  %v387_v30 = vpop.permute.xlu0 %386 }
 0xe9e   : > { %396 = vst.msk [vmem:[#allocation2 + $0x18] sm:$0xff] %vm392_vm13, %v387_v30 }
 0xea0   : > { %v1210_v36 = vpop.permute.xlu1 %1209 }
 0xea1   : > { %v1224_v59 = vadd.f32 %v1210_v36, %v8354_v12  ;;  %v1214_v26 = vpop.permute.xlu0 %1213 }
 0xea2   : > { %v1225_v51 = vadd.f32 %v10395_v35, %v1214_v26 }
 0xea3   : > { %1228 = vst [vmem:[%s7521_s15] sm:$0xff] %v1224_v59 }
 0xea4   : > { %1229 = vst [vmem:[%s7521_s15 + $0x8] sm:$0xff] %v1225_v51  ;;  %v1218_v23 = vpop.permute.xlu1 %1217 }
 0xea5   : > { %v1226_v1 = vadd.f32 %v1218_v23, %v10396_v5  ;;  %v1284_v46 = vpop.permute.xlu0 %1283 }
 0xea6   : > { %1295 = vst.msk [vmem:[#allocation2 + $0x20] sm:$0xff] %vm392_vm13, %v1284_v46 }
 0xea7   : > { %1230 = vst [vmem:[%s7521_s15 + $0x10] sm:$0xff] %v1226_v1 }
 0xea8   : > { %v1222_v6 = vpop.permute.xlu1 %1221 }
 0xea9   : > { %v1227_v33 = vadd.f32 %v10397_v15, %v1222_v6  ;;  %v1288_v11 = vpop.permute.xlu0 %1287 }
 0xeaa   : > { %1297 = vst.msk [vmem:[#allocation2 + $0x30] sm:$0xff] %vm392_vm13, %v1288_v11 }
 0xeab   : > { %1231 = vst [vmem:[%s7521_s15 + $0x18] sm:$0xff] %v1227_v33 }
 0xeac   : > { %v1286_v12 = vpop.permute.xlu1 %1285 }
 0xead   : > { %1296 = vst.msk [vmem:[#allocation2 + $0x28] sm:$0xff] %vm392_vm13, %v1286_v12  ;;  %v2113_v45 = vpop.permute.xlu0 %2112 }
 0xeae   : > { %v2127_v49 = vadd.f32 %v2113_v45, %v10398_v20 }
 0xeb0   : > { %5945 = vst [vmem:[%s7521_s15 + $0x20] sm:$0xff] %v2127_v49  ;;  %v1290_v22 = vpop.permute.xlu1 %1289 }
 0xeb1   : > { %1298 = vst.msk [vmem:[#allocation2 + $0x38] sm:$0xff] %vm392_vm13, %v1290_v22  ;;  %v2125_v34 = vpop.permute.xlu0 %2124 }
 0xeb2   : > { %v2130_v47 = vadd.f32 %v10399_v63, %v2125_v34  ;;  %v6090_v34 = vld [vmem:[%s10293_s2 + $0x128] sm:$0xff]  ;;  %v6091_v63 = vld [vmem:[%s10293_s2 + $0x130] sm:$0xff] }
 0xeb4   : > { %5948 = vst [vmem:[%s7521_s15 + $0x38] sm:$0xff] %v2130_v47  ;;  %v2117_v10 = vpop.permute.xlu1 %2116 }
 0xeb5   : > { %v2128_v48 = vadd.f32 %v10400_v27, %v2117_v10 }
 0xeb6   : > { %v2992_v60 = vpop.permute.xlu0 %2991 }
 0xeb7   : > { %5946 = vst [vmem:[%s7521_s15 + $0x28] sm:$0xff] %v2128_v48  ;;  %v3003_v29 = vadd.f32 %v10401_v18, %v2992_v60  ;;  %v6092_v60 = vld [vmem:[%s10293_s2 + $0x138] sm:$0xff] }
 0xeb8   : > { %v2121_v24 = vpop.permute.xlu1 %2120 }
 0xeb9   : > { %5998 = vst [vmem:[%s7521_s15 + $0x48] sm:$0xff] %v3003_v29  ;;  %v2129_v39 = vadd.f32 %v2121_v24, %v10402_v4 }
 0xeba   : > { %v3061_v52 = vpop.permute.xlu0 %3060 }
 0xebb   : > { %5947 = vst [vmem:[%s7521_s15 + $0x30] sm:$0xff] %v2129_v39  ;;  %3072 = vst.msk [vmem:[#allocation2 + $0x60] sm:$0xff] %vm392_vm13, %v3061_v52 }
 0xebd   : > { %v2988_v9 = vpop.permute.xlu1 %2987 }
 0xebe   : > { %v3002_v37 = vadd.f32 %v2988_v9, %v10403_v2  ;;  %v3065_v7 = vpop.permute.xlu0 %3064 }
 0xebf   : > { %3074 = vst.msk [vmem:[#allocation2 + $0x70] sm:$0xff] %vm392_vm13, %v3065_v7 }
 0xec0   : > { %5997 = vst [vmem:[%s7521_s15 + $0x40] sm:$0xff] %v3002_v37 }
 0xec1   : > { %v2996_v21 = vpop.permute.xlu1 %2995 }
 0xec2   : > { %v3004_v14 = vadd.f32 %v2996_v21, %v10404_v42  ;;  %v9790_v3 = vpop.permute.xlu0 %5639 }
 0xec4   : > { %5999 = vst [vmem:[%s7521_s15 + $0x50] sm:$0xff] %v3004_v14 }
 0xec5   : > { %v3000_v32 = vpop.permute.xlu1 %2999 }
 0xec6   : > { %v3005_v55 = vadd.f32 %v10405_v19, %v3000_v32  ;;  %v9794_v28 = vpop.permute.xlu0 %5651 }
 0xec8   : > { %6000 = vst [vmem:[%s7521_s15 + $0x58] sm:$0xff] %v3005_v55 }
 0xec9   : > { %v3063_v8 = vpop.permute.xlu1 %3062 }
 0xeca   : > { %3073 = vst.msk [vmem:[#allocation2 + $0x68] sm:$0xff] %vm392_vm13, %v3063_v8 }
 0xecb   : > { %v3892_v43 = vpop.permute.xlu0 %3891 }
 0xecc   : > { %v3903_v30 = vadd.f32 %v9563_v0, %v3892_v43 }
 0xecd   : > { %v3067_v36 = vpop.permute.xlu1 %3066 }
 0xece   : > { %6050 = vst [vmem:[%s7521_s15 + $0x68] sm:$0xff] %v3903_v30  ;;  %3075 = vst.msk [vmem:[#allocation2 + $0x78] sm:$0xff] %vm392_vm13, %v3067_v36 }
 0xed0   : > { %v9801_v59 = vpop.permute.xlu0 %4787 }
 0xed1   : > { %v9803_v26 = vpop.permute.xlu1 %5643 }
 0xed4   : > { %v9805_v35 = vpop.permute.xlu0 %4799 }
 0xed5   : > { %v9807_v51 = vpop.permute.xlu1 %5647 }
 0xed9   : > { %v9809_v23 = vpop.permute.xlu0 %5663 }
 0xeda   : > { %v3888_v5 = vpop.permute.xlu1 %3887 }
 0xedb   : > { %v3902_v1 = vadd.f32 %v3888_v5, %v9565_v54 }
 0xedd   : > { %6049 = vst [vmem:[%s7521_s15 + $0x60] sm:$0xff] %v3902_v1  ;;  %v3961_v0 = vpop.permute.xlu0 %3960 }
 0xede   : > { %3972 = vst.msk [vmem:[#allocation2 + $0x80] sm:$0xff] %vm392_vm13, %v3961_v0  ;;  %v3896_v46 = vpop.permute.xlu1 %3895 }
 0xedf   : > { %v3904_v6 = vadd.f32 %v3896_v46, %v9569_v40 }
 0xee1   : > { %6051 = vst [vmem:[%s7521_s15 + $0x70] sm:$0xff] %v3904_v6  ;;  %v3965_v15 = vpop.permute.xlu0 %3964 }
 0xee2   : > { %3974 = vst.msk [vmem:[#allocation2 + $0x90] sm:$0xff] %vm392_vm13, %v3965_v15  ;;  %v3900_v33 = vpop.permute.xlu1 %3899 }
 0xee3   : > { %v3905_v11 = vadd.f32 %v9567_v17, %v3900_v33  ;;  %v6089_v17 = vld [vmem:[%s10293_s2 + $0x120] sm:$0xff] }
 0xee4   : > { %6565 = vmatprep.mubr.msk.f32.mxu1 %vm406_vm1, %v6089_v17 }
 0xee5   : > { %6052 = vst [vmem:[%s7521_s15 + $0x78] sm:$0xff] %v3905_v11  ;;  %6566 = vmatmul.mubr.msk.f32.gmra.mrb[36].mxu1 %vm406_vm1, %v6090_v34 }
 0xee6   : > { %6568 = vmatprep.mubr.msk.f32.mxu1 %vm406_vm1, %v6091_v63 }
 0xee7   : > { %v9819_v12 = vpop.permute.xlu1 %4791 }
 0xee9   : > { %6569 = vmatmul.mubr.msk.f32.gmra.mrb[38].mxu1 %vm406_vm1, %v6092_v60 }
 0xeeb   : > { %v9821_v45 = vpop.permute.xlu1 %4795 }
 0xef0   : > { %v9823_v54 = vpop.permute.xlu1 %5659 }
 0xef4   : > { %v9825_v20 = vpop.permute.xlu1 %5667 }
 0xef8   : > { %v9827_v49 = vpop.permute.xlu1 %5671 }
 0xefc   : > { %v3963_v22 = vpop.permute.xlu1 %3962 }
 0xefd   : > { %3973 = vst.msk [vmem:[#allocation2 + $0x88] sm:$0xff] %vm392_vm13, %v3963_v22 }
 0xf00   : > { %v3967_v40 = vpop.permute.xlu1 %3966 }
 0xf01   : > { %3975 = vst.msk [vmem:[#allocation2 + $0x98] sm:$0xff] %vm392_vm13, %v3967_v40 }
 0xf5b   : > { %v6595_v47 = vpop.f32.mrb[20].mxu0 }
 0xf5c   : > { %v5077_v10 = vadd.f32 %v6595_v47, %v9751_v58  ;;  %v5033_v27 = vpop.f32.mrb[21].mxu0 }
 0xf5d   : > { %v5076_v48 = vadd.f32 %v9753_v61, %v5033_v27 }
 0xf5e   : > { %v9850_v29 = vsel %vm2144_vm15, %v5077_v10, 0.0 }
 0xf5f   : > { %v5188_v24 = vand.u32 2147483647, %v9850_v29  ;;  %v5191_v4 = vand.u32 2139095040, %v9850_v29  ;;  %v9856_v58 = vsel %vm2144_vm15, %v5076_v48, 0.0  ;;  %v6598_v39 = vpop.f32.mrb[22].mxu0  ;;  %vm5190_vm10 = vcmp.lt.s32.totalorder %v9850_v29, 0 }
 0xf60   : > { %v5084_v61 = vand.u32 2147483647, %v9856_v58  ;;  %v5087_v52 = vand.u32 2139095040, %v9856_v58  ;;  %v5079_v9 = vadd.f32 %v6598_v39, %v9757_v31  ;;  %v5043_v2 = vpop.f32.mrb[23].mxu0 }
 0xf61   : > { %v5192_v37 = vshrl.u32 %v5191_v4, 23  ;;  %v5195_v7 = vand.u32 8388607, %v5188_v24  ;;  %v5078_v43 = vadd.f32 %v9755_v57, %v5043_v2 }
 0xf62   : > { %v5088_v21 = vshrl.u32 %v5087_v52, 23  ;;  %v5091_v42 = vand.u32 8388607, %v5084_v61  ;;  %v9868_v14 = vsel %vm2144_vm15, %v5079_v9, 0.0  ;;  %v6137_v9 = vld [vmem:[%s10293_s2 + $0x140] sm:$0xff] }
 0xf63   : > { %v6125_v32 = vadd.s32 4294967169, %v5192_v37  ;;  %v5399_v55 = vand.u32 2139095040, %v9868_v14  ;;  %v5196_v31 = vor.u32 8388608, %v5195_v7  ;;  %v10325_v5 = vand.u32 2147483647, %v9868_v14  ;;  %6607 = vmatprep.mubr.msk.f32.mxu1 %vm406_vm1, %v6137_v9 }
 0xf64   : > { %v6121_v19 = vadd.s32 4294967169, %v5088_v21  ;;  %v5092_v30 = vor.u32 8388608, %v5091_v42  ;;  %v9875_v11 = vsel %vm2144_vm15, %v5078_v43, 0.0 }
 0xf65   : > { %v5198_v8 = vadd.s32 1, %v6125_v32  ;;  %v5400_v1 = vshrl.u32 %v5399_v55, 23  ;;  %v9877_v22 = vshll.u32 %v5196_v31, 8  ;;  %v9885_v17 = vand.u32 8388607, %v10325_v5 }
 0xf66   : > { %v5094_v36 = vadd.s32 1, %v6121_v19  ;;  %v9881_v57 = vshll.u32 %v5092_v30, 8 }
 0xf67   : > { %vm5199_vm13 = vcmp.gt.s32.totalorder %v5198_v8, 0  ;;  %v6133_v46 = vadd.s32 4294967169, %v5400_v1 }
 0xf68   : > { %v5200_v0 = vsel %vm5199_vm13, %v5198_v8, 0  ;;  %vm5095_vm4 = vcmp.gt.s32.totalorder %v5094_v36, 0 }
 0xf69   : > { %v5201_v6 = vshrl.u32 %v5200_v0, 5  ;;  %v5202_v15 = vand.u32 31, %v5200_v0  ;;  %v5096_v33 = vsel %vm5095_vm4, %v5094_v36, 0  ;;  %v9888_v10 = vadd.s32 1, %v6133_v46 }
 0xf6a   : > { %v9879_v40 = vshrl.u32 %v5096_v33, 5  ;;  %v5098_v47 = vand.u32 31, %v5096_v33 }
 0xf6b   : > { %v5203_v34 = vsub.s32 32, %v5202_v15  ;;  %v5205_v63 = vshll.u32 %v10369_v50, %v5202_v15  ;;  %v5208_v27 = vshll.u32 %v10370_v16, %v5202_v15  ;;  %v5211_v48 = vshll.u32 %v10371_v62, %v5202_v15 }
 0xf6c   : > { %v5214_v60 = vshll.u32 %v10372_v25, %v5202_v15  ;;  %v5217_v18 = vshll.u32 %v10353_v44, %v5202_v15  ;;  %vm5220_vm15 = vcmp.lt.s32.totalorder %v5201_v6, 1  ;;  %vm5221_vm0 = vcmp.lt.s32.totalorder %v5201_v6, 2 }
 0xf6d   : > { %v5206_v4 = vshrl.u32 %v10370_v16, %v5203_v34  ;;  %v5209_v39 = vshrl.u32 %v10371_v62, %v5203_v34  ;;  %v5212_v52 = vshrl.u32 %v10372_v25, %v5203_v34  ;;  %v5204_v2 = vshrl.u32 %v10369_v50, %v5203_v34 }
 0xf6e   : > { %v5215_v37 = vshrl.u32 %v10353_v44, %v5203_v34  ;;  %v5218_v7 = vshrl.u32 %v10354_v56, %v5203_v34  ;;  %v5099_v19 = vsub.s32 32, %v5098_v47  ;;  %vm5222_vm5 = vcmp.lt.s32.totalorder %v5201_v6, 3 }
 0xf6f   : > { %v5207_v21 = vor.u32 %v5206_v4, %v5205_v63  ;;  %v5210_v42 = vor.u32 %v5209_v39, %v5208_v27  ;;  %v5213_v32 = vor.u32 %v5212_v52, %v5211_v48  ;;  %vm5223_vm11 = vcmp.lt.s32.totalorder %v5201_v6, 4 }
 0xf70   : > { %v5216_v55 = vor.u32 %v5215_v37, %v5214_v60  ;;  %v5219_v31 = vor.u32 %v5218_v7, %v5217_v18  ;;  %v5101_v15 = vshll.u32 %v10369_v50, %v5098_v47  ;;  %v5102_v63 = vshrl.u32 %v10370_v16, %v5099_v19 }
 0xf71   : > { %v5224_v8 = vsel %vm5220_vm15, %v5204_v2, %v5207_v21  ;;  %v5225_v43 = vsel %vm5223_vm11, %v5213_v32, 2102212464  ;;  %v5228_v30 = vsel %vm5220_vm15, %v5207_v21, %v5210_v42  ;;  %v5232_v36 = vsel %vm5220_vm15, %v5210_v42, %v5213_v32 }
 0xf72   : > { %v5226_v1 = vsel %vm5222_vm5, %v5210_v42, %v5225_v43  ;;  %v5229_v0 = vsel %vm5223_vm11, %v5216_v55, 920167782  ;;  %v5233_v46 = vsel %vm5223_vm11, %v5219_v31, 1326507024  ;;  %v5104_v27 = vshll.u32 %v10370_v16, %v5098_v47 }
 0xf73   : > { %v5230_v33 = vsel %vm5222_vm5, %v5213_v32, %v5229_v0  ;;  %v5234_v34 = vsel %vm5222_vm5, %v5216_v55, %v5233_v46  ;;  %v5227_v48 = vsel %vm5221_vm0, %v5224_v8, %v5226_v1  ;;  %v5105_v4 = vshrl.u32 %v10371_v62, %v5099_v19 }
 0xf74   : > { %v5231_v60 = vsel %vm5221_vm0, %v5228_v30, %v5230_v33  ;;  %v5235_v18 = vsel %vm5221_vm0, %v5232_v36, %v5234_v34  ;;  %v5103_v37 = vor.u32 %v5102_v63, %v5101_v15  ;;  %v5107_v21 = vshll.u32 %v10371_v62, %v5098_v47 }
 0xf75   : > { %v9915_v39 = vmul.u32.u64.low %v9877_v22, %v5235_v18  ;;  %v9916_v52 = vmul.u32.u64.high %v9877_v22, %v5235_v18, %v9915_v39  ;;  %v9919_v9 = vmul.u32.u64.low %v9877_v22, %v5231_v60  ;;  %v9920_v2 = vmul.u32.u64.high %v9877_v22, %v5231_v60, %v9919_v9 }
 0xf76   : > { %v5106_v7 = vor.u32 %v5105_v4, %v5104_v27  ;;  %v5108_v42 = vshrl.u32 %v10372_v25, %v5099_v19  ;;  %v5100_v32 = vshrl.u32 %v10369_v50, %v5099_v19  ;;  %v5110_v6 = vshll.u32 %v10372_v25, %v5098_v47 }
 0xf77   : > { %v5111_v55 = vshrl.u32 %v10353_v44, %v5099_v19  ;;  %v5114_v31 = vshrl.u32 %v10354_v56, %v5099_v19  ;;  %v5243_v8 = vmul.u32 %v9877_v22, %v5227_v48  ;;  %v5113_v30 = vshll.u32 %v10353_v44, %v5098_v47 }
 0xf78   : > { %v5109_v43 = vor.u32 %v5108_v42, %v5107_v21  ;;  %vm5116_vm12 = vcmp.lt.s32.totalorder %v9879_v40, 1  ;;  %vm5245_vm2 = vc.u32 %v9916_v52, %v9919_v9  ;;  %v5246_v36 = vadd.s32 1, %v9920_v2 }
 0xf79   : > { %v5112_v1 = vor.u32 %v5111_v55, %v5110_v6  ;;  %vm5117_vm8 = vcmp.lt.s32.totalorder %v9879_v40, 2  ;;  %v5115_v0 = vor.u32 %v5114_v31, %v5113_v30  ;;  %vm5118_vm14 = vcmp.lt.s32.totalorder %v9879_v40, 3 }
 0xf7a   : > { %vm5119_vm3 = vcmp.lt.s32.totalorder %v9879_v40, 4  ;;  %v5124_v19 = vsel %vm5116_vm12, %v5103_v37, %v5106_v7  ;;  %v5247_v22 = vsel %vm5245_vm2, %v5246_v36, %v9920_v2  ;;  %v5128_v47 = vsel %vm5116_vm12, %v5106_v7, %v5109_v43 }
 0xf7b   : > { %v5121_v46 = vsel %vm5119_vm3, %v5109_v43, 2102212464  ;;  %v5125_v15 = vsel %vm5119_vm3, %v5112_v1, 920167782  ;;  %v5248_v33 = vadd.s32 %v5247_v22, %v5243_v8  ;;  %v5120_v34 = vsel %vm5116_vm12, %v5100_v32, %v5103_v37 }
 0xf7c   : > { %v5126_v63 = vsel %vm5118_vm14, %v5109_v43, %v5125_v15  ;;  %v5129_v27 = vsel %vm5119_vm3, %v5115_v0, 1326507024  ;;  %v5122_v48 = vsel %vm5118_vm14, %v5106_v7, %v5121_v46  ;;  %vm5407_vm6 = vcmp.gt.s32.totalorder %v9888_v10, 0 }
 0xf7d   : > { %v5127_v60 = vsel %vm5117_vm8, %v5124_v19, %v5126_v63  ;;  %v5130_v18 = vsel %vm5118_vm14, %v5112_v1, %v5129_v27  ;;  %v5249_v4 = vadd.s32 536870912, %v5248_v33  ;;  %v5408_v7 = vsel %vm5407_vm6, %v9888_v10, 0 }
 0xf7e   : > { %v5131_v39 = vsel %vm5117_vm8, %v5128_v47, %v5130_v18  ;;  %v9943_v2 = vmul.u32.u64.low %v9881_v57, %v5127_v60  ;;  %v9944_v21 = vmul.u32.u64.high %v9881_v57, %v5127_v60, %v9943_v2  ;;  %v5123_v6 = vsel %vm5117_vm8, %v5120_v34, %v5122_v48 }
 0xf7f   : > { %v9948_v37 = vmul.u32.u64.low %v9881_v57, %v5131_v39  ;;  %v9949_v42 = vmul.u32.u64.high %v9881_v57, %v5131_v39, %v9948_v37  ;;  %v5250_v32 = vshrl.u32 %v5249_v4, 30  ;;  %v5404_v55 = vor.u32 8388608, %v9885_v17 }
 0xf80   : > { %v5410_v31 = vand.u32 31, %v5408_v7  ;;  %v5295_v8 = vand.u32 2139095040, %v9875_v11  ;;  %v5142_v30 = vadd.s32 1, %v9944_v21  ;;  %v5139_v1 = vmul.u32 %v9881_v57, %v5123_v6 }
 0xf81   : > { %v5251_v43 = vshll.u32 %v5250_v32, 30  ;;  %vm5141_vm7 = vc.u32 %v9949_v42, %v9943_v2  ;;  %v9963_v40 = vshll.u32 %v5404_v55, 8  ;;  %v5244_v57 = vadd.s32 %v9919_v9, %v9916_v52 }
 0xf82   : > { %v5411_v36 = vsub.s32 32, %v5410_v31  ;;  %v5143_v10 = vsel %vm5141_vm7, %v5142_v30, %v9944_v21  ;;  %v5296_v15 = vshrl.u32 %v5295_v8, 23  ;;  %v5409_v27 = vshrl.u32 %v5408_v7, 5 }
 0xf83   : > { %v9960_v0 = vsub.s32 %v5248_v33, %v5251_v43  ;;  %v5144_v19 = vadd.s32 %v5143_v10, %v5139_v1  ;;  %v5419_v33 = vshll.u32 %v10371_v62, %v5410_v31  ;;  %v5413_v48 = vshll.u32 %v10369_v50, %v5410_v31 }
 0xf84   : > { %v5414_v22 = vshrl.u32 %v10370_v16, %v5411_v36  ;;  %v5417_v46 = vshrl.u32 %v10371_v62, %v5411_v36  ;;  %v5420_v34 = vshrl.u32 %v10372_v25, %v5411_v36  ;;  %v5416_v60 = vshll.u32 %v10370_v16, %v5410_v31 }
 0xf85   : > { %v5254_v47 = vsub.s32 0, %v9960_v0  ;;  %v5145_v63 = vadd.s32 536870912, %v5144_v19  ;;  %v5422_v39 = vshll.u32 %v10372_v25, %v5410_v31  ;;  %v5423_v21 = vshrl.u32 %v10353_v44, %v5411_v36 }
 0xf86   : > { %v5421_v4 = vor.u32 %v5420_v34, %v5419_v33  ;;  %v5415_v9 = vor.u32 %v5414_v22, %v5413_v48  ;;  %v5418_v37 = vor.u32 %v5417_v46, %v5416_v60  ;;  %v5426_v6 = vshrl.u32 %v10354_v56, %v5411_v36 }
 0xf87   : > { %v6126_v18 = vmin.u32 %v5254_v47, %v9960_v0  ;;  %v5146_v52 = vshrl.u32 %v5145_v63, 30  ;;  %v5274_v8 = vsub.s32 4, %v5250_v32  ;;  %v5424_v43 = vor.u32 %v5423_v21, %v5422_v39 }
 0xf88   : > { %v6129_v7 = vadd.s32 4294967169, %v5296_v15  ;;  %v5412_v1 = vshrl.u32 %v10369_v50, %v5411_v36  ;;  %v5425_v10 = vshll.u32 %v10353_v44, %v5410_v31  ;;  %vm5431_vm9 = vcmp.lt.s32.totalorder %v5409_v27, 4 }
 0xf89   : > { %v5256_v55 = vclz %v6126_v18  ;;  %v5147_v30 = vshll.u32 %v5146_v52, 30  ;;  %vm5428_vm13 = vcmp.lt.s32.totalorder %v5409_v27, 1  ;;  %vm5430_vm4 = vcmp.lt.s32.totalorder %v5409_v27, 3 }
 0xf8a   : > { %v5433_v33 = vsel %vm5431_vm9, %v5421_v4, 2102212464  ;;  %vm9984_vm15 = vcmp.le.f32.partialorder %v5188_v24, 0.7853982  ;;  %vm5086_vm0 = vcmp.lt.s32.totalorder %v9856_v58, 0  ;;  %v5427_v15 = vor.u32 %v5426_v6, %v5425_v10 }
 0xf8b   : > { %v6127_v47 = vadd.s32 4294967294, %v5256_v55  ;;  %v9989_v46 = vsub.s32 %v5144_v19, %v5147_v30  ;;  %v5436_v36 = vsel %vm5428_vm13, %v5415_v9, %v5418_v37  ;;  %v5437_v31 = vsel %vm5431_vm9, %v5424_v43, 920167782 }
 0xf8c   : > { %v5432_v34 = vsel %vm5428_vm13, %v5412_v1, %v5415_v9  ;;  %v5434_v63 = vsel %vm5430_vm4, %v5418_v37, %v5433_v33  ;;  %v5438_v48 = vsel %vm5430_vm4, %v5421_v4, %v5437_v31  ;;  %v5275_v60 = vsel %vm5190_vm10, %v5274_v8, %v5250_v32 }
 0xf8d   : > { %vm6128_vm5 = vcmp.lt.s32.totalorder %v6127_v47, 0  ;;  %v5150_v18 = vsub.s32 0, %v9989_v46  ;;  %vm5429_vm11 = vcmp.lt.s32.totalorder %v5409_v27, 2  ;;  %v5440_v6 = vsel %vm5428_vm13, %v5418_v37, %v5421_v4 }
 0xf8e   : > { %v5259_v24 = vsel %vm6128_vm5, 0, %v6127_v47  ;;  %v5439_v21 = vsel %vm5429_vm11, %v5436_v36, %v5438_v48  ;;  %v5170_v30 = vsub.s32 4, %v5146_v52  ;;  %v5435_v9 = vsel %vm5429_vm11, %v5432_v34, %v5434_v63 }
 0xf8f   : > { %v5260_v19 = vsub.s32 32, %v5259_v24  ;;  %v5264_v39 = vsub.s32 4294967266, %v5259_v24  ;;  %v6122_v55 = vmin.u32 %v5150_v18, %v9989_v46  ;;  %v5441_v1 = vsel %vm5431_vm9, %v5427_v15, 1326507024 }
 0xf90   : > { %v5261_v10 = vshll.u32 %v9960_v0, %v5259_v24  ;;  %v5442_v32 = vsel %vm5430_vm4, %v5424_v43, %v5441_v1  ;;  %v10005_v5 = vmul.u32.u64.low %v9963_v40, %v5439_v21  ;;  %v10006_v17 = vmul.u32.u64.high %v9963_v40, %v5439_v21, %v10005_v5 }
 0xf91   : > { %v5262_v47 = vshrl.u32 %v5244_v57, %v5260_v19  ;;  %v5265_v33 = vadd.s32 127, %v5264_v39  ;;  %v5152_v8 = vclz %v6122_v55  ;;  %v5443_v31 = vsel %vm5429_vm11, %v5440_v6, %v5442_v32 }
 0xf92   : > { %v10010_v36 = vmul.u32.u64.low %v9963_v40, %v5443_v31  ;;  %v10011_v34 = vmul.u32.u64.high %v9963_v40, %v5443_v31, %v10010_v36  ;;  %vm10015_vm12 = vcmp.le.f32.partialorder %v5084_v61, 0.7853982  ;;  %v10411_v27 = vand.u32 2147483647, %v9875_v11 }
 0xf93   : > { %v5263_v4 = vor.u32 %v5262_v47, %v5261_v10  ;;  %v5266_v37 = vshll.u32 %v5265_v33, 23  ;;  %v6123_v57 = vadd.s32 4294967294, %v5152_v8  ;;  %v5302_v15 = vadd.s32 1, %v6129_v7 }
 0xf94   : > { %v5299_v43 = vand.u32 8388607, %v10411_v27  ;;  %v5277_v48 = vsel %vm9984_vm15, 0, %v5275_v60  ;;  %v5140_v24 = vadd.s32 %v9943_v2, %v9949_v42  ;;  %v5171_v18 = vsel %vm5086_vm0, %v5170_v30, %v5146_v52 }
 0xf95   : > { %v5267_v63 = vor.u32 4788187, %v5266_v37  ;;  %vm6124_vm2 = vcmp.lt.s32.totalorder %v6123_v57, 0  ;;  %v5451_v61 = vmul.u32 %v9963_v40, %v5435_v9  ;;  %v5454_v19 = vadd.s32 1, %v10006_v17 }
 0xf96   : > { %vm5303_vm8 = vcmp.gt.s32.totalorder %v5302_v15, 0  ;;  %v5270_v21 = vcvt.s32.f32 %v5263_v4  ;;  %v5155_v6 = vsel %vm6124_vm2, 0, %v6123_v57  ;;  %vm5453_vm14 = vc.u32 %v10011_v34, %v10005_v5 }
 0xf97   : > { %v5268_v39 = vand.u32 2147483647, %v5267_v63  ;;  %v5281_v7 = vadd.s32 3, %v5277_v48  ;;  %v5156_v60 = vsub.s32 32, %v5155_v6  ;;  %v5160_v55 = vsub.s32 4294967266, %v5155_v6 }
 0xf98   : > { %v5455_v2 = vsel %vm5453_vm14, %v5454_v19, %v10006_v17  ;;  %v5173_v52 = vsel %vm10015_vm12, 0, %v5171_v18  ;;  %v5304_v40 = vsel %vm5303_vm8, %v5302_v15, 0  ;;  %v5157_v9 = vshll.u32 %v9989_v46, %v5155_v6 }
 0xf99   : > { %v5271_v42 = vmul.f32 %v5270_v21, %v5268_v39  ;;  %v5456_v30 = vadd.s32 %v5455_v2, %v5451_v61  ;;  %v5158_v1 = vshrl.u32 %v5140_v24, %v5156_v60  ;;  %v5161_v10 = vadd.s32 127, %v5160_v55 }
 0xf9a   : > { %v5306_v47 = vand.u32 31, %v5304_v40  ;;  %v10037_v17 = vand.u32 3, %v5281_v7  ;;  %v10039_v36 = vadd.s32 3, %v5173_v52  ;;  %v5300_v15 = vor.u32 8388608, %v5299_v43 }
 0xf9b   : > { %v5272_v33 = vxor.u32 2147483648, %v5271_v42  ;;  %v5457_v32 = vadd.s32 536870912, %v5456_v30  ;;  %v5159_v8 = vor.u32 %v5158_v1, %v5157_v9  ;;  %v5162_v31 = vshll.u32 %v5161_v10, 23 }
 0xf9c   : > { %v5307_v4 = vsub.s32 32, %v5306_v47  ;;  %v5309_v63 = vshll.u32 %v10369_v50, %v5306_v47  ;;  %v5305_v22 = vshrl.u32 %v5304_v40, 5  ;;  %v5312_v6 = vshll.u32 %v10370_v16, %v5306_v47 }
 0xf9d   : > { %v5273_v37 = vsel %vm5190_vm10, %v5272_v33, %v5271_v42  ;;  %v10041_v57 = vshrl.u32 %v5457_v32, 30  ;;  %v5163_v27 = vor.u32 4788187, %v5162_v31  ;;  %v5166_v48 = vcvt.s32.f32 %v5159_v8 }
 0xf9e   : > { %v5276_v46 = vsel %vm9984_vm15, %v9850_v29, %v5273_v37  ;;  %v5310_v18 = vshrl.u32 %v10370_v16, %v5307_v4  ;;  %v5313_v19 = vshrl.u32 %v10371_v62, %v5307_v4  ;;  %v5316_v39 = vshrl.u32 %v10372_v25, %v5307_v4 }
 0xf9f   : > { %7190 = vcosq.f32 %v5276_v46  ;;  %v5459_v24 = vshll.u32 %v10041_v57, 30  ;;  %v5164_v61 = vand.u32 2147483647, %v5163_v27  ;;  %v5315_v43 = vshll.u32 %v10371_v62, %v5306_v47 }
 0xfa0   : > { %7192 = vsinq.f32 %v5276_v46  ;;  %v5311_v60 = vor.u32 %v5310_v18, %v5309_v63  ;;  %v5318_v55 = vshll.u32 %v10372_v25, %v5306_v47  ;;  %v10056_v2 = vshll.u32 %v5300_v15, 8 }
 0xfa1   : > { %v10051_v21 = vsub.s32 %v5456_v30, %v5459_v24  ;;  %v5167_v7 = vmul.f32 %v5166_v48, %v5164_v61  ;;  %v5314_v52 = vor.u32 %v5313_v19, %v5312_v6  ;;  %v5317_v9 = vor.u32 %v5316_v39, %v5315_v43 }
 0xfa2   : > { %v5319_v1 = vshrl.u32 %v10353_v44, %v5307_v4  ;;  %v5321_v30 = vshll.u32 %v10353_v44, %v5306_v47  ;;  %v5322_v40 = vshrl.u32 %v10354_v56, %v5307_v4  ;;  %vm5287_vm3 = vcmp.eq.s32.totalorder %v10037_v17, 2 }
 0xfa3   : > { %v5462_v42 = vsub.s32 0, %v10051_v21  ;;  %v5168_v10 = vxor.u32 2147483648, %v5167_v7  ;;  %v5308_v62 = vshrl.u32 %v10369_v50, %v5307_v4  ;;  %vm5324_vm6 = vcmp.lt.s32.totalorder %v5305_v22, 1 }
 0xfa4   : > { %v5320_v25 = vor.u32 %v5319_v1, %v5318_v55  ;;  %v5323_v32 = vor.u32 %v5322_v40, %v5321_v30  ;;  %vm5325_vm7 = vcmp.lt.s32.totalorder %v5305_v22, 2  ;;  %vm5327_vm10 = vcmp.lt.s32.totalorder %v5305_v22, 4 }
 0xfa5   : > { %v6134_v16 = vmin.u32 %v5462_v42, %v10051_v21  ;;  %v5169_v33 = vsel %vm5086_vm0, %v5168_v10, %v5167_v7  ;;  %v5329_v56 = vsel %vm5327_vm10, %v5317_v9, 2102212464  ;;  %v5332_v8 = vsel %vm5324_vm6, %v5311_v60, %v5314_v52 }
 0xfa6   : > { %v5172_v44 = vsel %vm10015_vm12, %v9856_v58, %v5169_v33  ;;  %vm5326_vm9 = vcmp.lt.s32.totalorder %v5305_v22, 3  ;;  %v5328_v50 = vsel %vm5324_vm6, %v5308_v62, %v5311_v60  ;;  %v5333_v31 = vsel %vm5327_vm10, %v5320_v25, 920167782 }
 0xfa7   : > { %v5464_v47 = vclz %v6134_v16  ;;  %7194 = vcosq.f32 %v5172_v44  ;;  %v5334_v46 = vsel %vm5326_vm9, %v5317_v9, %v5333_v31  ;;  %v5336_v27 = vsel %vm5324_vm6, %v5314_v52, %v5317_v9 }
 0xfa8   : > { %7196 = vsinq.f32 %v5172_v44  ;;  %v5330_v0 = vsel %vm5326_vm9, %v5314_v52, %v5329_v56  ;;  %v5335_v63 = vsel %vm5325_vm7, %v5332_v8, %v5334_v46  ;;  %v5337_v48 = vsel %vm5327_vm10, %v5323_v32, 1326507024 }
 0xfa9   : > { %v7191_v4 = vpop.eup %7190  ;;  %v6135_v37 = vadd.s32 4294967294, %v5464_v47  ;;  %v5338_v18 = vsel %vm5326_vm9, %v5320_v25, %v5337_v48  ;;  %v10078_v61 = vmul.u32.u64.low %v10056_v2, %v5335_v63  ;;  %v10079_v19 = vmul.u32.u64.high %v10056_v2, %v5335_v63, %v10078_v61 }
 0xfaa   : > { %v7193_v15 = vpop.eup %7192  ;;  %v5288_v24 = vxor.u32 2147483648, %v7191_v4  ;;  %v5339_v6 = vsel %vm5325_vm7, %v5336_v27, %v5338_v18  ;;  %vm5280_vm4 = vweird.f32 %v9850_v29  ;;  %vm5284_vm15 = vcmp.eq.s32.totalorder %v10037_v17, 0 }
 0xfab   : > { %vm6136_vm13 = vcmp.lt.s32.totalorder %v6135_v37, 0  ;;  %v5285_v43 = vxor.u32 2147483648, %v7193_v15  ;;  %v10087_v55 = vmul.u32.u64.low %v10056_v2, %v5339_v6  ;;  %v10088_v42 = vmul.u32.u64.high %v10056_v2, %v5339_v6, %v10087_v55 }
 0xfac   : > { %v5467_v39 = vsel %vm6136_vm13, 0, %v6135_v37  ;;  %v5289_v7 = vsel %vm5287_vm3, %v5288_v24, %v7193_v15  ;;  %vm5283_vm0 = vcmp.lt.s32.totalorder %v10037_v17, 2  ;;  %v5178_v9 = vand.u32 3, %v10039_v36 }
 0xfad   : > { %v5472_v60 = vsub.s32 4294967266, %v5467_v39  ;;  %v5286_v52 = vsel %vm5284_vm15, %v7191_v4, %v5285_v43  ;;  %v5331_v1 = vsel %vm5325_vm7, %v5328_v50, %v5330_v0  ;;  %v5350_v10 = vadd.s32 1, %v10079_v19 }
 0xfae   : > { %v5290_v30 = vsel %vm5283_vm0, %v5286_v52, %v5289_v7  ;;  %v5468_v29 = vsub.s32 32, %v5467_v39  ;;  %v5347_v25 = vmul.u32 %v10056_v2, %v5331_v1  ;;  %vm5349_vm5 = vc.u32 %v10088_v42, %v10078_v61 }
 0xfaf   : > { %v5473_v40 = vadd.s32 127, %v5472_v60  ;;  %v5291_v16 = vsel %vm5280_vm4, nan, %v5290_v30  ;;  %v5351_v32 = vsel %vm5349_vm5, %v5350_v10, %v10079_v19  ;;  %vm5183_vm11 = vcmp.eq.s32.totalorder %v5178_v9, 2 }
 0xfb0   : > { %v5452_v36 = vadd.s32 %v10005_v5, %v10011_v34  ;;  %v5352_v44 = vadd.s32 %v5351_v32, %v5347_v25  ;;  %vm5180_vm12 = vcmp.eq.s32.totalorder %v5178_v9, 0  ;;  %vm5179_vm2 = vcmp.lt.s32.totalorder %v5178_v9, 2  ;;  %v6144_v9 = vld [vmem:[%s10293_s2 + $0x178] sm:$0xff] }
 0xfb1   : > { %v7195_v62 = vpop.eup %7194  ;;  %v5474_v22 = vshll.u32 %v5473_v40, 23  ;;  %vm5176_vm8 = vweird.f32 %v9856_v58  ;;  %v5469_v4 = vshll.u32 %v10051_v21, %v5467_v39  ;;  %vm5398_vm3 = vcmp.lt.s32.totalorder %v9868_v14, 0 }
 0xfb2   : > { %v7197_v33 = vpop.eup %7196  ;;  %v5184_v17 = vxor.u32 2147483648, %v7195_v62  ;;  %v5470_v8 = vshrl.u32 %v5452_v36, %v5468_v29  ;;  %v5353_v50 = vadd.s32 536870912, %v5352_v44  ;;  %v5348_v7 = vadd.s32 %v10078_v61, %v10088_v42 }
 0xfb3   : > { %v5181_v47 = vxor.u32 2147483648, %v7197_v33  ;;  %v5475_v37 = vor.u32 4788187, %v5474_v22  ;;  %v10412_v52 = vand.u32 2147483647, %v9868_v14  ;;  %v5482_v29 = vsub.s32 4, %v10041_v57 }
 0xfb4   : > { %v5185_v56 = vsel %vm5183_vm11, %v5184_v17, %v7197_v33  ;;  %v5354_v46 = vshrl.u32 %v5353_v50, 30  ;;  %v5471_v0 = vor.u32 %v5470_v8, %v5469_v4  ;;  %vm5294_vm7 = vcmp.lt.s32.totalorder %v9875_v11, 0 }
 0xfb5   : > { %v5182_v31 = vsel %vm5180_vm12, %v7195_v62, %v5181_v47  ;;  %v5476_v34 = vand.u32 2147483647, %v5475_v37  ;;  %vm10107_vm6 = vcmp.le.f32.partialorder %v10412_v52, 0.7853982  ;;  %v5483_v33 = vsel %vm5398_vm3, %v5482_v29, %v10041_v57  ;;  %v6143_v52 = vld [vmem:[%s10293_s2 + $0x170] sm:$0xff] }
 0xfb6   : > { %v5186_v2 = vsel %vm5179_vm2, %v5182_v31, %v5185_v56  ;;  %v5355_v5 = vshll.u32 %v5354_v46, 30  ;;  %v5478_v48 = vcvt.s32.f32 %v5471_v0  ;;  %v5378_v17 = vsub.s32 4, %v5354_v46 }
 0xfb7   : > { %v5187_v27 = vsel %vm5176_vm8, nan, %v5186_v2  ;;  %v5485_v36 = vsel %vm10107_vm6, 0, %v5483_v33  ;;  %vm5488_vm5 = vweird.f32 %v9868_v14  ;;  %vm5384_vm12 = vweird.f32 %v9875_v11 }
 0xfb8   : > { %v6755_v15 = vpack.c.bf16 %v5291_v16, %v5187_v27  ;;  %v5356_v63 = vsub.s32 %v5352_v44, %v5355_v5  ;;  %v5479_v18 = vmul.f32 %v5478_v48, %v5476_v34  ;;  %v10415_v44 = vand.u32 2147483647, %v9875_v11 }
 0xfb9   : > { %v5379_v56 = vsel %vm5294_vm7, %v5378_v17, %v5354_v46  ;;  %v5489_v8 = vadd.s32 3, %v5485_v36 }
 0xfba   : > { %6756 = vmatprep.subr.bf16.mxu1 %v6755_v15  ;;  %v5358_v24 = vsub.s32 0, %v5356_v63  ;;  %v5480_v43 = vxor.u32 2147483648, %v5479_v18  ;;  %vm5293_vm10 = vcmp.le.f32.partialorder %v10415_v44, 0.7853982 }
 0xfbb   : > { %6758 = vmatpush3.bf16.msra.mxu1 %v6755_v15  ;;  %v5381_v57 = vsel %vm5293_vm10, 0, %v5379_v56  ;;  %v5490_v4 = vand.u32 3, %v5489_v8 }
 0xfbc   : > { %v6130_v19 = vmin.u32 %v5358_v24, %v5356_v63  ;;  %v5481_v39 = vsel %vm5398_vm3, %v5480_v43, %v5479_v18  ;;  %v5385_v37 = vadd.s32 3, %v5381_v57 }
 0xfbd   : > { %v5484_v40 = vsel %vm10107_vm6, %v9868_v14, %v5481_v39  ;;  %vm5492_vm9 = vcmp.eq.s32.totalorder %v5490_v4, 0  ;;  %vm5495_vm13 = vcmp.eq.s32.totalorder %v5490_v4, 2  ;;  %vm5491_vm4 = vcmp.lt.s32.totalorder %v5490_v4, 2  ;;  %v6140_v14 = vld [vmem:[%s10293_s2 + $0x158] sm:$0xff] }
 0xfbe   : > { %v5360_v6 = vclz %v6130_v19  ;;  %7198 = vcosq.f32 %v5484_v40  ;;  %v5386_v0 = vand.u32 3, %v5385_v37 }
 0xfbf   : > { %7200 = vsinq.f32 %v5484_v40 }
 0xfc0   : > { %v6131_v58 = vadd.s32 4294967294, %v5360_v6  ;;  %vm5391_vm15 = vcmp.eq.s32.totalorder %v5386_v0, 2  ;;  %vm5388_vm0 = vcmp.eq.s32.totalorder %v5386_v0, 0  ;;  %vm5387_vm11 = vcmp.lt.s32.totalorder %v5386_v0, 2 }
 0xfc2   : > { %vm6132_vm14 = vcmp.lt.s32.totalorder %v6131_v58, 0 }
 0xfc3   : > { %v5363_v21 = vsel %vm6132_vm14, 0, %v6131_v58 }
 0xfc4   : > { %v5364_v60 = vsub.s32 32, %v5363_v21  ;;  %v5368_v55 = vsub.s32 4294967266, %v5363_v21  ;;  %v5365_v1 = vshll.u32 %v5356_v63, %v5363_v21 }
 0xfc6   : > { %v5366_v10 = vshrl.u32 %v5348_v7, %v5364_v60  ;;  %v5369_v30 = vadd.s32 127, %v5368_v55  ;;  %v6138_v7 = vld [vmem:[%s10293_s2 + $0x148] sm:$0xff]  ;;  %v6139_v60 = vld [vmem:[%s10293_s2 + $0x150] sm:$0xff] }
 0xfc7   : > { %v6142_v55 = vld [vmem:[%s10293_s2 + $0x168] sm:$0xff] }
 0xfc8   : > { %v5367_v16 = vor.u32 %v5366_v10, %v5365_v1  ;;  %v5370_v62 = vshll.u32 %v5369_v30, 23  ;;  %v7199_v31 = vpop.eup %7198  ;;  %v6567_v1 = vpop.f32.mrb[36].mxu1 }
 0xfc9   : > { %v7201_v2 = vpop.eup %7200  ;;  %v5496_v15 = vxor.u32 2147483648, %v7199_v31  ;;  %v4803_v10 = vadd.f32 %v6567_v1, %v9819_v12  ;;  %v4747_v30 = vpop.f32.mrb[37].mxu1 }
 0xfca   : > { %v5371_v61 = vor.u32 4788187, %v5370_v62  ;;  %v5374_v25 = vcvt.s32.f32 %v5367_v16  ;;  %v5493_v27 = vxor.u32 2147483648, %v7201_v2  ;;  %v4802_v40 = vadd.f32 %v9801_v59, %v4747_v30  ;;  %v6570_v16 = vpop.f32.mrb[38].mxu1 }
 0xfcb   : > { %v5497_v34 = vsel %vm5495_vm13, %v5496_v15, %v7201_v2  ;;  %6102 = vst [vmem:[%s7521_s15 + $0x88] sm:$0xff] %v4803_v10  ;;  %v4805_v62 = vadd.f32 %v6570_v16, %v9805_v35  ;;  %v4757_v29 = vpop.f32.mrb[39].mxu1 }
 0xfcc   : > { %v5372_v42 = vand.u32 2147483647, %v5371_v61  ;;  %v5494_v5 = vsel %vm5492_vm9, %v7199_v31, %v5493_v27  ;;  %6101 = vst [vmem:[%s7521_s15 + $0x80] sm:$0xff] %v4802_v40  ;;  %v4804_v61 = vadd.f32 %v9821_v45, %v4757_v29 }
 0xfcd   : > { %v5498_v24 = vsel %vm5491_vm4, %v5494_v5, %v5497_v34  ;;  %6104 = vst [vmem:[%s7521_s15 + $0x98] sm:$0xff] %v4805_v62 }
 0xfce   : > { %v5375_v32 = vmul.f32 %v5374_v25, %v5372_v42  ;;  %v5499_v43 = vsel %vm5488_vm5, nan, %v5498_v24  ;;  %6103 = vst [vmem:[%s7521_s15 + $0x90] sm:$0xff] %v4804_v61 }
 0xfd0   : > { %v5376_v22 = vxor.u32 2147483648, %v5375_v32 }
 0xfd2   : > { %v5377_v47 = vsel %vm5294_vm7, %v5376_v22, %v5375_v32 }
 0xfd3   : > { %v5380_v50 = vsel %vm5293_vm10, %v9875_v11, %v5377_v47  ;;  %v6141_v11 = vld [vmem:[%s10293_s2 + $0x160] sm:$0xff] }
 0xfd4   : > { %7202 = vcosq.f32 %v5380_v50 }
 0xfd5   : > { %7204 = vsinq.f32 %v5380_v50 }
 0xfde   : > { %v7203_v63 = vpop.eup %7202 }
 0xfdf   : > { %v7205_v46 = vpop.eup %7204  ;;  %v5392_v48 = vxor.u32 2147483648, %v7203_v63 }
 0xfe0   : > { %v5389_v18 = vxor.u32 2147483648, %v7205_v46 }
 0xfe1   : > { %v5393_v19 = vsel %vm5391_vm15, %v5392_v48, %v7205_v46 }
 0xfe2   : > { %v5390_v6 = vsel %vm5388_vm0, %v7203_v63, %v5389_v18 }
 0xfe3   : > { %v5394_v58 = vsel %vm5387_vm11, %v5390_v6, %v5393_v19 }
 0xfe4   : > { %v5395_v21 = vsel %vm5384_vm12, nan, %v5394_v58 }
 0xfe5   : > { %v6759_v39 = vpack.c.bf16 %v5499_v43, %v5395_v21 }
 0xfe7   : > { %6760 = vmatprep.subr.bf16.mxu1 %v6759_v39 }
 0xfe8   : > { %6762 = vmatpush3.bf16.msra.mxu1 %v6759_v39 }
 0xfeb   : > { %6608 = vmatmul.mubr.msk.f32.vlgmr.msra.gmra.mrb[40].mxu1 %vm406_vm1, %v6138_v7 }
 0xfec   : > { %6610 = vmatprep.mubr.msk.f32.mxu1 %vm406_vm1, %v6139_v60 }
 0xfef   : > { %6611 = vmatmul.mubr.msk.f32.gmra.mrb[42].mxu1 %vm406_vm1, %v6140_v14 }
 0xff0   : > { %6613 = vmatprep.mubr.msk.f32.mxu1 %vm406_vm1, %v6141_v11 }
 0xff3   : > { %6614 = vmatmul.mubr.msk.f32.gmra.mrb[44].mxu1 %vm406_vm1, %v6142_v55 }
 0xff4   : > { %6616 = vmatprep.mubr.msk.f32.mxu1 %vm406_vm1, %v6143_v52 }
 0xff7   : > { %6617 = vmatmul.mubr.msk.f32.gmra.mrb[46].mxu1 %vm406_vm1, %v6144_v9 }
0x10be   : > { %v6609_v42 = vpop.f32.mrb[40].mxu1 }
0x10bf   : > { %v5655_v12 = vadd.f32 %v6609_v42, %v9803_v26  ;;  %v5599_v25 = vpop.f32.mrb[41].mxu1 }
0x10c0   : > { %v5654_v59 = vadd.f32 %v9790_v3, %v5599_v25 }
0x10c1   : > { %v5684_v33 = vadd.f32 %v5655_v12, %v9577_v13 }
0x10c2   : > { %v5683_v35 = vadd.f32 %v5654_v59, %v9579_v38  ;;  %v6612_v32 = vpop.f32.mrb[42].mxu1 }
0x10c3   : > { %v5688_v45 = vmul.f32 0.5, %v5684_v33  ;;  %v5657_v17 = vadd.f32 %v6612_v32, %v9794_v28  ;;  %v5609_v36 = vpop.f32.mrb[43].mxu1 }
0x10c4   : > { %v5687_v22 = vmul.f32 0.5, %v5683_v35  ;;  %v5656_v26 = vadd.f32 %v9807_v51, %v5609_v36 }
0x10c5   : > { %5692 = vst [vmem:[%s7519_s14 + $0x8] sm:$0xff] %v5688_v45  ;;  %v5686_v13 = vadd.f32 %v5657_v17, %v9589_v41 }
0x10c6   : > { %5691 = vst [vmem:[%s7519_s14] sm:$0xff] %v5687_v22  ;;  %v5685_v38 = vadd.f32 %v5656_v26, %v9591_v53  ;;  %v6615_v3 = vpop.f32.mrb[44].mxu1 }
0x10c7   : > { %v5690_v28 = vmul.f32 0.5, %v5686_v13  ;;  %v5675_v51 = vadd.f32 %v6615_v3, %v9809_v23  ;;  %v5619_v44 = vpop.f32.mrb[45].mxu1 }
0x10c8   : > { %v5689_v41 = vmul.f32 0.5, %v5685_v38  ;;  %v5674_v53 = vadd.f32 %v9823_v54, %v5619_v44 }
0x10c9   : > { %5694 = vst [vmem:[%s7519_s14 + $0x18] sm:$0xff] %v5690_v28  ;;  %6154 = vst [vmem:[%s7521_s15 + $0xa8] sm:$0xff] %v5675_v51 }
0x10ca   : > { %5693 = vst [vmem:[%s7519_s14 + $0x10] sm:$0xff] %v5689_v41  ;;  %6153 = vst [vmem:[%s7521_s15 + $0xa0] sm:$0xff] %v5674_v53  ;;  %v6618_v47 = vpop.f32.mrb[46].mxu1 }
0x10cb   : > { %v5677_v23 = vadd.f32 %v6618_v47, %v9827_v49  ;;  %v5629_v56 = vpop.f32.mrb[47].mxu1 }
0x10cc   : > { %7247 = shalt.err (!%p7244_p10)
}
0x10cd   : > { %s7248_s14 = scalar_lea.hbm %s10185_s30, 512  ;;  %s7252_s13 = scalar_lea.hbm %s10295_s4, 2048 }
0x10ce   : > { %p7249_p11 = scmp.ne.s32.totalorder %s10185_s30, %s7248_s14  ;;  %p7253_p0 = scmp.lt.u32.totalorder %s10185_s30, %s10295_s4 }
0x10cf   : > { %p7254_p1 = scmp.lt.u32.totalorder %s7252_s13, %s7248_s14  ;;  %p7256_p3 = scmp.lt.u32.totalorder %s7248_s14, %s10185_s30 }
0x10d0   : > { %p7250_p12 = pnand %p7249_p11, %p7487_p8 }
0x10d1   : > { %p7255_p2 = por %p7254_p1, %p7253_p0 }
0x10d2   : > { %p7251_p13 = pneg %p7250_p12 }
0x10d3   : > { %p7257_p4 = por %p7256_p3, %p7255_p2 }
0x10d5   : > { %p7258_p5 = pnand %p7257_p4, %p7251_p13 }
0x10d7   : > { %7261 = shalt.err (!%p7258_p5)
}
0x10d8   : > { %s7393_s27 = smov 128   ;;  %s7394_s17 = smov 256   ;;  %v5676_v54 = vadd.f32 %v9825_v20, %v5629_v56  ;;  %6156 = vst [vmem:[%s7521_s15 + $0xb8] sm:$0xff] %v5677_v23 }
0x10d9   : > { %s7395_s11 = smov 8   ;;  %s10228_s16 = scalar_lea.hbm %s10296_s5, %s6160_s21 }
0x10da   : > { %6885 = dma.vmem_to_hbm [thread:$0]  (%p7487_p8), %s10176_s26, 512, %s10185_s30, %s5696_s9, %s7393_s27, %s7394_s17, %s7395_s11  }
0x10db   : > { %s10416_s13 = sshll.u32 %s7521_s15, 4  ;;  %6155 = vst [vmem:[%s7521_s15 + $0xb0] sm:$0xff] %v5676_v54  ;;  %s5701_s0 = scalar_lea.sflag [#allocation7], %s7513_s6  ;;  %s10232_s13 = int_to_ptr.vmem [resolvable:$true] %s10416_s13 }
0x10dc   : > { %s7262_s1 = scalar_lea.vmem %s10232_s13, 3072  ;;  %s7396_s26 = smov [#allocation6]  }
0x10dd   : > { %p7263_p6 = scmp.ne.s32.totalorder %s10232_s13, %s7262_s1  ;;  %s7266_s22 = sshll.u32 %s7396_s26, 4  ;;  %s7267_s22 = int_to_ptr.vmem [resolvable:$false] %s7266_s22 }
0x10de   : > { %s7268_s30 = scalar_lea.vmem %s7267_s22, 6144  ;;  %p7269_p11 = scmp.lt.s32.totalorder %s10232_s13, %s7267_s22 }
0x10df   : > { %p7264_p7 = pnand %p7263_p6, %p7487_p8  ;;  %p7270_p12 = scmp.lt.s32.totalorder %s7268_s30, %s7262_s1 }
0x10e1   : > { %p7265_p10 = pneg %p7264_p7  ;;  %p7271_p13 = por %p7270_p12, %p7269_p11 }
0x10e3   : > { %p7272_p0 = pnand %p7271_p13, %p7265_p10 }
0x10e5   : > { %7275 = shalt.err (!%p7272_p0)
}
0x10e6   : > { %s7276_s15 = scalar_lea.hbm %s10228_s16, 3072  ;;  %s7280_s14 = scalar_lea.hbm %s10296_s5, 12288 }
0x10e7   : > { %p7277_p1 = scmp.ne.s32.totalorder %s10228_s16, %s7276_s15  ;;  %p7281_p4 = scmp.lt.u32.totalorder %s10228_s16, %s10296_s5 }
0x10e8   : > { %p7282_p5 = scmp.lt.u32.totalorder %s7280_s14, %s7276_s15  ;;  %p7284_p7 = scmp.lt.u32.totalorder %s7276_s15, %s10228_s16 }
0x10e9   : > { %p7278_p2 = pnand %p7277_p1, %p7487_p8 }
0x10ea   : > { %p7283_p6 = por %p7282_p5, %p7281_p4 }
0x10eb   : > { %p7279_p3 = pneg %p7278_p2 }
0x10ec   : > { %p7285_p10 = por %p7284_p7, %p7283_p6 }
0x10ee   : > { %p7286_p11 = pnand %p7285_p10, %p7279_p3 }
0x10f0   : > { %7289 = shalt.err (!%p7286_p11)
}
0x10f1   : > { %6886 = dma.vmem_to_hbm [thread:$0]  (%p7487_p8), %s10232_s13, 3072, %s10228_s16, %s5701_s0, %s7393_s27, %s7394_s17, %s7395_s11  }
0x10f2 PF: > { %p6896_p12 = scmp.ge.s32.totalorder %s7360_s25, 2  ;;  %s5747_s1 = sand.u32 1, %s7332_s18  }
0x10f3   : > { %s5748_s22 = scalar_lea.sflag [#allocation5], %s5747_s1 }
0x10f4   : > { %p6890_p13 = pnand %p6896_p12, %p7491_p9 }
0x10f6   : > { %7323 = dma.done.wait (!%p6890_p13), %s5748_s22, 512  }
0x10f7   : > { %7325 = vsyncadd (!%p6890_p13), %s5748_s22, 4294966784  ;;  %s5757_s7 = scalar_lea.sflag [#allocation7], %s5747_s1 }
0x10f8   : > { %7327 = dma.done.wait (!%p6890_p13), %s5757_s7, 3072  }
0x10f9   : > { %7329 = vsyncadd (!%p6890_p13), %s5757_s7, 4294964224  ;;  %s22_s25 = sadd.s32 1, %s7360_s25   ;;  %s10417_s18 = smov %s7336_s19 }
0x10fa   : > { %p19_p0 = scmp.ge.s32.totalorder %s22_s25, 6   ;;  %s10418_s19 = smov %s7340_s20 }
0x10fb   : > { %s10419_s20 = smov %s7499_s12  ;;  %s10420_s21 = smov %s7352_s23 }
0x10fc   : > { %s10421_s22 = smov %s7356_s24  ;;  %s10422_s23 = smov %s10425_s28 }
0x10fd   : > { %s10423_s24 = smov %s10429_s29  ;;  %21 = sbr.rel (!%p19_p0) target bundleno = 10 (0xa), region = 161 }
0x1104   :  { %5762 = vsyncpa [#allocation5], 1 }
0x1105   :  { %5764 = vsyncpa [#allocation5 + $0x1], 1 }
0x1106   :  { %5765 = vsyncpa [#allocation7], 1 }
0x1107   :  { %5767 = vsyncpa [#allocation7 + $0x1], 1 }

</bundles_post_ra>
